<compile_context>
chip_gen: v7x
topology: tpu7x:2x2x1
jax: 0.10.0
libtpu: 0.0.40
codegen_flags: <defaults>
</compile_context>

<pallas_src>
import math

import jax
import jax.numpy as jnp
from jax.experimental import pallas as pl
from jax.experimental.pallas import tpu as pltpu  # noqa: F401  (TPU backend)


# ------------------------- Fused LSTM-stack + fc kernel -----------------------
def _lstm_stack_fc_kernel(x_ref, wih0_ref, wih_ref, whh_ref, b_ref,
                          fcw_ref, fcb_ref, out_ref):
    """All LSTM layers + fc head, fully resident in VMEM.

    x_ref   : (T*B, D)        time-major; rows [t*B, (t+1)*B) are timestep t
    wih0_ref: (D, 4H)         layer-0 W_ih^T
    wih_ref : (NL-1, H, 4H)   W_ih^T for layers 1..NL-1
    whh_ref : (NL, H, 4H)     W_hh^T for all layers
    b_ref   : (NL, 1, 4H)     fused bias (b_ih + b_hh) per layer
    fcw_ref : (1, H)          fc weight
    fcb_ref : (1, 1)          fc bias
    out_ref : (B, 1)          fc(final hidden of last layer)
    """
    NL = whh_ref.shape[0]
    H = whh_ref.shape[1]
    B = out_ref.shape[0]
    T = x_ref.shape[0] // B

    prev = x_ref[...]                                   # (T*B, D_in) layer input
    h = jnp.zeros((B, H), jnp.float32)

    for l in range(NL):                                 # layers: fully unrolled
        w_in = wih0_ref[...] if l == 0 else wih_ref[l - 1]   # (D_in, 4H)
        w_hh = whh_ref[l]                                    # (H, 4H)

        # Hoisted input projection: one MXU matmul covering every timestep,
        # off the serial recurrence path; bias folded in.
        xproj = jnp.dot(prev, w_in,
                        preferred_element_type=jnp.float32) + b_ref[l]  # (T*B, 4H)

        h = jnp.zeros((B, H), jnp.float32)
        c = jnp.zeros((B, H), jnp.float32)
        hs = []
        for t in range(T):                              # time: fully unrolled
            gates = (jnp.dot(h, w_hh, preferred_element_type=jnp.float32)
                     + xproj[t * B:(t + 1) * B])         # (B, 4H), aligned slice
            i = jax.nn.sigmoid(gates[:, 0 * H:1 * H])    # input gate
            f = jax.nn.sigmoid(gates[:, 1 * H:2 * H])    # forget gate
            g = jnp.tanh(gates[:, 2 * H:3 * H])          # cell candidate
            o = jax.nn.sigmoid(gates[:, 3 * H:4 * H])    # output gate
            c = f * c + i * g
            h = o * jnp.tanh(c)
            if l < NL - 1:
                hs.append(h)
        if l < NL - 1:
            prev = jnp.concatenate(hs, axis=0)          # (T*B, H) next-layer input

    # fc(hidden_last): VPU multiply + lane reduce, single (B, 1) write.
    out_ref[...] = (jnp.sum(h * fcw_ref[...], axis=-1, keepdims=True)
                    + fcb_ref[...])


# ------------------------------ Parameter init --------------------------------
def init_model(key, input_dim, hidden_dim, num_layers):
    """Params for lstm1/lstm2/lstm3 (num_layers each) + fc, pre-transposed."""
    NL = 3 * num_layers
    k = 1.0 / math.sqrt(hidden_dim)
    wih0_T = None
    wih_T, whh_T, biases = [], [], []
    for layer in range(NL):
        d_in = input_dim if layer == 0 else hidden_dim
        key, k1, k2, k3, k4 = jax.random.split(key, 5)
        w_ih = jax.random.uniform(k1, (4 * hidden_dim, d_in), jnp.float32, -k, k)
        w_hh = jax.random.uniform(k2, (4 * hidden_dim, hidden_dim), jnp.float32, -k, k)
        b_ih = jax.random.uniform(k3, (4 * hidden_dim,), jnp.float32, -k, k)
        b_hh = jax.random.uniform(k4, (4 * hidden_dim,), jnp.float32, -k, k)
        if layer == 0:
            wih0_T = w_ih.T                              # (D, 4H)
        else:
            wih_T.append(w_ih.T)                         # (H, 4H)
        whh_T.append(w_hh.T)                             # (H, 4H)
        biases.append((b_ih + b_hh).reshape(1, 4 * hidden_dim))

    # fc: kaiming_uniform_ weight (a=0, fan_in, leaky_relu), zero bias.
    key, kw = jax.random.split(key)
    bound = math.sqrt(6.0 / hidden_dim)
    fc_w = jax.random.uniform(kw, (1, hidden_dim), jnp.float32, -bound, bound)
    fc_b = jnp.zeros((1, 1), jnp.float32)
    return {
        "wih0_T": wih0_T,                 # (D, 4H)
        "wih_T": jnp.stack(wih_T),        # (NL-1, H, 4H)
        "whh_T": jnp.stack(whh_T),        # (NL, H, 4H)
        "b": jnp.stack(biases),           # (NL, 1, 4H)
        "fc_w": fc_w,                     # (1, H)
        "fc_b": fc_b,                     # (1, 1)
    }


# ---------------------------------- Forward -----------------------------------
def lstm_model_forward(params, x):
    """x: (B, T, input_dim), batch_first (PyTorch convention). Returns (B, 1)."""
    B, T, D = x.shape
    pad = (-B) % 8                        # pad batch to fill the 8 sublanes
    if pad:
        x = jnp.concatenate([x, jnp.zeros((pad, T, D), x.dtype)], axis=0)
    Bp = B + pad
    # batch_first -> time-major, flattened: rows [t*Bp, (t+1)*Bp) = timestep t
    x_flat = jnp.transpose(x, (1, 0, 2)).reshape(T * Bp, D)

    y = pl.pallas_call(
        _lstm_stack_fc_kernel,
        out_shape=jax.ShapeDtypeStruct((Bp, 1), jnp.float32),
    )(x_flat, params["wih0_T"], params["wih_T"], params["whh_T"],
      params["b"], params["fc_w"], params["fc_b"])
    return y[:B]


# ------------------------------------ Main ------------------------------------
if __name__ == "__main__":
    INPUT_DIM, HIDDEN_DIM, NUM_LAYERS = 4, 32, 2
    B, T = 4, 8

    key = jax.random.PRNGKey(0)
    key, xkey = jax.random.split(key)
    params = init_model(key, INPUT_DIM, HIDDEN_DIM, NUM_LAYERS)
    x = jax.random.normal(xkey, (B, T, INPUT_DIM), jnp.float32)

    y = jax.jit(lstm_model_forward)(params, x)
    jax.block_until_ready(y)
    assert y.shape == (B, 1)
    print("KERNEL_OK")
</pallas_src>

<mosaic_0001>
module attributes {stable_mosaic.version = 11 : i64} {
  func.func @_lstm_stack_fc_kernel(%arg0: memref<64x4xf32, #tpu.memory_space<vmem>>, %arg1: memref<4x128xf32, #tpu.memory_space<vmem>>, %arg2: memref<5x32x128xf32, #tpu.memory_space<vmem>>, %arg3: memref<6x32x128xf32, #tpu.memory_space<vmem>>, %arg4: memref<6x1x128xf32, #tpu.memory_space<vmem>>, %arg5: memref<1x32xf32, #tpu.memory_space<vmem>>, %arg6: memref<1x1xf32, #tpu.memory_space<vmem>>, %arg7: memref<8x1xf32, #tpu.memory_space<vmem>>) attributes {dimension_semantics = [], scalar_prefetch = 0 : i64, scratch_operands = 0 : i64, tpu.core_type = #tpu.core_type<tc>} {
    %c0 = arith.constant 0 : index
    %c0_0 = arith.constant 0 : index
    %0 = vector.load %arg0[%c0, %c0_0] : memref<64x4xf32, #tpu.memory_space<vmem>>, vector<64x4xf32>
    %c0_1 = arith.constant 0 : index
    %c0_2 = arith.constant 0 : index
    %1 = vector.load %arg1[%c0_1, %c0_2] : memref<4x128xf32, #tpu.memory_space<vmem>>, vector<4x128xf32>
    %c0_3 = arith.constant 0 : index
    %c0_4 = arith.constant 0 : index
    %c0_5 = arith.constant 0 : index
    %2 = vector.load %arg3[%c0_3, %c0_4, %c0_5] : memref<6x32x128xf32, #tpu.memory_space<vmem>>, vector<1x32x128xf32>
    %3 = vector.shape_cast %2 : vector<1x32x128xf32> to vector<32x128xf32>
    %cst = arith.constant dense<0.000000e+00> : vector<64x128xf32>
    %4 = tpu.matmul %0, %1, %cst {dimension_numbers = #tpu.dot_dimension_numbers<[1], [0], [0], [1], [0, 0, 1, 1], [], []>} : vector<64x4xf32>, vector<4x128xf32>, vector<64x128xf32> -> vector<64x128xf32>
    %c0_6 = arith.constant 0 : index
    %c0_7 = arith.constant 0 : index
    %c0_8 = arith.constant 0 : index
    %5 = vector.load %arg4[%c0_6, %c0_7, %c0_8] : memref<6x1x128xf32, #tpu.memory_space<vmem>>, vector<1x1x128xf32>
    %6 = vector.shape_cast %5 : vector<1x1x128xf32> to vector<1x128xf32>
    %7 = vector.broadcast %6 : vector<1x128xf32> to vector<64x128xf32>
    %8 = arith.addf %4, %7 : vector<64x128xf32>
    %cst_9 = arith.constant 0.000000e+00 : f32
    %9 = vector.broadcast %cst_9 : f32 to vector<8x32xf32>
    %cst_10 = arith.constant 0.000000e+00 : f32
    %10 = vector.broadcast %cst_10 : f32 to vector<8x32xf32>
    %cst_11 = arith.constant dense<0.000000e+00> : vector<8x128xf32>
    %11 = tpu.matmul %9, %3, %cst_11 {dimension_numbers = #tpu.dot_dimension_numbers<[1], [0], [0], [1], [0, 0, 1, 1], [], []>} : vector<8x32xf32>, vector<32x128xf32>, vector<8x128xf32> -> vector<8x128xf32>
    %12 = vector.extract_strided_slice %8 {offsets = [0, 0], sizes = [8, 128], strides = [1, 1]} : vector<64x128xf32> to vector<8x128xf32>
    %13 = arith.addf %11, %12 : vector<8x128xf32>
    %14 = vector.extract_strided_slice %13 {offsets = [0, 0], sizes = [8, 32], strides = [1, 1]} : vector<8x128xf32> to vector<8x32xf32>
    %15 = arith.negf %14 : vector<8x32xf32>
    %16 = math.exp %15 : vector<8x32xf32>
    %cst_12 = arith.constant 1.000000e+00 : f32
    %17 = vector.broadcast %cst_12 : f32 to vector<8x32xf32>
    %18 = arith.addf %17, %16 : vector<8x32xf32>
    %19 = arith.divf %17, %18 : vector<8x32xf32>
    %20 = vector.extract_strided_slice %13 {offsets = [0, 32], sizes = [8, 32], strides = [1, 1]} : vector<8x128xf32> to vector<8x32xf32>
    %21 = arith.negf %20 : vector<8x32xf32>
    %22 = math.exp %21 : vector<8x32xf32>
    %cst_13 = arith.constant 1.000000e+00 : f32
    %23 = vector.broadcast %cst_13 : f32 to vector<8x32xf32>
    %24 = arith.addf %23, %22 : vector<8x32xf32>
    %25 = arith.divf %23, %24 : vector<8x32xf32>
    %26 = vector.extract_strided_slice %13 {offsets = [0, 64], sizes = [8, 32], strides = [1, 1]} : vector<8x128xf32> to vector<8x32xf32>
    %27 = math.tanh %26 : vector<8x32xf32>
    %28 = vector.extract_strided_slice %13 {offsets = [0, 96], sizes = [8, 32], strides = [1, 1]} : vector<8x128xf32> to vector<8x32xf32>
    %29 = arith.negf %28 : vector<8x32xf32>
    %30 = math.exp %29 : vector<8x32xf32>
    %cst_14 = arith.constant 1.000000e+00 : f32
    %31 = vector.broadcast %cst_14 : f32 to vector<8x32xf32>
    %32 = arith.addf %31, %30 : vector<8x32xf32>
    %33 = arith.divf %31, %32 : vector<8x32xf32>
    %34 = arith.mulf %25, %10 : vector<8x32xf32>
    %35 = arith.mulf %19, %27 : vector<8x32xf32>
    %36 = arith.addf %34, %35 : vector<8x32xf32>
    %37 = math.tanh %36 : vector<8x32xf32>
    %38 = arith.mulf %33, %37 : vector<8x32xf32>
    %cst_15 = arith.constant dense<0.000000e+00> : vector<8x128xf32>
    %39 = tpu.matmul %38, %3, %cst_15 {dimension_numbers = #tpu.dot_dimension_numbers<[1], [0], [0], [1], [0, 0, 1, 1], [], []>} : vector<8x32xf32>, vector<32x128xf32>, vector<8x128xf32> -> vector<8x128xf32>
    %40 = vector.extract_strided_slice %8 {offsets = [8, 0], sizes = [8, 128], strides = [1, 1]} : vector<64x128xf32> to vector<8x128xf32>
    %41 = arith.addf %39, %40 : vector<8x128xf32>
    %42 = vector.extract_strided_slice %41 {offsets = [0, 0], sizes = [8, 32], strides = [1, 1]} : vector<8x128xf32> to vector<8x32xf32>
    %43 = arith.negf %42 : vector<8x32xf32>
    %44 = math.exp %43 : vector<8x32xf32>
    %cst_16 = arith.constant 1.000000e+00 : f32
    %45 = vector.broadcast %cst_16 : f32 to vector<8x32xf32>
    %46 = arith.addf %45, %44 : vector<8x32xf32>
    %47 = arith.divf %45, %46 : vector<8x32xf32>
    %48 = vector.extract_strided_slice %41 {offsets = [0, 32], sizes = [8, 32], strides = [1, 1]} : vector<8x128xf32> to vector<8x32xf32>
    %49 = arith.negf %48 : vector<8x32xf32>
    %50 = math.exp %49 : vector<8x32xf32>
    %cst_17 = arith.constant 1.000000e+00 : f32
    %51 = vector.broadcast %cst_17 : f32 to vector<8x32xf32>
    %52 = arith.addf %51, %50 : vector<8x32xf32>
    %53 = arith.divf %51, %52 : vector<8x32xf32>
    %54 = vector.extract_strided_slice %41 {offsets = [0, 64], sizes = [8, 32], strides = [1, 1]} : vector<8x128xf32> to vector<8x32xf32>
    %55 = math.tanh %54 : vector<8x32xf32>
    %56 = vector.extract_strided_slice %41 {offsets = [0, 96], sizes = [8, 32], strides = [1, 1]} : vector<8x128xf32> to vector<8x32xf32>
    %57 = arith.negf %56 : vector<8x32xf32>
    %58 = math.exp %57 : vector<8x32xf32>
    %cst_18 = arith.constant 1.000000e+00 : f32
    %59 = vector.broadcast %cst_18 : f32 to vector<8x32xf32>
    %60 = arith.addf %59, %58 : vector<8x32xf32>
    %61 = arith.divf %59, %60 : vector<8x32xf32>
    %62 = arith.mulf %53, %36 : vector<8x32xf32>
    %63 = arith.mulf %47, %55 : vector<8x32xf32>
    %64 = arith.addf %62, %63 : vector<8x32xf32>
    %65 = math.tanh %64 : vector<8x32xf32>
    %66 = arith.mulf %61, %65 : vector<8x32xf32>
    %cst_19 = arith.constant dense<0.000000e+00> : vector<8x128xf32>
    %67 = tpu.matmul %66, %3, %cst_19 {dimension_numbers = #tpu.dot_dimension_numbers<[1], [0], [0], [1], [0, 0, 1, 1], [], []>} : vector<8x32xf32>, vector<32x128xf32>, vector<8x128xf32> -> vector<8x128xf32>
    %68 = vector.extract_strided_slice %8 {offsets = [16, 0], sizes = [8, 128], strides = [1, 1]} : vector<64x128xf32> to vector<8x128xf32>
    %69 = arith.addf %67, %68 : vector<8x128xf32>
    %70 = vector.extract_strided_slice %69 {offsets = [0, 0], sizes = [8, 32], strides = [1, 1]} : vector<8x128xf32> to vector<8x32xf32>
    %71 = arith.negf %70 : vector<8x32xf32>
    %72 = math.exp %71 : vector<8x32xf32>
    %cst_20 = arith.constant 1.000000e+00 : f32
    %73 = vector.broadcast %cst_20 : f32 to vector<8x32xf32>
    %74 = arith.addf %73, %72 : vector<8x32xf32>
    %75 = arith.divf %73, %74 : vector<8x32xf32>
    %76 = vector.extract_strided_slice %69 {offsets = [0, 32], sizes = [8, 32], strides = [1, 1]} : vector<8x128xf32> to vector<8x32xf32>
    %77 = arith.negf %76 : vector<8x32xf32>
    %78 = math.exp %77 : vector<8x32xf32>
    %cst_21 = arith.constant 1.000000e+00 : f32
    %79 = vector.broadcast %cst_21 : f32 to vector<8x32xf32>
    %80 = arith.addf %79, %78 : vector<8x32xf32>
    %81 = arith.divf %79, %80 : vector<8x32xf32>
    %82 = vector.extract_strided_slice %69 {offsets = [0, 64], sizes = [8, 32], strides = [1, 1]} : vector<8x128xf32> to vector<8x32xf32>
    %83 = math.tanh %82 : vector<8x32xf32>
    %84 = vector.extract_strided_slice %69 {offsets = [0, 96], sizes = [8, 32], strides = [1, 1]} : vector<8x128xf32> to vector<8x32xf32>
    %85 = arith.negf %84 : vector<8x32xf32>
    %86 = math.exp %85 : vector<8x32xf32>
    %cst_22 = arith.constant 1.000000e+00 : f32
    %87 = vector.broadcast %cst_22 : f32 to vector<8x32xf32>
    %88 = arith.addf %87, %86 : vector<8x32xf32>
    %89 = arith.divf %87, %88 : vector<8x32xf32>
    %90 = arith.mulf %81, %64 : vector<8x32xf32>
    %91 = arith.mulf %75, %83 : vector<8x32xf32>
    %92 = arith.addf %90, %91 : vector<8x32xf32>
    %93 = math.tanh %92 : vector<8x32xf32>
    %94 = arith.mulf %89, %93 : vector<8x32xf32>
    %cst_23 = arith.constant dense<0.000000e+00> : vector<8x128xf32>
    %95 = tpu.matmul %94, %3, %cst_23 {dimension_numbers = #tpu.dot_dimension_numbers<[1], [0], [0], [1], [0, 0, 1, 1], [], []>} : vector<8x32xf32>, vector<32x128xf32>, vector<8x128xf32> -> vector<8x128xf32>
    %96 = vector.extract_strided_slice %8 {offsets = [24, 0], sizes = [8, 128], strides = [1, 1]} : vector<64x128xf32> to vector<8x128xf32>
    %97 = arith.addf %95, %96 : vector<8x128xf32>
    %98 = vector.extract_strided_slice %97 {offsets = [0, 0], sizes = [8, 32], strides = [1, 1]} : vector<8x128xf32> to vector<8x32xf32>
    %99 = arith.negf %98 : vector<8x32xf32>
    %100 = math.exp %99 : vector<8x32xf32>
    %cst_24 = arith.constant 1.000000e+00 : f32
    %101 = vector.broadcast %cst_24 : f32 to vector<8x32xf32>
    %102 = arith.addf %101, %100 : vector<8x32xf32>
    %103 = arith.divf %101, %102 : vector<8x32xf32>
    %104 = vector.extract_strided_slice %97 {offsets = [0, 32], sizes = [8, 32], strides = [1, 1]} : vector<8x128xf32> to vector<8x32xf32>
    %105 = arith.negf %104 : vector<8x32xf32>
    %106 = math.exp %105 : vector<8x32xf32>
    %cst_25 = arith.constant 1.000000e+00 : f32
    %107 = vector.broadcast %cst_25 : f32 to vector<8x32xf32>
    %108 = arith.addf %107, %106 : vector<8x32xf32>
    %109 = arith.divf %107, %108 : vector<8x32xf32>
    %110 = vector.extract_strided_slice %97 {offsets = [0, 64], sizes = [8, 32], strides = [1, 1]} : vector<8x128xf32> to vector<8x32xf32>
    %111 = math.tanh %110 : vector<8x32xf32>
    %112 = vector.extract_strided_slice %97 {offsets = [0, 96], sizes = [8, 32], strides = [1, 1]} : vector<8x128xf32> to vector<8x32xf32>
    %113 = arith.negf %112 : vector<8x32xf32>
    %114 = math.exp %113 : vector<8x32xf32>
    %cst_26 = arith.constant 1.000000e+00 : f32
    %115 = vector.broadcast %cst_26 : f32 to vector<8x32xf32>
    %116 = arith.addf %115, %114 : vector<8x32xf32>
    %117 = arith.divf %115, %116 : vector<8x32xf32>
    %118 = arith.mulf %109, %92 : vector<8x32xf32>
    %119 = arith.mulf %103, %111 : vector<8x32xf32>
    %120 = arith.addf %118, %119 : vector<8x32xf32>
    %121 = math.tanh %120 : vector<8x32xf32>
    %122 = arith.mulf %117, %121 : vector<8x32xf32>
    %cst_27 = arith.constant dense<0.000000e+00> : vector<8x128xf32>
    %123 = tpu.matmul %122, %3, %cst_27 {dimension_numbers = #tpu.dot_dimension_numbers<[1], [0], [0], [1], [0, 0, 1, 1], [], []>} : vector<8x32xf32>, vector<32x128xf32>, vector<8x128xf32> -> vector<8x128xf32>
    %124 = vector.extract_strided_slice %8 {offsets = [32, 0], sizes = [8, 128], strides = [1, 1]} : vector<64x128xf32> to vector<8x128xf32>
    %125 = arith.addf %123, %124 : vector<8x128xf32>
    %126 = vector.extract_strided_slice %125 {offsets = [0, 0], sizes = [8, 32], strides = [1, 1]} : vector<8x128xf32> to vector<8x32xf32>
    %127 = arith.negf %126 : vector<8x32xf32>
    %128 = math.exp %127 : vector<8x32xf32>
    %cst_28 = arith.constant 1.000000e+00 : f32
    %129 = vector.broadcast %cst_28 : f32 to vector<8x32xf32>
    %130 = arith.addf %129, %128 : vector<8x32xf32>
    %131 = arith.divf %129, %130 : vector<8x32xf32>
    %132 = vector.extract_strided_slice %125 {offsets = [0, 32], sizes = [8, 32], strides = [1, 1]} : vector<8x128xf32> to vector<8x32xf32>
    %133 = arith.negf %132 : vector<8x32xf32>
    %134 = math.exp %133 : vector<8x32xf32>
    %cst_29 = arith.constant 1.000000e+00 : f32
    %135 = vector.broadcast %cst_29 : f32 to vector<8x32xf32>
    %136 = arith.addf %135, %134 : vector<8x32xf32>
    %137 = arith.divf %135, %136 : vector<8x32xf32>
    %138 = vector.extract_strided_slice %125 {offsets = [0, 64], sizes = [8, 32], strides = [1, 1]} : vector<8x128xf32> to vector<8x32xf32>
    %139 = math.tanh %138 : vector<8x32xf32>
    %140 = vector.extract_strided_slice %125 {offsets = [0, 96], sizes = [8, 32], strides = [1, 1]} : vector<8x128xf32> to vector<8x32xf32>
    %141 = arith.negf %140 : vector<8x32xf32>
    %142 = math.exp %141 : vector<8x32xf32>
    %cst_30 = arith.constant 1.000000e+00 : f32
    %143 = vector.broadcast %cst_30 : f32 to vector<8x32xf32>
    %144 = arith.addf %143, %142 : vector<8x32xf32>
    %145 = arith.divf %143, %144 : vector<8x32xf32>
    %146 = arith.mulf %137, %120 : vector<8x32xf32>
    %147 = arith.mulf %131, %139 : vector<8x32xf32>
    %148 = arith.addf %146, %147 : vector<8x32xf32>
    %149 = math.tanh %148 : vector<8x32xf32>
    %150 = arith.mulf %145, %149 : vector<8x32xf32>
    %cst_31 = arith.constant dense<0.000000e+00> : vector<8x128xf32>
    %151 = tpu.matmul %150, %3, %cst_31 {dimension_numbers = #tpu.dot_dimension_numbers<[1], [0], [0], [1], [0, 0, 1, 1], [], []>} : vector<8x32xf32>, vector<32x128xf32>, vector<8x128xf32> -> vector<8x128xf32>
    %152 = vector.extract_strided_slice %8 {offsets = [40, 0], sizes = [8, 128], strides = [1, 1]} : vector<64x128xf32> to vector<8x128xf32>
    %153 = arith.addf %151, %152 : vector<8x128xf32>
    %154 = vector.extract_strided_slice %153 {offsets = [0, 0], sizes = [8, 32], strides = [1, 1]} : vector<8x128xf32> to vector<8x32xf32>
    %155 = arith.negf %154 : vector<8x32xf32>
    %156 = math.exp %155 : vector<8x32xf32>
    %cst_32 = arith.constant 1.000000e+00 : f32
    %157 = vector.broadcast %cst_32 : f32 to vector<8x32xf32>
    %158 = arith.addf %157, %156 : vector<8x32xf32>
    %159 = arith.divf %157, %158 : vector<8x32xf32>
    %160 = vector.extract_strided_slice %153 {offsets = [0, 32], sizes = [8, 32], strides = [1, 1]} : vector<8x128xf32> to vector<8x32xf32>
    %161 = arith.negf %160 : vector<8x32xf32>
    %162 = math.exp %161 : vector<8x32xf32>
    %cst_33 = arith.constant 1.000000e+00 : f32
    %163 = vector.broadcast %cst_33 : f32 to vector<8x32xf32>
    %164 = arith.addf %163, %162 : vector<8x32xf32>
    %165 = arith.divf %163, %164 : vector<8x32xf32>
    %166 = vector.extract_strided_slice %153 {offsets = [0, 64], sizes = [8, 32], strides = [1, 1]} : vector<8x128xf32> to vector<8x32xf32>
    %167 = math.tanh %166 : vector<8x32xf32>
    %168 = vector.extract_strided_slice %153 {offsets = [0, 96], sizes = [8, 32], strides = [1, 1]} : vector<8x128xf32> to vector<8x32xf32>
    %169 = arith.negf %168 : vector<8x32xf32>
    %170 = math.exp %169 : vector<8x32xf32>
    %cst_34 = arith.constant 1.000000e+00 : f32
    %171 = vector.broadcast %cst_34 : f32 to vector<8x32xf32>
    %172 = arith.addf %171, %170 : vector<8x32xf32>
    %173 = arith.divf %171, %172 : vector<8x32xf32>
    %174 = arith.mulf %165, %148 : vector<8x32xf32>
    %175 = arith.mulf %159, %167 : vector<8x32xf32>
    %176 = arith.addf %174, %175 : vector<8x32xf32>
    %177 = math.tanh %176 : vector<8x32xf32>
    %178 = arith.mulf %173, %177 : vector<8x32xf32>
    %cst_35 = arith.constant dense<0.000000e+00> : vector<8x128xf32>
    %179 = tpu.matmul %178, %3, %cst_35 {dimension_numbers = #tpu.dot_dimension_numbers<[1], [0], [0], [1], [0, 0, 1, 1], [], []>} : vector<8x32xf32>, vector<32x128xf32>, vector<8x128xf32> -> vector<8x128xf32>
    %180 = vector.extract_strided_slice %8 {offsets = [48, 0], sizes = [8, 128], strides = [1, 1]} : vector<64x128xf32> to vector<8x128xf32>
    %181 = arith.addf %179, %180 : vector<8x128xf32>
    %182 = vector.extract_strided_slice %181 {offsets = [0, 0], sizes = [8, 32], strides = [1, 1]} : vector<8x128xf32> to vector<8x32xf32>
    %183 = arith.negf %182 : vector<8x32xf32>
    %184 = math.exp %183 : vector<8x32xf32>
    %cst_36 = arith.constant 1.000000e+00 : f32
    %185 = vector.broadcast %cst_36 : f32 to vector<8x32xf32>
    %186 = arith.addf %185, %184 : vector<8x32xf32>
    %187 = arith.divf %185, %186 : vector<8x32xf32>
    %188 = vector.extract_strided_slice %181 {offsets = [0, 32], sizes = [8, 32], strides = [1, 1]} : vector<8x128xf32> to vector<8x32xf32>
    %189 = arith.negf %188 : vector<8x32xf32>
    %190 = math.exp %189 : vector<8x32xf32>
    %cst_37 = arith.constant 1.000000e+00 : f32
    %191 = vector.broadcast %cst_37 : f32 to vector<8x32xf32>
    %192 = arith.addf %191, %190 : vector<8x32xf32>
    %193 = arith.divf %191, %192 : vector<8x32xf32>
    %194 = vector.extract_strided_slice %181 {offsets = [0, 64], sizes = [8, 32], strides = [1, 1]} : vector<8x128xf32> to vector<8x32xf32>
    %195 = math.tanh %194 : vector<8x32xf32>
    %196 = vector.extract_strided_slice %181 {offsets = [0, 96], sizes = [8, 32], strides = [1, 1]} : vector<8x128xf32> to vector<8x32xf32>
    %197 = arith.negf %196 : vector<8x32xf32>
    %198 = math.exp %197 : vector<8x32xf32>
    %cst_38 = arith.constant 1.000000e+00 : f32
    %199 = vector.broadcast %cst_38 : f32 to vector<8x32xf32>
    %200 = arith.addf %199, %198 : vector<8x32xf32>
    %201 = arith.divf %199, %200 : vector<8x32xf32>
    %202 = arith.mulf %193, %176 : vector<8x32xf32>
    %203 = arith.mulf %187, %195 : vector<8x32xf32>
    %204 = arith.addf %202, %203 : vector<8x32xf32>
    %205 = math.tanh %204 : vector<8x32xf32>
    %206 = arith.mulf %201, %205 : vector<8x32xf32>
    %cst_39 = arith.constant dense<0.000000e+00> : vector<8x128xf32>
    %207 = tpu.matmul %206, %3, %cst_39 {dimension_numbers = #tpu.dot_dimension_numbers<[1], [0], [0], [1], [0, 0, 1, 1], [], []>} : vector<8x32xf32>, vector<32x128xf32>, vector<8x128xf32> -> vector<8x128xf32>
    %208 = vector.extract_strided_slice %8 {offsets = [56, 0], sizes = [8, 128], strides = [1, 1]} : vector<64x128xf32> to vector<8x128xf32>
    %209 = arith.addf %207, %208 : vector<8x128xf32>
    %210 = vector.extract_strided_slice %209 {offsets = [0, 0], sizes = [8, 32], strides = [1, 1]} : vector<8x128xf32> to vector<8x32xf32>
    %211 = arith.negf %210 : vector<8x32xf32>
    %212 = math.exp %211 : vector<8x32xf32>
    %cst_40 = arith.constant 1.000000e+00 : f32
    %213 = vector.broadcast %cst_40 : f32 to vector<8x32xf32>
    %214 = arith.addf %213, %212 : vector<8x32xf32>
    %215 = arith.divf %213, %214 : vector<8x32xf32>
    %216 = vector.extract_strided_slice %209 {offsets = [0, 32], sizes = [8, 32], strides = [1, 1]} : vector<8x128xf32> to vector<8x32xf32>
    %217 = arith.negf %216 : vector<8x32xf32>
    %218 = math.exp %217 : vector<8x32xf32>
    %cst_41 = arith.constant 1.000000e+00 : f32
    %219 = vector.broadcast %cst_41 : f32 to vector<8x32xf32>
    %220 = arith.addf %219, %218 : vector<8x32xf32>
    %221 = arith.divf %219, %220 : vector<8x32xf32>
    %222 = vector.extract_strided_slice %209 {offsets = [0, 64], sizes = [8, 32], strides = [1, 1]} : vector<8x128xf32> to vector<8x32xf32>
    %223 = math.tanh %222 : vector<8x32xf32>
    %224 = vector.extract_strided_slice %209 {offsets = [0, 96], sizes = [8, 32], strides = [1, 1]} : vector<8x128xf32> to vector<8x32xf32>
    %225 = arith.negf %224 : vector<8x32xf32>
    %226 = math.exp %225 : vector<8x32xf32>
    %cst_42 = arith.constant 1.000000e+00 : f32
    %227 = vector.broadcast %cst_42 : f32 to vector<8x32xf32>
    %228 = arith.addf %227, %226 : vector<8x32xf32>
    %229 = arith.divf %227, %228 : vector<8x32xf32>
    %230 = arith.mulf %221, %204 : vector<8x32xf32>
    %231 = arith.mulf %215, %223 : vector<8x32xf32>
    %232 = arith.addf %230, %231 : vector<8x32xf32>
    %233 = math.tanh %232 : vector<8x32xf32>
    %234 = arith.mulf %229, %233 : vector<8x32xf32>
    %235 = tpu.concatenate %38, %66, %94, %122, %150, %178, %206, %234 in 0 : vector<8x32xf32>, vector<8x32xf32>, vector<8x32xf32>, vector<8x32xf32>, vector<8x32xf32>, vector<8x32xf32>, vector<8x32xf32>, vector<8x32xf32> -> vector<64x32xf32>
    %c0_43 = arith.constant 0 : index
    %c0_44 = arith.constant 0 : index
    %c0_45 = arith.constant 0 : index
    %236 = vector.load %arg2[%c0_43, %c0_44, %c0_45] : memref<5x32x128xf32, #tpu.memory_space<vmem>>, vector<1x32x128xf32>
    %237 = vector.shape_cast %236 : vector<1x32x128xf32> to vector<32x128xf32>
    %c1 = arith.constant 1 : index
    %c0_46 = arith.constant 0 : index
    %c0_47 = arith.constant 0 : index
    %238 = vector.load %arg3[%c1, %c0_46, %c0_47] : memref<6x32x128xf32, #tpu.memory_space<vmem>>, vector<1x32x128xf32>
    %239 = vector.shape_cast %238 : vector<1x32x128xf32> to vector<32x128xf32>
    %cst_48 = arith.constant dense<0.000000e+00> : vector<64x128xf32>
    %240 = tpu.matmul %235, %237, %cst_48 {dimension_numbers = #tpu.dot_dimension_numbers<[1], [0], [0], [1], [0, 0, 1, 1], [], []>} : vector<64x32xf32>, vector<32x128xf32>, vector<64x128xf32> -> vector<64x128xf32>
    %c1_49 = arith.constant 1 : index
    %c0_50 = arith.constant 0 : index
    %c0_51 = arith.constant 0 : index
    %241 = vector.load %arg4[%c1_49, %c0_50, %c0_51] : memref<6x1x128xf32, #tpu.memory_space<vmem>>, vector<1x1x128xf32>
    %242 = vector.shape_cast %241 : vector<1x1x128xf32> to vector<1x128xf32>
    %243 = vector.broadcast %242 : vector<1x128xf32> to vector<64x128xf32>
    %244 = arith.addf %240, %243 : vector<64x128xf32>
    %cst_52 = arith.constant 0.000000e+00 : f32
    %245 = vector.broadcast %cst_52 : f32 to vector<8x32xf32>
    %cst_53 = arith.constant 0.000000e+00 : f32
    %246 = vector.broadcast %cst_53 : f32 to vector<8x32xf32>
    %cst_54 = arith.constant dense<0.000000e+00> : vector<8x128xf32>
    %247 = tpu.matmul %245, %239, %cst_54 {dimension_numbers = #tpu.dot_dimension_numbers<[1], [0], [0], [1], [0, 0, 1, 1], [], []>} : vector<8x32xf32>, vector<32x128xf32>, vector<8x128xf32> -> vector<8x128xf32>
    %248 = vector.extract_strided_slice %244 {offsets = [0, 0], sizes = [8, 128], strides = [1, 1]} : vector<64x128xf32> to vector<8x128xf32>
    %249 = arith.addf %247, %248 : vector<8x128xf32>
    %250 = vector.extract_strided_slice %249 {offsets = [0, 0], sizes = [8, 32], strides = [1, 1]} : vector<8x128xf32> to vector<8x32xf32>
    %251 = arith.negf %250 : vector<8x32xf32>
    %252 = math.exp %251 : vector<8x32xf32>
    %cst_55 = arith.constant 1.000000e+00 : f32
    %253 = vector.broadcast %cst_55 : f32 to vector<8x32xf32>
    %254 = arith.addf %253, %252 : vector<8x32xf32>
    %255 = arith.divf %253, %254 : vector<8x32xf32>
    %256 = vector.extract_strided_slice %249 {offsets = [0, 32], sizes = [8, 32], strides = [1, 1]} : vector<8x128xf32> to vector<8x32xf32>
    %257 = arith.negf %256 : vector<8x32xf32>
    %258 = math.exp %257 : vector<8x32xf32>
    %cst_56 = arith.constant 1.000000e+00 : f32
    %259 = vector.broadcast %cst_56 : f32 to vector<8x32xf32>
    %260 = arith.addf %259, %258 : vector<8x32xf32>
    %261 = arith.divf %259, %260 : vector<8x32xf32>
    %262 = vector.extract_strided_slice %249 {offsets = [0, 64], sizes = [8, 32], strides = [1, 1]} : vector<8x128xf32> to vector<8x32xf32>
    %263 = math.tanh %262 : vector<8x32xf32>
    %264 = vector.extract_strided_slice %249 {offsets = [0, 96], sizes = [8, 32], strides = [1, 1]} : vector<8x128xf32> to vector<8x32xf32>
    %265 = arith.negf %264 : vector<8x32xf32>
    %266 = math.exp %265 : vector<8x32xf32>
    %cst_57 = arith.constant 1.000000e+00 : f32
    %267 = vector.broadcast %cst_57 : f32 to vector<8x32xf32>
    %268 = arith.addf %267, %266 : vector<8x32xf32>
    %269 = arith.divf %267, %268 : vector<8x32xf32>
    %270 = arith.mulf %261, %246 : vector<8x32xf32>
    %271 = arith.mulf %255, %263 : vector<8x32xf32>
    %272 = arith.addf %270, %271 : vector<8x32xf32>
    %273 = math.tanh %272 : vector<8x32xf32>
    %274 = arith.mulf %269, %273 : vector<8x32xf32>
    %cst_58 = arith.constant dense<0.000000e+00> : vector<8x128xf32>
    %275 = tpu.matmul %274, %239, %cst_58 {dimension_numbers = #tpu.dot_dimension_numbers<[1], [0], [0], [1], [0, 0, 1, 1], [], []>} : vector<8x32xf32>, vector<32x128xf32>, vector<8x128xf32> -> vector<8x128xf32>
    %276 = vector.extract_strided_slice %244 {offsets = [8, 0], sizes = [8, 128], strides = [1, 1]} : vector<64x128xf32> to vector<8x128xf32>
    %277 = arith.addf %275, %276 : vector<8x128xf32>
    %278 = vector.extract_strided_slice %277 {offsets = [0, 0], sizes = [8, 32], strides = [1, 1]} : vector<8x128xf32> to vector<8x32xf32>
    %279 = arith.negf %278 : vector<8x32xf32>
    %280 = math.exp %279 : vector<8x32xf32>
    %cst_59 = arith.constant 1.000000e+00 : f32
    %281 = vector.broadcast %cst_59 : f32 to vector<8x32xf32>
    %282 = arith.addf %281, %280 : vector<8x32xf32>
    %283 = arith.divf %281, %282 : vector<8x32xf32>
    %284 = vector.extract_strided_slice %277 {offsets = [0, 32], sizes = [8, 32], strides = [1, 1]} : vector<8x128xf32> to vector<8x32xf32>
    %285 = arith.negf %284 : vector<8x32xf32>
    %286 = math.exp %285 : vector<8x32xf32>
    %cst_60 = arith.constant 1.000000e+00 : f32
    %287 = vector.broadcast %cst_60 : f32 to vector<8x32xf32>
    %288 = arith.addf %287, %286 : vector<8x32xf32>
    %289 = arith.divf %287, %288 : vector<8x32xf32>
    %290 = vector.extract_strided_slice %277 {offsets = [0, 64], sizes = [8, 32], strides = [1, 1]} : vector<8x128xf32> to vector<8x32xf32>
    %291 = math.tanh %290 : vector<8x32xf32>
    %292 = vector.extract_strided_slice %277 {offsets = [0, 96], sizes = [8, 32], strides = [1, 1]} : vector<8x128xf32> to vector<8x32xf32>
    %293 = arith.negf %292 : vector<8x32xf32>
    %294 = math.exp %293 : vector<8x32xf32>
    %cst_61 = arith.constant 1.000000e+00 : f32
    %295 = vector.broadcast %cst_61 : f32 to vector<8x32xf32>
    %296 = arith.addf %295, %294 : vector<8x32xf32>
    %297 = arith.divf %295, %296 : vector<8x32xf32>
    %298 = arith.mulf %289, %272 : vector<8x32xf32>
    %299 = arith.mulf %283, %291 : vector<8x32xf32>
    %300 = arith.addf %298, %299 : vector<8x32xf32>
    %301 = math.tanh %300 : vector<8x32xf32>
    %302 = arith.mulf %297, %301 : vector<8x32xf32>
    %cst_62 = arith.constant dense<0.000000e+00> : vector<8x128xf32>
    %303 = tpu.matmul %302, %239, %cst_62 {dimension_numbers = #tpu.dot_dimension_numbers<[1], [0], [0], [1], [0, 0, 1, 1], [], []>} : vector<8x32xf32>, vector<32x128xf32>, vector<8x128xf32> -> vector<8x128xf32>
    %304 = vector.extract_strided_slice %244 {offsets = [16, 0], sizes = [8, 128], strides = [1, 1]} : vector<64x128xf32> to vector<8x128xf32>
    %305 = arith.addf %303, %304 : vector<8x128xf32>
    %306 = vector.extract_strided_slice %305 {offsets = [0, 0], sizes = [8, 32], strides = [1, 1]} : vector<8x128xf32> to vector<8x32xf32>
    %307 = arith.negf %306 : vector<8x32xf32>
    %308 = math.exp %307 : vector<8x32xf32>
    %cst_63 = arith.constant 1.000000e+00 : f32
    %309 = vector.broadcast %cst_63 : f32 to vector<8x32xf32>
    %310 = arith.addf %309, %308 : vector<8x32xf32>
    %311 = arith.divf %309, %310 : vector<8x32xf32>
    %312 = vector.extract_strided_slice %305 {offsets = [0, 32], sizes = [8, 32], strides = [1, 1]} : vector<8x128xf32> to vector<8x32xf32>
    %313 = arith.negf %312 : vector<8x32xf32>
    %314 = math.exp %313 : vector<8x32xf32>
    %cst_64 = arith.constant 1.000000e+00 : f32
    %315 = vector.broadcast %cst_64 : f32 to vector<8x32xf32>
    %316 = arith.addf %315, %314 : vector<8x32xf32>
    %317 = arith.divf %315, %316 : vector<8x32xf32>
    %318 = vector.extract_strided_slice %305 {offsets = [0, 64], sizes = [8, 32], strides = [1, 1]} : vector<8x128xf32> to vector<8x32xf32>
    %319 = math.tanh %318 : vector<8x32xf32>
    %320 = vector.extract_strided_slice %305 {offsets = [0, 96], sizes = [8, 32], strides = [1, 1]} : vector<8x128xf32> to vector<8x32xf32>
    %321 = arith.negf %320 : vector<8x32xf32>
    %322 = math.exp %321 : vector<8x32xf32>
    %cst_65 = arith.constant 1.000000e+00 : f32
    %323 = vector.broadcast %cst_65 : f32 to vector<8x32xf32>
    %324 = arith.addf %323, %322 : vector<8x32xf32>
    %325 = arith.divf %323, %324 : vector<8x32xf32>
    %326 = arith.mulf %317, %300 : vector<8x32xf32>
    %327 = arith.mulf %311, %319 : vector<8x32xf32>
    %328 = arith.addf %326, %327 : vector<8x32xf32>
    %329 = math.tanh %328 : vector<8x32xf32>
    %330 = arith.mulf %325, %329 : vector<8x32xf32>
    %cst_66 = arith.constant dense<0.000000e+00> : vector<8x128xf32>
    %331 = tpu.matmul %330, %239, %cst_66 {dimension_numbers = #tpu.dot_dimension_numbers<[1], [0], [0], [1], [0, 0, 1, 1], [], []>} : vector<8x32xf32>, vector<32x128xf32>, vector<8x128xf32> -> vector<8x128xf32>
    %332 = vector.extract_strided_slice %244 {offsets = [24, 0], sizes = [8, 128], strides = [1, 1]} : vector<64x128xf32> to vector<8x128xf32>
    %333 = arith.addf %331, %332 : vector<8x128xf32>
    %334 = vector.extract_strided_slice %333 {offsets = [0, 0], sizes = [8, 32], strides = [1, 1]} : vector<8x128xf32> to vector<8x32xf32>
    %335 = arith.negf %334 : vector<8x32xf32>
    %336 = math.exp %335 : vector<8x32xf32>
    %cst_67 = arith.constant 1.000000e+00 : f32
    %337 = vector.broadcast %cst_67 : f32 to vector<8x32xf32>
    %338 = arith.addf %337, %336 : vector<8x32xf32>
    %339 = arith.divf %337, %338 : vector<8x32xf32>
    %340 = vector.extract_strided_slice %333 {offsets = [0, 32], sizes = [8, 32], strides = [1, 1]} : vector<8x128xf32> to vector<8x32xf32>
    %341 = arith.negf %340 : vector<8x32xf32>
    %342 = math.exp %341 : vector<8x32xf32>
    %cst_68 = arith.constant 1.000000e+00 : f32
    %343 = vector.broadcast %cst_68 : f32 to vector<8x32xf32>
    %344 = arith.addf %343, %342 : vector<8x32xf32>
    %345 = arith.divf %343, %344 : vector<8x32xf32>
    %346 = vector.extract_strided_slice %333 {offsets = [0, 64], sizes = [8, 32], strides = [1, 1]} : vector<8x128xf32> to vector<8x32xf32>
    %347 = math.tanh %346 : vector<8x32xf32>
    %348 = vector.extract_strided_slice %333 {offsets = [0, 96], sizes = [8, 32], strides = [1, 1]} : vector<8x128xf32> to vector<8x32xf32>
    %349 = arith.negf %348 : vector<8x32xf32>
    %350 = math.exp %349 : vector<8x32xf32>
    %cst_69 = arith.constant 1.000000e+00 : f32
    %351 = vector.broadcast %cst_69 : f32 to vector<8x32xf32>
    %352 = arith.addf %351, %350 : vector<8x32xf32>
    %353 = arith.divf %351, %352 : vector<8x32xf32>
    %354 = arith.mulf %345, %328 : vector<8x32xf32>
    %355 = arith.mulf %339, %347 : vector<8x32xf32>
    %356 = arith.addf %354, %355 : vector<8x32xf32>
    %357 = math.tanh %356 : vector<8x32xf32>
    %358 = arith.mulf %353, %357 : vector<8x32xf32>
    %cst_70 = arith.constant dense<0.000000e+00> : vector<8x128xf32>
    %359 = tpu.matmul %358, %239, %cst_70 {dimension_numbers = #tpu.dot_dimension_numbers<[1], [0], [0], [1], [0, 0, 1, 1], [], []>} : vector<8x32xf32>, vector<32x128xf32>, vector<8x128xf32> -> vector<8x128xf32>
    %360 = vector.extract_strided_slice %244 {offsets = [32, 0], sizes = [8, 128], strides = [1, 1]} : vector<64x128xf32> to vector<8x128xf32>
    %361 = arith.addf %359, %360 : vector<8x128xf32>
    %362 = vector.extract_strided_slice %361 {offsets = [0, 0], sizes = [8, 32], strides = [1, 1]} : vector<8x128xf32> to vector<8x32xf32>
    %363 = arith.negf %362 : vector<8x32xf32>
    %364 = math.exp %363 : vector<8x32xf32>
    %cst_71 = arith.constant 1.000000e+00 : f32
    %365 = vector.broadcast %cst_71 : f32 to vector<8x32xf32>
    %366 = arith.addf %365, %364 : vector<8x32xf32>
    %367 = arith.divf %365, %366 : vector<8x32xf32>
    %368 = vector.extract_strided_slice %361 {offsets = [0, 32], sizes = [8, 32], strides = [1, 1]} : vector<8x128xf32> to vector<8x32xf32>
    %369 = arith.negf %368 : vector<8x32xf32>
    %370 = math.exp %369 : vector<8x32xf32>
    %cst_72 = arith.constant 1.000000e+00 : f32
    %371 = vector.broadcast %cst_72 : f32 to vector<8x32xf32>
    %372 = arith.addf %371, %370 : vector<8x32xf32>
    %373 = arith.divf %371, %372 : vector<8x32xf32>
    %374 = vector.extract_strided_slice %361 {offsets = [0, 64], sizes = [8, 32], strides = [1, 1]} : vector<8x128xf32> to vector<8x32xf32>
    %375 = math.tanh %374 : vector<8x32xf32>
    %376 = vector.extract_strided_slice %361 {offsets = [0, 96], sizes = [8, 32], strides = [1, 1]} : vector<8x128xf32> to vector<8x32xf32>
    %377 = arith.negf %376 : vector<8x32xf32>
    %378 = math.exp %377 : vector<8x32xf32>
    %cst_73 = arith.constant 1.000000e+00 : f32
    %379 = vector.broadcast %cst_73 : f32 to vector<8x32xf32>
    %380 = arith.addf %379, %378 : vector<8x32xf32>
    %381 = arith.divf %379, %380 : vector<8x32xf32>
    %382 = arith.mulf %373, %356 : vector<8x32xf32>
    %383 = arith.mulf %367, %375 : vector<8x32xf32>
    %384 = arith.addf %382, %383 : vector<8x32xf32>
    %385 = math.tanh %384 : vector<8x32xf32>
    %386 = arith.mulf %381, %385 : vector<8x32xf32>
    %cst_74 = arith.constant dense<0.000000e+00> : vector<8x128xf32>
    %387 = tpu.matmul %386, %239, %cst_74 {dimension_numbers = #tpu.dot_dimension_numbers<[1], [0], [0], [1], [0, 0, 1, 1], [], []>} : vector<8x32xf32>, vector<32x128xf32>, vector<8x128xf32> -> vector<8x128xf32>
    %388 = vector.extract_strided_slice %244 {offsets = [40, 0], sizes = [8, 128], strides = [1, 1]} : vector<64x128xf32> to vector<8x128xf32>
    %389 = arith.addf %387, %388 : vector<8x128xf32>
    %390 = vector.extract_strided_slice %389 {offsets = [0, 0], sizes = [8, 32], strides = [1, 1]} : vector<8x128xf32> to vector<8x32xf32>
    %391 = arith.negf %390 : vector<8x32xf32>
    %392 = math.exp %391 : vector<8x32xf32>
    %cst_75 = arith.constant 1.000000e+00 : f32
    %393 = vector.broadcast %cst_75 : f32 to vector<8x32xf32>
    %394 = arith.addf %393, %392 : vector<8x32xf32>
    %395 = arith.divf %393, %394 : vector<8x32xf32>
    %396 = vector.extract_strided_slice %389 {offsets = [0, 32], sizes = [8, 32], strides = [1, 1]} : vector<8x128xf32> to vector<8x32xf32>
    %397 = arith.negf %396 : vector<8x32xf32>
    %398 = math.exp %397 : vector<8x32xf32>
    %cst_76 = arith.constant 1.000000e+00 : f32
    %399 = vector.broadcast %cst_76 : f32 to vector<8x32xf32>
    %400 = arith.addf %399, %398 : vector<8x32xf32>
    %401 = arith.divf %399, %400 : vector<8x32xf32>
    %402 = vector.extract_strided_slice %389 {offsets = [0, 64], sizes = [8, 32], strides = [1, 1]} : vector<8x128xf32> to vector<8x32xf32>
    %403 = math.tanh %402 : vector<8x32xf32>
    %404 = vector.extract_strided_slice %389 {offsets = [0, 96], sizes = [8, 32], strides = [1, 1]} : vector<8x128xf32> to vector<8x32xf32>
    %405 = arith.negf %404 : vector<8x32xf32>
    %406 = math.exp %405 : vector<8x32xf32>
    %cst_77 = arith.constant 1.000000e+00 : f32
    %407 = vector.broadcast %cst_77 : f32 to vector<8x32xf32>
    %408 = arith.addf %407, %406 : vector<8x32xf32>
    %409 = arith.divf %407, %408 : vector<8x32xf32>
    %410 = arith.mulf %401, %384 : vector<8x32xf32>
    %411 = arith.mulf %395, %403 : vector<8x32xf32>
    %412 = arith.addf %410, %411 : vector<8x32xf32>
    %413 = math.tanh %412 : vector<8x32xf32>
    %414 = arith.mulf %409, %413 : vector<8x32xf32>
    %cst_78 = arith.constant dense<0.000000e+00> : vector<8x128xf32>
    %415 = tpu.matmul %414, %239, %cst_78 {dimension_numbers = #tpu.dot_dimension_numbers<[1], [0], [0], [1], [0, 0, 1, 1], [], []>} : vector<8x32xf32>, vector<32x128xf32>, vector<8x128xf32> -> vector<8x128xf32>
    %416 = vector.extract_strided_slice %244 {offsets = [48, 0], sizes = [8, 128], strides = [1, 1]} : vector<64x128xf32> to vector<8x128xf32>
    %417 = arith.addf %415, %416 : vector<8x128xf32>
    %418 = vector.extract_strided_slice %417 {offsets = [0, 0], sizes = [8, 32], strides = [1, 1]} : vector<8x128xf32> to vector<8x32xf32>
    %419 = arith.negf %418 : vector<8x32xf32>
    %420 = math.exp %419 : vector<8x32xf32>
    %cst_79 = arith.constant 1.000000e+00 : f32
    %421 = vector.broadcast %cst_79 : f32 to vector<8x32xf32>
    %422 = arith.addf %421, %420 : vector<8x32xf32>
    %423 = arith.divf %421, %422 : vector<8x32xf32>
    %424 = vector.extract_strided_slice %417 {offsets = [0, 32], sizes = [8, 32], strides = [1, 1]} : vector<8x128xf32> to vector<8x32xf32>
    %425 = arith.negf %424 : vector<8x32xf32>
    %426 = math.exp %425 : vector<8x32xf32>
    %cst_80 = arith.constant 1.000000e+00 : f32
    %427 = vector.broadcast %cst_80 : f32 to vector<8x32xf32>
    %428 = arith.addf %427, %426 : vector<8x32xf32>
    %429 = arith.divf %427, %428 : vector<8x32xf32>
    %430 = vector.extract_strided_slice %417 {offsets = [0, 64], sizes = [8, 32], strides = [1, 1]} : vector<8x128xf32> to vector<8x32xf32>
    %431 = math.tanh %430 : vector<8x32xf32>
    %432 = vector.extract_strided_slice %417 {offsets = [0, 96], sizes = [8, 32], strides = [1, 1]} : vector<8x128xf32> to vector<8x32xf32>
    %433 = arith.negf %432 : vector<8x32xf32>
    %434 = math.exp %433 : vector<8x32xf32>
    %cst_81 = arith.constant 1.000000e+00 : f32
    %435 = vector.broadcast %cst_81 : f32 to vector<8x32xf32>
    %436 = arith.addf %435, %434 : vector<8x32xf32>
    %437 = arith.divf %435, %436 : vector<8x32xf32>
    %438 = arith.mulf %429, %412 : vector<8x32xf32>
    %439 = arith.mulf %423, %431 : vector<8x32xf32>
    %440 = arith.addf %438, %439 : vector<8x32xf32>
    %441 = math.tanh %440 : vector<8x32xf32>
    %442 = arith.mulf %437, %441 : vector<8x32xf32>
    %cst_82 = arith.constant dense<0.000000e+00> : vector<8x128xf32>
    %443 = tpu.matmul %442, %239, %cst_82 {dimension_numbers = #tpu.dot_dimension_numbers<[1], [0], [0], [1], [0, 0, 1, 1], [], []>} : vector<8x32xf32>, vector<32x128xf32>, vector<8x128xf32> -> vector<8x128xf32>
    %444 = vector.extract_strided_slice %244 {offsets = [56, 0], sizes = [8, 128], strides = [1, 1]} : vector<64x128xf32> to vector<8x128xf32>
    %445 = arith.addf %443, %444 : vector<8x128xf32>
    %446 = vector.extract_strided_slice %445 {offsets = [0, 0], sizes = [8, 32], strides = [1, 1]} : vector<8x128xf32> to vector<8x32xf32>
    %447 = arith.negf %446 : vector<8x32xf32>
    %448 = math.exp %447 : vector<8x32xf32>
    %cst_83 = arith.constant 1.000000e+00 : f32
    %449 = vector.broadcast %cst_83 : f32 to vector<8x32xf32>
    %450 = arith.addf %449, %448 : vector<8x32xf32>
    %451 = arith.divf %449, %450 : vector<8x32xf32>
    %452 = vector.extract_strided_slice %445 {offsets = [0, 32], sizes = [8, 32], strides = [1, 1]} : vector<8x128xf32> to vector<8x32xf32>
    %453 = arith.negf %452 : vector<8x32xf32>
    %454 = math.exp %453 : vector<8x32xf32>
    %cst_84 = arith.constant 1.000000e+00 : f32
    %455 = vector.broadcast %cst_84 : f32 to vector<8x32xf32>
    %456 = arith.addf %455, %454 : vector<8x32xf32>
    %457 = arith.divf %455, %456 : vector<8x32xf32>
    %458 = vector.extract_strided_slice %445 {offsets = [0, 64], sizes = [8, 32], strides = [1, 1]} : vector<8x128xf32> to vector<8x32xf32>
    %459 = math.tanh %458 : vector<8x32xf32>
    %460 = vector.extract_strided_slice %445 {offsets = [0, 96], sizes = [8, 32], strides = [1, 1]} : vector<8x128xf32> to vector<8x32xf32>
    %461 = arith.negf %460 : vector<8x32xf32>
    %462 = math.exp %461 : vector<8x32xf32>
    %cst_85 = arith.constant 1.000000e+00 : f32
    %463 = vector.broadcast %cst_85 : f32 to vector<8x32xf32>
    %464 = arith.addf %463, %462 : vector<8x32xf32>
    %465 = arith.divf %463, %464 : vector<8x32xf32>
    %466 = arith.mulf %457, %440 : vector<8x32xf32>
    %467 = arith.mulf %451, %459 : vector<8x32xf32>
    %468 = arith.addf %466, %467 : vector<8x32xf32>
    %469 = math.tanh %468 : vector<8x32xf32>
    %470 = arith.mulf %465, %469 : vector<8x32xf32>
    %471 = tpu.concatenate %274, %302, %330, %358, %386, %414, %442, %470 in 0 : vector<8x32xf32>, vector<8x32xf32>, vector<8x32xf32>, vector<8x32xf32>, vector<8x32xf32>, vector<8x32xf32>, vector<8x32xf32>, vector<8x32xf32> -> vector<64x32xf32>
    %c1_86 = arith.constant 1 : index
    %c0_87 = arith.constant 0 : index
    %c0_88 = arith.constant 0 : index
    %472 = vector.load %arg2[%c1_86, %c0_87, %c0_88] : memref<5x32x128xf32, #tpu.memory_space<vmem>>, vector<1x32x128xf32>
    %473 = vector.shape_cast %472 : vector<1x32x128xf32> to vector<32x128xf32>
    %c2 = arith.constant 2 : index
    %c0_89 = arith.constant 0 : index
    %c0_90 = arith.constant 0 : index
    %474 = vector.load %arg3[%c2, %c0_89, %c0_90] : memref<6x32x128xf32, #tpu.memory_space<vmem>>, vector<1x32x128xf32>
    %475 = vector.shape_cast %474 : vector<1x32x128xf32> to vector<32x128xf32>
    %cst_91 = arith.constant dense<0.000000e+00> : vector<64x128xf32>
    %476 = tpu.matmul %471, %473, %cst_91 {dimension_numbers = #tpu.dot_dimension_numbers<[1], [0], [0], [1], [0, 0, 1, 1], [], []>} : vector<64x32xf32>, vector<32x128xf32>, vector<64x128xf32> -> vector<64x128xf32>
    %c2_92 = arith.constant 2 : index
    %c0_93 = arith.constant 0 : index
    %c0_94 = arith.constant 0 : index
    %477 = vector.load %arg4[%c2_92, %c0_93, %c0_94] : memref<6x1x128xf32, #tpu.memory_space<vmem>>, vector<1x1x128xf32>
    %478 = vector.shape_cast %477 : vector<1x1x128xf32> to vector<1x128xf32>
    %479 = vector.broadcast %478 : vector<1x128xf32> to vector<64x128xf32>
    %480 = arith.addf %476, %479 : vector<64x128xf32>
    %cst_95 = arith.constant 0.000000e+00 : f32
    %481 = vector.broadcast %cst_95 : f32 to vector<8x32xf32>
    %cst_96 = arith.constant 0.000000e+00 : f32
    %482 = vector.broadcast %cst_96 : f32 to vector<8x32xf32>
    %cst_97 = arith.constant dense<0.000000e+00> : vector<8x128xf32>
    %483 = tpu.matmul %481, %475, %cst_97 {dimension_numbers = #tpu.dot_dimension_numbers<[1], [0], [0], [1], [0, 0, 1, 1], [], []>} : vector<8x32xf32>, vector<32x128xf32>, vector<8x128xf32> -> vector<8x128xf32>
    %484 = vector.extract_strided_slice %480 {offsets = [0, 0], sizes = [8, 128], strides = [1, 1]} : vector<64x128xf32> to vector<8x128xf32>
    %485 = arith.addf %483, %484 : vector<8x128xf32>
    %486 = vector.extract_strided_slice %485 {offsets = [0, 0], sizes = [8, 32], strides = [1, 1]} : vector<8x128xf32> to vector<8x32xf32>
    %487 = arith.negf %486 : vector<8x32xf32>
    %488 = math.exp %487 : vector<8x32xf32>
    %cst_98 = arith.constant 1.000000e+00 : f32
    %489 = vector.broadcast %cst_98 : f32 to vector<8x32xf32>
    %490 = arith.addf %489, %488 : vector<8x32xf32>
    %491 = arith.divf %489, %490 : vector<8x32xf32>
    %492 = vector.extract_strided_slice %485 {offsets = [0, 32], sizes = [8, 32], strides = [1, 1]} : vector<8x128xf32> to vector<8x32xf32>
    %493 = arith.negf %492 : vector<8x32xf32>
    %494 = math.exp %493 : vector<8x32xf32>
    %cst_99 = arith.constant 1.000000e+00 : f32
    %495 = vector.broadcast %cst_99 : f32 to vector<8x32xf32>
    %496 = arith.addf %495, %494 : vector<8x32xf32>
    %497 = arith.divf %495, %496 : vector<8x32xf32>
    %498 = vector.extract_strided_slice %485 {offsets = [0, 64], sizes = [8, 32], strides = [1, 1]} : vector<8x128xf32> to vector<8x32xf32>
    %499 = math.tanh %498 : vector<8x32xf32>
    %500 = vector.extract_strided_slice %485 {offsets = [0, 96], sizes = [8, 32], strides = [1, 1]} : vector<8x128xf32> to vector<8x32xf32>
    %501 = arith.negf %500 : vector<8x32xf32>
    %502 = math.exp %501 : vector<8x32xf32>
    %cst_100 = arith.constant 1.000000e+00 : f32
    %503 = vector.broadcast %cst_100 : f32 to vector<8x32xf32>
    %504 = arith.addf %503, %502 : vector<8x32xf32>
    %505 = arith.divf %503, %504 : vector<8x32xf32>
    %506 = arith.mulf %497, %482 : vector<8x32xf32>
    %507 = arith.mulf %491, %499 : vector<8x32xf32>
    %508 = arith.addf %506, %507 : vector<8x32xf32>
    %509 = math.tanh %508 : vector<8x32xf32>
    %510 = arith.mulf %505, %509 : vector<8x32xf32>
    %cst_101 = arith.constant dense<0.000000e+00> : vector<8x128xf32>
    %511 = tpu.matmul %510, %475, %cst_101 {dimension_numbers = #tpu.dot_dimension_numbers<[1], [0], [0], [1], [0, 0, 1, 1], [], []>} : vector<8x32xf32>, vector<32x128xf32>, vector<8x128xf32> -> vector<8x128xf32>
    %512 = vector.extract_strided_slice %480 {offsets = [8, 0], sizes = [8, 128], strides = [1, 1]} : vector<64x128xf32> to vector<8x128xf32>
    %513 = arith.addf %511, %512 : vector<8x128xf32>
    %514 = vector.extract_strided_slice %513 {offsets = [0, 0], sizes = [8, 32], strides = [1, 1]} : vector<8x128xf32> to vector<8x32xf32>
    %515 = arith.negf %514 : vector<8x32xf32>
    %516 = math.exp %515 : vector<8x32xf32>
    %cst_102 = arith.constant 1.000000e+00 : f32
    %517 = vector.broadcast %cst_102 : f32 to vector<8x32xf32>
    %518 = arith.addf %517, %516 : vector<8x32xf32>
    %519 = arith.divf %517, %518 : vector<8x32xf32>
    %520 = vector.extract_strided_slice %513 {offsets = [0, 32], sizes = [8, 32], strides = [1, 1]} : vector<8x128xf32> to vector<8x32xf32>
    %521 = arith.negf %520 : vector<8x32xf32>
    %522 = math.exp %521 : vector<8x32xf32>
    %cst_103 = arith.constant 1.000000e+00 : f32
    %523 = vector.broadcast %cst_103 : f32 to vector<8x32xf32>
    %524 = arith.addf %523, %522 : vector<8x32xf32>
    %525 = arith.divf %523, %524 : vector<8x32xf32>
    %526 = vector.extract_strided_slice %513 {offsets = [0, 64], sizes = [8, 32], strides = [1, 1]} : vector<8x128xf32> to vector<8x32xf32>
    %527 = math.tanh %526 : vector<8x32xf32>
    %528 = vector.extract_strided_slice %513 {offsets = [0, 96], sizes = [8, 32], strides = [1, 1]} : vector<8x128xf32> to vector<8x32xf32>
    %529 = arith.negf %528 : vector<8x32xf32>
    %530 = math.exp %529 : vector<8x32xf32>
    %cst_104 = arith.constant 1.000000e+00 : f32
    %531 = vector.broadcast %cst_104 : f32 to vector<8x32xf32>
    %532 = arith.addf %531, %530 : vector<8x32xf32>
    %533 = arith.divf %531, %532 : vector<8x32xf32>
    %534 = arith.mulf %525, %508 : vector<8x32xf32>
    %535 = arith.mulf %519, %527 : vector<8x32xf32>
    %536 = arith.addf %534, %535 : vector<8x32xf32>
    %537 = math.tanh %536 : vector<8x32xf32>
    %538 = arith.mulf %533, %537 : vector<8x32xf32>
    %cst_105 = arith.constant dense<0.000000e+00> : vector<8x128xf32>
    %539 = tpu.matmul %538, %475, %cst_105 {dimension_numbers = #tpu.dot_dimension_numbers<[1], [0], [0], [1], [0, 0, 1, 1], [], []>} : vector<8x32xf32>, vector<32x128xf32>, vector<8x128xf32> -> vector<8x128xf32>
    %540 = vector.extract_strided_slice %480 {offsets = [16, 0], sizes = [8, 128], strides = [1, 1]} : vector<64x128xf32> to vector<8x128xf32>
    %541 = arith.addf %539, %540 : vector<8x128xf32>
    %542 = vector.extract_strided_slice %541 {offsets = [0, 0], sizes = [8, 32], strides = [1, 1]} : vector<8x128xf32> to vector<8x32xf32>
    %543 = arith.negf %542 : vector<8x32xf32>
    %544 = math.exp %543 : vector<8x32xf32>
    %cst_106 = arith.constant 1.000000e+00 : f32
    %545 = vector.broadcast %cst_106 : f32 to vector<8x32xf32>
    %546 = arith.addf %545, %544 : vector<8x32xf32>
    %547 = arith.divf %545, %546 : vector<8x32xf32>
    %548 = vector.extract_strided_slice %541 {offsets = [0, 32], sizes = [8, 32], strides = [1, 1]} : vector<8x128xf32> to vector<8x32xf32>
    %549 = arith.negf %548 : vector<8x32xf32>
    %550 = math.exp %549 : vector<8x32xf32>
    %cst_107 = arith.constant 1.000000e+00 : f32
    %551 = vector.broadcast %cst_107 : f32 to vector<8x32xf32>
    %552 = arith.addf %551, %550 : vector<8x32xf32>
    %553 = arith.divf %551, %552 : vector<8x32xf32>
    %554 = vector.extract_strided_slice %541 {offsets = [0, 64], sizes = [8, 32], strides = [1, 1]} : vector<8x128xf32> to vector<8x32xf32>
    %555 = math.tanh %554 : vector<8x32xf32>
    %556 = vector.extract_strided_slice %541 {offsets = [0, 96], sizes = [8, 32], strides = [1, 1]} : vector<8x128xf32> to vector<8x32xf32>
    %557 = arith.negf %556 : vector<8x32xf32>
    %558 = math.exp %557 : vector<8x32xf32>
    %cst_108 = arith.constant 1.000000e+00 : f32
    %559 = vector.broadcast %cst_108 : f32 to vector<8x32xf32>
    %560 = arith.addf %559, %558 : vector<8x32xf32>
    %561 = arith.divf %559, %560 : vector<8x32xf32>
    %562 = arith.mulf %553, %536 : vector<8x32xf32>
    %563 = arith.mulf %547, %555 : vector<8x32xf32>
    %564 = arith.addf %562, %563 : vector<8x32xf32>
    %565 = math.tanh %564 : vector<8x32xf32>
    %566 = arith.mulf %561, %565 : vector<8x32xf32>
    %cst_109 = arith.constant dense<0.000000e+00> : vector<8x128xf32>
    %567 = tpu.matmul %566, %475, %cst_109 {dimension_numbers = #tpu.dot_dimension_numbers<[1], [0], [0], [1], [0, 0, 1, 1], [], []>} : vector<8x32xf32>, vector<32x128xf32>, vector<8x128xf32> -> vector<8x128xf32>
    %568 = vector.extract_strided_slice %480 {offsets = [24, 0], sizes = [8, 128], strides = [1, 1]} : vector<64x128xf32> to vector<8x128xf32>
    %569 = arith.addf %567, %568 : vector<8x128xf32>
    %570 = vector.extract_strided_slice %569 {offsets = [0, 0], sizes = [8, 32], strides = [1, 1]} : vector<8x128xf32> to vector<8x32xf32>
    %571 = arith.negf %570 : vector<8x32xf32>
    %572 = math.exp %571 : vector<8x32xf32>
    %cst_110 = arith.constant 1.000000e+00 : f32
    %573 = vector.broadcast %cst_110 : f32 to vector<8x32xf32>
    %574 = arith.addf %573, %572 : vector<8x32xf32>
    %575 = arith.divf %573, %574 : vector<8x32xf32>
    %576 = vector.extract_strided_slice %569 {offsets = [0, 32], sizes = [8, 32], strides = [1, 1]} : vector<8x128xf32> to vector<8x32xf32>
    %577 = arith.negf %576 : vector<8x32xf32>
    %578 = math.exp %577 : vector<8x32xf32>
    %cst_111 = arith.constant 1.000000e+00 : f32
    %579 = vector.broadcast %cst_111 : f32 to vector<8x32xf32>
    %580 = arith.addf %579, %578 : vector<8x32xf32>
    %581 = arith.divf %579, %580 : vector<8x32xf32>
    %582 = vector.extract_strided_slice %569 {offsets = [0, 64], sizes = [8, 32], strides = [1, 1]} : vector<8x128xf32> to vector<8x32xf32>
    %583 = math.tanh %582 : vector<8x32xf32>
    %584 = vector.extract_strided_slice %569 {offsets = [0, 96], sizes = [8, 32], strides = [1, 1]} : vector<8x128xf32> to vector<8x32xf32>
    %585 = arith.negf %584 : vector<8x32xf32>
    %586 = math.exp %585 : vector<8x32xf32>
    %cst_112 = arith.constant 1.000000e+00 : f32
    %587 = vector.broadcast %cst_112 : f32 to vector<8x32xf32>
    %588 = arith.addf %587, %586 : vector<8x32xf32>
    %589 = arith.divf %587, %588 : vector<8x32xf32>
    %590 = arith.mulf %581, %564 : vector<8x32xf32>
    %591 = arith.mulf %575, %583 : vector<8x32xf32>
    %592 = arith.addf %590, %591 : vector<8x32xf32>
    %593 = math.tanh %592 : vector<8x32xf32>
    %594 = arith.mulf %589, %593 : vector<8x32xf32>
    %cst_113 = arith.constant dense<0.000000e+00> : vector<8x128xf32>
    %595 = tpu.matmul %594, %475, %cst_113 {dimension_numbers = #tpu.dot_dimension_numbers<[1], [0], [0], [1], [0, 0, 1, 1], [], []>} : vector<8x32xf32>, vector<32x128xf32>, vector<8x128xf32> -> vector<8x128xf32>
    %596 = vector.extract_strided_slice %480 {offsets = [32, 0], sizes = [8, 128], strides = [1, 1]} : vector<64x128xf32> to vector<8x128xf32>
    %597 = arith.addf %595, %596 : vector<8x128xf32>
    %598 = vector.extract_strided_slice %597 {offsets = [0, 0], sizes = [8, 32], strides = [1, 1]} : vector<8x128xf32> to vector<8x32xf32>
    %599 = arith.negf %598 : vector<8x32xf32>
    %600 = math.exp %599 : vector<8x32xf32>
    %cst_114 = arith.constant 1.000000e+00 : f32
    %601 = vector.broadcast %cst_114 : f32 to vector<8x32xf32>
    %602 = arith.addf %601, %600 : vector<8x32xf32>
    %603 = arith.divf %601, %602 : vector<8x32xf32>
    %604 = vector.extract_strided_slice %597 {offsets = [0, 32], sizes = [8, 32], strides = [1, 1]} : vector<8x128xf32> to vector<8x32xf32>
    %605 = arith.negf %604 : vector<8x32xf32>
    %606 = math.exp %605 : vector<8x32xf32>
    %cst_115 = arith.constant 1.000000e+00 : f32
    %607 = vector.broadcast %cst_115 : f32 to vector<8x32xf32>
    %608 = arith.addf %607, %606 : vector<8x32xf32>
    %609 = arith.divf %607, %608 : vector<8x32xf32>
    %610 = vector.extract_strided_slice %597 {offsets = [0, 64], sizes = [8, 32], strides = [1, 1]} : vector<8x128xf32> to vector<8x32xf32>
    %611 = math.tanh %610 : vector<8x32xf32>
    %612 = vector.extract_strided_slice %597 {offsets = [0, 96], sizes = [8, 32], strides = [1, 1]} : vector<8x128xf32> to vector<8x32xf32>
    %613 = arith.negf %612 : vector<8x32xf32>
    %614 = math.exp %613 : vector<8x32xf32>
    %cst_116 = arith.constant 1.000000e+00 : f32
    %615 = vector.broadcast %cst_116 : f32 to vector<8x32xf32>
    %616 = arith.addf %615, %614 : vector<8x32xf32>
    %617 = arith.divf %615, %616 : vector<8x32xf32>
    %618 = arith.mulf %609, %592 : vector<8x32xf32>
    %619 = arith.mulf %603, %611 : vector<8x32xf32>
    %620 = arith.addf %618, %619 : vector<8x32xf32>
    %621 = math.tanh %620 : vector<8x32xf32>
    %622 = arith.mulf %617, %621 : vector<8x32xf32>
    %cst_117 = arith.constant dense<0.000000e+00> : vector<8x128xf32>
    %623 = tpu.matmul %622, %475, %cst_117 {dimension_numbers = #tpu.dot_dimension_numbers<[1], [0], [0], [1], [0, 0, 1, 1], [], []>} : vector<8x32xf32>, vector<32x128xf32>, vector<8x128xf32> -> vector<8x128xf32>
    %624 = vector.extract_strided_slice %480 {offsets = [40, 0], sizes = [8, 128], strides = [1, 1]} : vector<64x128xf32> to vector<8x128xf32>
    %625 = arith.addf %623, %624 : vector<8x128xf32>
    %626 = vector.extract_strided_slice %625 {offsets = [0, 0], sizes = [8, 32], strides = [1, 1]} : vector<8x128xf32> to vector<8x32xf32>
    %627 = arith.negf %626 : vector<8x32xf32>
    %628 = math.exp %627 : vector<8x32xf32>
    %cst_118 = arith.constant 1.000000e+00 : f32
    %629 = vector.broadcast %cst_118 : f32 to vector<8x32xf32>
    %630 = arith.addf %629, %628 : vector<8x32xf32>
    %631 = arith.divf %629, %630 : vector<8x32xf32>
    %632 = vector.extract_strided_slice %625 {offsets = [0, 32], sizes = [8, 32], strides = [1, 1]} : vector<8x128xf32> to vector<8x32xf32>
    %633 = arith.negf %632 : vector<8x32xf32>
    %634 = math.exp %633 : vector<8x32xf32>
    %cst_119 = arith.constant 1.000000e+00 : f32
    %635 = vector.broadcast %cst_119 : f32 to vector<8x32xf32>
    %636 = arith.addf %635, %634 : vector<8x32xf32>
    %637 = arith.divf %635, %636 : vector<8x32xf32>
    %638 = vector.extract_strided_slice %625 {offsets = [0, 64], sizes = [8, 32], strides = [1, 1]} : vector<8x128xf32> to vector<8x32xf32>
    %639 = math.tanh %638 : vector<8x32xf32>
    %640 = vector.extract_strided_slice %625 {offsets = [0, 96], sizes = [8, 32], strides = [1, 1]} : vector<8x128xf32> to vector<8x32xf32>
    %641 = arith.negf %640 : vector<8x32xf32>
    %642 = math.exp %641 : vector<8x32xf32>
    %cst_120 = arith.constant 1.000000e+00 : f32
    %643 = vector.broadcast %cst_120 : f32 to vector<8x32xf32>
    %644 = arith.addf %643, %642 : vector<8x32xf32>
    %645 = arith.divf %643, %644 : vector<8x32xf32>
    %646 = arith.mulf %637, %620 : vector<8x32xf32>
    %647 = arith.mulf %631, %639 : vector<8x32xf32>
    %648 = arith.addf %646, %647 : vector<8x32xf32>
    %649 = math.tanh %648 : vector<8x32xf32>
    %650 = arith.mulf %645, %649 : vector<8x32xf32>
    %cst_121 = arith.constant dense<0.000000e+00> : vector<8x128xf32>
    %651 = tpu.matmul %650, %475, %cst_121 {dimension_numbers = #tpu.dot_dimension_numbers<[1], [0], [0], [1], [0, 0, 1, 1], [], []>} : vector<8x32xf32>, vector<32x128xf32>, vector<8x128xf32> -> vector<8x128xf32>
    %652 = vector.extract_strided_slice %480 {offsets = [48, 0], sizes = [8, 128], strides = [1, 1]} : vector<64x128xf32> to vector<8x128xf32>
    %653 = arith.addf %651, %652 : vector<8x128xf32>
    %654 = vector.extract_strided_slice %653 {offsets = [0, 0], sizes = [8, 32], strides = [1, 1]} : vector<8x128xf32> to vector<8x32xf32>
    %655 = arith.negf %654 : vector<8x32xf32>
    %656 = math.exp %655 : vector<8x32xf32>
    %cst_122 = arith.constant 1.000000e+00 : f32
    %657 = vector.broadcast %cst_122 : f32 to vector<8x32xf32>
    %658 = arith.addf %657, %656 : vector<8x32xf32>
    %659 = arith.divf %657, %658 : vector<8x32xf32>
    %660 = vector.extract_strided_slice %653 {offsets = [0, 32], sizes = [8, 32], strides = [1, 1]} : vector<8x128xf32> to vector<8x32xf32>
    %661 = arith.negf %660 : vector<8x32xf32>
    %662 = math.exp %661 : vector<8x32xf32>
    %cst_123 = arith.constant 1.000000e+00 : f32
    %663 = vector.broadcast %cst_123 : f32 to vector<8x32xf32>
    %664 = arith.addf %663, %662 : vector<8x32xf32>
    %665 = arith.divf %663, %664 : vector<8x32xf32>
    %666 = vector.extract_strided_slice %653 {offsets = [0, 64], sizes = [8, 32], strides = [1, 1]} : vector<8x128xf32> to vector<8x32xf32>
    %667 = math.tanh %666 : vector<8x32xf32>
    %668 = vector.extract_strided_slice %653 {offsets = [0, 96], sizes = [8, 32], strides = [1, 1]} : vector<8x128xf32> to vector<8x32xf32>
    %669 = arith.negf %668 : vector<8x32xf32>
    %670 = math.exp %669 : vector<8x32xf32>
    %cst_124 = arith.constant 1.000000e+00 : f32
    %671 = vector.broadcast %cst_124 : f32 to vector<8x32xf32>
    %672 = arith.addf %671, %670 : vector<8x32xf32>
    %673 = arith.divf %671, %672 : vector<8x32xf32>
    %674 = arith.mulf %665, %648 : vector<8x32xf32>
    %675 = arith.mulf %659, %667 : vector<8x32xf32>
    %676 = arith.addf %674, %675 : vector<8x32xf32>
    %677 = math.tanh %676 : vector<8x32xf32>
    %678 = arith.mulf %673, %677 : vector<8x32xf32>
    %cst_125 = arith.constant dense<0.000000e+00> : vector<8x128xf32>
    %679 = tpu.matmul %678, %475, %cst_125 {dimension_numbers = #tpu.dot_dimension_numbers<[1], [0], [0], [1], [0, 0, 1, 1], [], []>} : vector<8x32xf32>, vector<32x128xf32>, vector<8x128xf32> -> vector<8x128xf32>
    %680 = vector.extract_strided_slice %480 {offsets = [56, 0], sizes = [8, 128], strides = [1, 1]} : vector<64x128xf32> to vector<8x128xf32>
    %681 = arith.addf %679, %680 : vector<8x128xf32>
    %682 = vector.extract_strided_slice %681 {offsets = [0, 0], sizes = [8, 32], strides = [1, 1]} : vector<8x128xf32> to vector<8x32xf32>
    %683 = arith.negf %682 : vector<8x32xf32>
    %684 = math.exp %683 : vector<8x32xf32>
    %cst_126 = arith.constant 1.000000e+00 : f32
    %685 = vector.broadcast %cst_126 : f32 to vector<8x32xf32>
    %686 = arith.addf %685, %684 : vector<8x32xf32>
    %687 = arith.divf %685, %686 : vector<8x32xf32>
    %688 = vector.extract_strided_slice %681 {offsets = [0, 32], sizes = [8, 32], strides = [1, 1]} : vector<8x128xf32> to vector<8x32xf32>
    %689 = arith.negf %688 : vector<8x32xf32>
    %690 = math.exp %689 : vector<8x32xf32>
    %cst_127 = arith.constant 1.000000e+00 : f32
    %691 = vector.broadcast %cst_127 : f32 to vector<8x32xf32>
    %692 = arith.addf %691, %690 : vector<8x32xf32>
    %693 = arith.divf %691, %692 : vector<8x32xf32>
    %694 = vector.extract_strided_slice %681 {offsets = [0, 64], sizes = [8, 32], strides = [1, 1]} : vector<8x128xf32> to vector<8x32xf32>
    %695 = math.tanh %694 : vector<8x32xf32>
    %696 = vector.extract_strided_slice %681 {offsets = [0, 96], sizes = [8, 32], strides = [1, 1]} : vector<8x128xf32> to vector<8x32xf32>
    %697 = arith.negf %696 : vector<8x32xf32>
    %698 = math.exp %697 : vector<8x32xf32>
    %cst_128 = arith.constant 1.000000e+00 : f32
    %699 = vector.broadcast %cst_128 : f32 to vector<8x32xf32>
    %700 = arith.addf %699, %698 : vector<8x32xf32>
    %701 = arith.divf %699, %700 : vector<8x32xf32>
    %702 = arith.mulf %693, %676 : vector<8x32xf32>
    %703 = arith.mulf %687, %695 : vector<8x32xf32>
    %704 = arith.addf %702, %703 : vector<8x32xf32>
    %705 = math.tanh %704 : vector<8x32xf32>
    %706 = arith.mulf %701, %705 : vector<8x32xf32>
    %707 = tpu.concatenate %510, %538, %566, %594, %622, %650, %678, %706 in 0 : vector<8x32xf32>, vector<8x32xf32>, vector<8x32xf32>, vector<8x32xf32>, vector<8x32xf32>, vector<8x32xf32>, vector<8x32xf32>, vector<8x32xf32> -> vector<64x32xf32>
    %c2_129 = arith.constant 2 : index
    %c0_130 = arith.constant 0 : index
    %c0_131 = arith.constant 0 : index
    %708 = vector.load %arg2[%c2_129, %c0_130, %c0_131] : memref<5x32x128xf32, #tpu.memory_space<vmem>>, vector<1x32x128xf32>
    %709 = vector.shape_cast %708 : vector<1x32x128xf32> to vector<32x128xf32>
    %c3 = arith.constant 3 : index
    %c0_132 = arith.constant 0 : index
    %c0_133 = arith.constant 0 : index
    %710 = vector.load %arg3[%c3, %c0_132, %c0_133] : memref<6x32x128xf32, #tpu.memory_space<vmem>>, vector<1x32x128xf32>
    %711 = vector.shape_cast %710 : vector<1x32x128xf32> to vector<32x128xf32>
    %cst_134 = arith.constant dense<0.000000e+00> : vector<64x128xf32>
    %712 = tpu.matmul %707, %709, %cst_134 {dimension_numbers = #tpu.dot_dimension_numbers<[1], [0], [0], [1], [0, 0, 1, 1], [], []>} : vector<64x32xf32>, vector<32x128xf32>, vector<64x128xf32> -> vector<64x128xf32>
    %c3_135 = arith.constant 3 : index
    %c0_136 = arith.constant 0 : index
    %c0_137 = arith.constant 0 : index
    %713 = vector.load %arg4[%c3_135, %c0_136, %c0_137] : memref<6x1x128xf32, #tpu.memory_space<vmem>>, vector<1x1x128xf32>
    %714 = vector.shape_cast %713 : vector<1x1x128xf32> to vector<1x128xf32>
    %715 = vector.broadcast %714 : vector<1x128xf32> to vector<64x128xf32>
    %716 = arith.addf %712, %715 : vector<64x128xf32>
    %cst_138 = arith.constant 0.000000e+00 : f32
    %717 = vector.broadcast %cst_138 : f32 to vector<8x32xf32>
    %cst_139 = arith.constant 0.000000e+00 : f32
    %718 = vector.broadcast %cst_139 : f32 to vector<8x32xf32>
    %cst_140 = arith.constant dense<0.000000e+00> : vector<8x128xf32>
    %719 = tpu.matmul %717, %711, %cst_140 {dimension_numbers = #tpu.dot_dimension_numbers<[1], [0], [0], [1], [0, 0, 1, 1], [], []>} : vector<8x32xf32>, vector<32x128xf32>, vector<8x128xf32> -> vector<8x128xf32>
    %720 = vector.extract_strided_slice %716 {offsets = [0, 0], sizes = [8, 128], strides = [1, 1]} : vector<64x128xf32> to vector<8x128xf32>
    %721 = arith.addf %719, %720 : vector<8x128xf32>
    %722 = vector.extract_strided_slice %721 {offsets = [0, 0], sizes = [8, 32], strides = [1, 1]} : vector<8x128xf32> to vector<8x32xf32>
    %723 = arith.negf %722 : vector<8x32xf32>
    %724 = math.exp %723 : vector<8x32xf32>
    %cst_141 = arith.constant 1.000000e+00 : f32
    %725 = vector.broadcast %cst_141 : f32 to vector<8x32xf32>
    %726 = arith.addf %725, %724 : vector<8x32xf32>
    %727 = arith.divf %725, %726 : vector<8x32xf32>
    %728 = vector.extract_strided_slice %721 {offsets = [0, 32], sizes = [8, 32], strides = [1, 1]} : vector<8x128xf32> to vector<8x32xf32>
    %729 = arith.negf %728 : vector<8x32xf32>
    %730 = math.exp %729 : vector<8x32xf32>
    %cst_142 = arith.constant 1.000000e+00 : f32
    %731 = vector.broadcast %cst_142 : f32 to vector<8x32xf32>
    %732 = arith.addf %731, %730 : vector<8x32xf32>
    %733 = arith.divf %731, %732 : vector<8x32xf32>
    %734 = vector.extract_strided_slice %721 {offsets = [0, 64], sizes = [8, 32], strides = [1, 1]} : vector<8x128xf32> to vector<8x32xf32>
    %735 = math.tanh %734 : vector<8x32xf32>
    %736 = vector.extract_strided_slice %721 {offsets = [0, 96], sizes = [8, 32], strides = [1, 1]} : vector<8x128xf32> to vector<8x32xf32>
    %737 = arith.negf %736 : vector<8x32xf32>
    %738 = math.exp %737 : vector<8x32xf32>
    %cst_143 = arith.constant 1.000000e+00 : f32
    %739 = vector.broadcast %cst_143 : f32 to vector<8x32xf32>
    %740 = arith.addf %739, %738 : vector<8x32xf32>
    %741 = arith.divf %739, %740 : vector<8x32xf32>
    %742 = arith.mulf %733, %718 : vector<8x32xf32>
    %743 = arith.mulf %727, %735 : vector<8x32xf32>
    %744 = arith.addf %742, %743 : vector<8x32xf32>
    %745 = math.tanh %744 : vector<8x32xf32>
    %746 = arith.mulf %741, %745 : vector<8x32xf32>
    %cst_144 = arith.constant dense<0.000000e+00> : vector<8x128xf32>
    %747 = tpu.matmul %746, %711, %cst_144 {dimension_numbers = #tpu.dot_dimension_numbers<[1], [0], [0], [1], [0, 0, 1, 1], [], []>} : vector<8x32xf32>, vector<32x128xf32>, vector<8x128xf32> -> vector<8x128xf32>
    %748 = vector.extract_strided_slice %716 {offsets = [8, 0], sizes = [8, 128], strides = [1, 1]} : vector<64x128xf32> to vector<8x128xf32>
    %749 = arith.addf %747, %748 : vector<8x128xf32>
    %750 = vector.extract_strided_slice %749 {offsets = [0, 0], sizes = [8, 32], strides = [1, 1]} : vector<8x128xf32> to vector<8x32xf32>
    %751 = arith.negf %750 : vector<8x32xf32>
    %752 = math.exp %751 : vector<8x32xf32>
    %cst_145 = arith.constant 1.000000e+00 : f32
    %753 = vector.broadcast %cst_145 : f32 to vector<8x32xf32>
    %754 = arith.addf %753, %752 : vector<8x32xf32>
    %755 = arith.divf %753, %754 : vector<8x32xf32>
    %756 = vector.extract_strided_slice %749 {offsets = [0, 32], sizes = [8, 32], strides = [1, 1]} : vector<8x128xf32> to vector<8x32xf32>
    %757 = arith.negf %756 : vector<8x32xf32>
    %758 = math.exp %757 : vector<8x32xf32>
    %cst_146 = arith.constant 1.000000e+00 : f32
    %759 = vector.broadcast %cst_146 : f32 to vector<8x32xf32>
    %760 = arith.addf %759, %758 : vector<8x32xf32>
    %761 = arith.divf %759, %760 : vector<8x32xf32>
    %762 = vector.extract_strided_slice %749 {offsets = [0, 64], sizes = [8, 32], strides = [1, 1]} : vector<8x128xf32> to vector<8x32xf32>
    %763 = math.tanh %762 : vector<8x32xf32>
    %764 = vector.extract_strided_slice %749 {offsets = [0, 96], sizes = [8, 32], strides = [1, 1]} : vector<8x128xf32> to vector<8x32xf32>
    %765 = arith.negf %764 : vector<8x32xf32>
    %766 = math.exp %765 : vector<8x32xf32>
    %cst_147 = arith.constant 1.000000e+00 : f32
    %767 = vector.broadcast %cst_147 : f32 to vector<8x32xf32>
    %768 = arith.addf %767, %766 : vector<8x32xf32>
    %769 = arith.divf %767, %768 : vector<8x32xf32>
    %770 = arith.mulf %761, %744 : vector<8x32xf32>
    %771 = arith.mulf %755, %763 : vector<8x32xf32>
    %772 = arith.addf %770, %771 : vector<8x32xf32>
    %773 = math.tanh %772 : vector<8x32xf32>
    %774 = arith.mulf %769, %773 : vector<8x32xf32>
    %cst_148 = arith.constant dense<0.000000e+00> : vector<8x128xf32>
    %775 = tpu.matmul %774, %711, %cst_148 {dimension_numbers = #tpu.dot_dimension_numbers<[1], [0], [0], [1], [0, 0, 1, 1], [], []>} : vector<8x32xf32>, vector<32x128xf32>, vector<8x128xf32> -> vector<8x128xf32>
    %776 = vector.extract_strided_slice %716 {offsets = [16, 0], sizes = [8, 128], strides = [1, 1]} : vector<64x128xf32> to vector<8x128xf32>
    %777 = arith.addf %775, %776 : vector<8x128xf32>
    %778 = vector.extract_strided_slice %777 {offsets = [0, 0], sizes = [8, 32], strides = [1, 1]} : vector<8x128xf32> to vector<8x32xf32>
    %779 = arith.negf %778 : vector<8x32xf32>
    %780 = math.exp %779 : vector<8x32xf32>
    %cst_149 = arith.constant 1.000000e+00 : f32
    %781 = vector.broadcast %cst_149 : f32 to vector<8x32xf32>
    %782 = arith.addf %781, %780 : vector<8x32xf32>
    %783 = arith.divf %781, %782 : vector<8x32xf32>
    %784 = vector.extract_strided_slice %777 {offsets = [0, 32], sizes = [8, 32], strides = [1, 1]} : vector<8x128xf32> to vector<8x32xf32>
    %785 = arith.negf %784 : vector<8x32xf32>
    %786 = math.exp %785 : vector<8x32xf32>
    %cst_150 = arith.constant 1.000000e+00 : f32
    %787 = vector.broadcast %cst_150 : f32 to vector<8x32xf32>
    %788 = arith.addf %787, %786 : vector<8x32xf32>
    %789 = arith.divf %787, %788 : vector<8x32xf32>
    %790 = vector.extract_strided_slice %777 {offsets = [0, 64], sizes = [8, 32], strides = [1, 1]} : vector<8x128xf32> to vector<8x32xf32>
    %791 = math.tanh %790 : vector<8x32xf32>
    %792 = vector.extract_strided_slice %777 {offsets = [0, 96], sizes = [8, 32], strides = [1, 1]} : vector<8x128xf32> to vector<8x32xf32>
    %793 = arith.negf %792 : vector<8x32xf32>
    %794 = math.exp %793 : vector<8x32xf32>
    %cst_151 = arith.constant 1.000000e+00 : f32
    %795 = vector.broadcast %cst_151 : f32 to vector<8x32xf32>
    %796 = arith.addf %795, %794 : vector<8x32xf32>
    %797 = arith.divf %795, %796 : vector<8x32xf32>
    %798 = arith.mulf %789, %772 : vector<8x32xf32>
    %799 = arith.mulf %783, %791 : vector<8x32xf32>
    %800 = arith.addf %798, %799 : vector<8x32xf32>
    %801 = math.tanh %800 : vector<8x32xf32>
    %802 = arith.mulf %797, %801 : vector<8x32xf32>
    %cst_152 = arith.constant dense<0.000000e+00> : vector<8x128xf32>
    %803 = tpu.matmul %802, %711, %cst_152 {dimension_numbers = #tpu.dot_dimension_numbers<[1], [0], [0], [1], [0, 0, 1, 1], [], []>} : vector<8x32xf32>, vector<32x128xf32>, vector<8x128xf32> -> vector<8x128xf32>
    %804 = vector.extract_strided_slice %716 {offsets = [24, 0], sizes = [8, 128], strides = [1, 1]} : vector<64x128xf32> to vector<8x128xf32>
    %805 = arith.addf %803, %804 : vector<8x128xf32>
    %806 = vector.extract_strided_slice %805 {offsets = [0, 0], sizes = [8, 32], strides = [1, 1]} : vector<8x128xf32> to vector<8x32xf32>
    %807 = arith.negf %806 : vector<8x32xf32>
    %808 = math.exp %807 : vector<8x32xf32>
    %cst_153 = arith.constant 1.000000e+00 : f32
    %809 = vector.broadcast %cst_153 : f32 to vector<8x32xf32>
    %810 = arith.addf %809, %808 : vector<8x32xf32>
    %811 = arith.divf %809, %810 : vector<8x32xf32>
    %812 = vector.extract_strided_slice %805 {offsets = [0, 32], sizes = [8, 32], strides = [1, 1]} : vector<8x128xf32> to vector<8x32xf32>
    %813 = arith.negf %812 : vector<8x32xf32>
    %814 = math.exp %813 : vector<8x32xf32>
    %cst_154 = arith.constant 1.000000e+00 : f32
    %815 = vector.broadcast %cst_154 : f32 to vector<8x32xf32>
    %816 = arith.addf %815, %814 : vector<8x32xf32>
    %817 = arith.divf %815, %816 : vector<8x32xf32>
    %818 = vector.extract_strided_slice %805 {offsets = [0, 64], sizes = [8, 32], strides = [1, 1]} : vector<8x128xf32> to vector<8x32xf32>
    %819 = math.tanh %818 : vector<8x32xf32>
    %820 = vector.extract_strided_slice %805 {offsets = [0, 96], sizes = [8, 32], strides = [1, 1]} : vector<8x128xf32> to vector<8x32xf32>
    %821 = arith.negf %820 : vector<8x32xf32>
    %822 = math.exp %821 : vector<8x32xf32>
    %cst_155 = arith.constant 1.000000e+00 : f32
    %823 = vector.broadcast %cst_155 : f32 to vector<8x32xf32>
    %824 = arith.addf %823, %822 : vector<8x32xf32>
    %825 = arith.divf %823, %824 : vector<8x32xf32>
    %826 = arith.mulf %817, %800 : vector<8x32xf32>
    %827 = arith.mulf %811, %819 : vector<8x32xf32>
    %828 = arith.addf %826, %827 : vector<8x32xf32>
    %829 = math.tanh %828 : vector<8x32xf32>
    %830 = arith.mulf %825, %829 : vector<8x32xf32>
    %cst_156 = arith.constant dense<0.000000e+00> : vector<8x128xf32>
    %831 = tpu.matmul %830, %711, %cst_156 {dimension_numbers = #tpu.dot_dimension_numbers<[1], [0], [0], [1], [0, 0, 1, 1], [], []>} : vector<8x32xf32>, vector<32x128xf32>, vector<8x128xf32> -> vector<8x128xf32>
    %832 = vector.extract_strided_slice %716 {offsets = [32, 0], sizes = [8, 128], strides = [1, 1]} : vector<64x128xf32> to vector<8x128xf32>
    %833 = arith.addf %831, %832 : vector<8x128xf32>
    %834 = vector.extract_strided_slice %833 {offsets = [0, 0], sizes = [8, 32], strides = [1, 1]} : vector<8x128xf32> to vector<8x32xf32>
    %835 = arith.negf %834 : vector<8x32xf32>
    %836 = math.exp %835 : vector<8x32xf32>
    %cst_157 = arith.constant 1.000000e+00 : f32
    %837 = vector.broadcast %cst_157 : f32 to vector<8x32xf32>
    %838 = arith.addf %837, %836 : vector<8x32xf32>
    %839 = arith.divf %837, %838 : vector<8x32xf32>
    %840 = vector.extract_strided_slice %833 {offsets = [0, 32], sizes = [8, 32], strides = [1, 1]} : vector<8x128xf32> to vector<8x32xf32>
    %841 = arith.negf %840 : vector<8x32xf32>
    %842 = math.exp %841 : vector<8x32xf32>
    %cst_158 = arith.constant 1.000000e+00 : f32
    %843 = vector.broadcast %cst_158 : f32 to vector<8x32xf32>
    %844 = arith.addf %843, %842 : vector<8x32xf32>
    %845 = arith.divf %843, %844 : vector<8x32xf32>
    %846 = vector.extract_strided_slice %833 {offsets = [0, 64], sizes = [8, 32], strides = [1, 1]} : vector<8x128xf32> to vector<8x32xf32>
    %847 = math.tanh %846 : vector<8x32xf32>
    %848 = vector.extract_strided_slice %833 {offsets = [0, 96], sizes = [8, 32], strides = [1, 1]} : vector<8x128xf32> to vector<8x32xf32>
    %849 = arith.negf %848 : vector<8x32xf32>
    %850 = math.exp %849 : vector<8x32xf32>
    %cst_159 = arith.constant 1.000000e+00 : f32
    %851 = vector.broadcast %cst_159 : f32 to vector<8x32xf32>
    %852 = arith.addf %851, %850 : vector<8x32xf32>
    %853 = arith.divf %851, %852 : vector<8x32xf32>
    %854 = arith.mulf %845, %828 : vector<8x32xf32>
    %855 = arith.mulf %839, %847 : vector<8x32xf32>
    %856 = arith.addf %854, %855 : vector<8x32xf32>
    %857 = math.tanh %856 : vector<8x32xf32>
    %858 = arith.mulf %853, %857 : vector<8x32xf32>
    %cst_160 = arith.constant dense<0.000000e+00> : vector<8x128xf32>
    %859 = tpu.matmul %858, %711, %cst_160 {dimension_numbers = #tpu.dot_dimension_numbers<[1], [0], [0], [1], [0, 0, 1, 1], [], []>} : vector<8x32xf32>, vector<32x128xf32>, vector<8x128xf32> -> vector<8x128xf32>
    %860 = vector.extract_strided_slice %716 {offsets = [40, 0], sizes = [8, 128], strides = [1, 1]} : vector<64x128xf32> to vector<8x128xf32>
    %861 = arith.addf %859, %860 : vector<8x128xf32>
    %862 = vector.extract_strided_slice %861 {offsets = [0, 0], sizes = [8, 32], strides = [1, 1]} : vector<8x128xf32> to vector<8x32xf32>
    %863 = arith.negf %862 : vector<8x32xf32>
    %864 = math.exp %863 : vector<8x32xf32>
    %cst_161 = arith.constant 1.000000e+00 : f32
    %865 = vector.broadcast %cst_161 : f32 to vector<8x32xf32>
    %866 = arith.addf %865, %864 : vector<8x32xf32>
    %867 = arith.divf %865, %866 : vector<8x32xf32>
    %868 = vector.extract_strided_slice %861 {offsets = [0, 32], sizes = [8, 32], strides = [1, 1]} : vector<8x128xf32> to vector<8x32xf32>
    %869 = arith.negf %868 : vector<8x32xf32>
    %870 = math.exp %869 : vector<8x32xf32>
    %cst_162 = arith.constant 1.000000e+00 : f32
    %871 = vector.broadcast %cst_162 : f32 to vector<8x32xf32>
    %872 = arith.addf %871, %870 : vector<8x32xf32>
    %873 = arith.divf %871, %872 : vector<8x32xf32>
    %874 = vector.extract_strided_slice %861 {offsets = [0, 64], sizes = [8, 32], strides = [1, 1]} : vector<8x128xf32> to vector<8x32xf32>
    %875 = math.tanh %874 : vector<8x32xf32>
    %876 = vector.extract_strided_slice %861 {offsets = [0, 96], sizes = [8, 32], strides = [1, 1]} : vector<8x128xf32> to vector<8x32xf32>
    %877 = arith.negf %876 : vector<8x32xf32>
    %878 = math.exp %877 : vector<8x32xf32>
    %cst_163 = arith.constant 1.000000e+00 : f32
    %879 = vector.broadcast %cst_163 : f32 to vector<8x32xf32>
    %880 = arith.addf %879, %878 : vector<8x32xf32>
    %881 = arith.divf %879, %880 : vector<8x32xf32>
    %882 = arith.mulf %873, %856 : vector<8x32xf32>
    %883 = arith.mulf %867, %875 : vector<8x32xf32>
    %884 = arith.addf %882, %883 : vector<8x32xf32>
    %885 = math.tanh %884 : vector<8x32xf32>
    %886 = arith.mulf %881, %885 : vector<8x32xf32>
    %cst_164 = arith.constant dense<0.000000e+00> : vector<8x128xf32>
    %887 = tpu.matmul %886, %711, %cst_164 {dimension_numbers = #tpu.dot_dimension_numbers<[1], [0], [0], [1], [0, 0, 1, 1], [], []>} : vector<8x32xf32>, vector<32x128xf32>, vector<8x128xf32> -> vector<8x128xf32>
    %888 = vector.extract_strided_slice %716 {offsets = [48, 0], sizes = [8, 128], strides = [1, 1]} : vector<64x128xf32> to vector<8x128xf32>
    %889 = arith.addf %887, %888 : vector<8x128xf32>
    %890 = vector.extract_strided_slice %889 {offsets = [0, 0], sizes = [8, 32], strides = [1, 1]} : vector<8x128xf32> to vector<8x32xf32>
    %891 = arith.negf %890 : vector<8x32xf32>
    %892 = math.exp %891 : vector<8x32xf32>
    %cst_165 = arith.constant 1.000000e+00 : f32
    %893 = vector.broadcast %cst_165 : f32 to vector<8x32xf32>
    %894 = arith.addf %893, %892 : vector<8x32xf32>
    %895 = arith.divf %893, %894 : vector<8x32xf32>
    %896 = vector.extract_strided_slice %889 {offsets = [0, 32], sizes = [8, 32], strides = [1, 1]} : vector<8x128xf32> to vector<8x32xf32>
    %897 = arith.negf %896 : vector<8x32xf32>
    %898 = math.exp %897 : vector<8x32xf32>
    %cst_166 = arith.constant 1.000000e+00 : f32
    %899 = vector.broadcast %cst_166 : f32 to vector<8x32xf32>
    %900 = arith.addf %899, %898 : vector<8x32xf32>
    %901 = arith.divf %899, %900 : vector<8x32xf32>
    %902 = vector.extract_strided_slice %889 {offsets = [0, 64], sizes = [8, 32], strides = [1, 1]} : vector<8x128xf32> to vector<8x32xf32>
    %903 = math.tanh %902 : vector<8x32xf32>
    %904 = vector.extract_strided_slice %889 {offsets = [0, 96], sizes = [8, 32], strides = [1, 1]} : vector<8x128xf32> to vector<8x32xf32>
    %905 = arith.negf %904 : vector<8x32xf32>
    %906 = math.exp %905 : vector<8x32xf32>
    %cst_167 = arith.constant 1.000000e+00 : f32
    %907 = vector.broadcast %cst_167 : f32 to vector<8x32xf32>
    %908 = arith.addf %907, %906 : vector<8x32xf32>
    %909 = arith.divf %907, %908 : vector<8x32xf32>
    %910 = arith.mulf %901, %884 : vector<8x32xf32>
    %911 = arith.mulf %895, %903 : vector<8x32xf32>
    %912 = arith.addf %910, %911 : vector<8x32xf32>
    %913 = math.tanh %912 : vector<8x32xf32>
    %914 = arith.mulf %909, %913 : vector<8x32xf32>
    %cst_168 = arith.constant dense<0.000000e+00> : vector<8x128xf32>
    %915 = tpu.matmul %914, %711, %cst_168 {dimension_numbers = #tpu.dot_dimension_numbers<[1], [0], [0], [1], [0, 0, 1, 1], [], []>} : vector<8x32xf32>, vector<32x128xf32>, vector<8x128xf32> -> vector<8x128xf32>
    %916 = vector.extract_strided_slice %716 {offsets = [56, 0], sizes = [8, 128], strides = [1, 1]} : vector<64x128xf32> to vector<8x128xf32>
    %917 = arith.addf %915, %916 : vector<8x128xf32>
    %918 = vector.extract_strided_slice %917 {offsets = [0, 0], sizes = [8, 32], strides = [1, 1]} : vector<8x128xf32> to vector<8x32xf32>
    %919 = arith.negf %918 : vector<8x32xf32>
    %920 = math.exp %919 : vector<8x32xf32>
    %cst_169 = arith.constant 1.000000e+00 : f32
    %921 = vector.broadcast %cst_169 : f32 to vector<8x32xf32>
    %922 = arith.addf %921, %920 : vector<8x32xf32>
    %923 = arith.divf %921, %922 : vector<8x32xf32>
    %924 = vector.extract_strided_slice %917 {offsets = [0, 32], sizes = [8, 32], strides = [1, 1]} : vector<8x128xf32> to vector<8x32xf32>
    %925 = arith.negf %924 : vector<8x32xf32>
    %926 = math.exp %925 : vector<8x32xf32>
    %cst_170 = arith.constant 1.000000e+00 : f32
    %927 = vector.broadcast %cst_170 : f32 to vector<8x32xf32>
    %928 = arith.addf %927, %926 : vector<8x32xf32>
    %929 = arith.divf %927, %928 : vector<8x32xf32>
    %930 = vector.extract_strided_slice %917 {offsets = [0, 64], sizes = [8, 32], strides = [1, 1]} : vector<8x128xf32> to vector<8x32xf32>
    %931 = math.tanh %930 : vector<8x32xf32>
    %932 = vector.extract_strided_slice %917 {offsets = [0, 96], sizes = [8, 32], strides = [1, 1]} : vector<8x128xf32> to vector<8x32xf32>
    %933 = arith.negf %932 : vector<8x32xf32>
    %934 = math.exp %933 : vector<8x32xf32>
    %cst_171 = arith.constant 1.000000e+00 : f32
    %935 = vector.broadcast %cst_171 : f32 to vector<8x32xf32>
    %936 = arith.addf %935, %934 : vector<8x32xf32>
    %937 = arith.divf %935, %936 : vector<8x32xf32>
    %938 = arith.mulf %929, %912 : vector<8x32xf32>
    %939 = arith.mulf %923, %931 : vector<8x32xf32>
    %940 = arith.addf %938, %939 : vector<8x32xf32>
    %941 = math.tanh %940 : vector<8x32xf32>
    %942 = arith.mulf %937, %941 : vector<8x32xf32>
    %943 = tpu.concatenate %746, %774, %802, %830, %858, %886, %914, %942 in 0 : vector<8x32xf32>, vector<8x32xf32>, vector<8x32xf32>, vector<8x32xf32>, vector<8x32xf32>, vector<8x32xf32>, vector<8x32xf32>, vector<8x32xf32> -> vector<64x32xf32>
    %c3_172 = arith.constant 3 : index
    %c0_173 = arith.constant 0 : index
    %c0_174 = arith.constant 0 : index
    %944 = vector.load %arg2[%c3_172, %c0_173, %c0_174] : memref<5x32x128xf32, #tpu.memory_space<vmem>>, vector<1x32x128xf32>
    %945 = vector.shape_cast %944 : vector<1x32x128xf32> to vector<32x128xf32>
    %c4 = arith.constant 4 : index
    %c0_175 = arith.constant 0 : index
    %c0_176 = arith.constant 0 : index
    %946 = vector.load %arg3[%c4, %c0_175, %c0_176] : memref<6x32x128xf32, #tpu.memory_space<vmem>>, vector<1x32x128xf32>
    %947 = vector.shape_cast %946 : vector<1x32x128xf32> to vector<32x128xf32>
    %cst_177 = arith.constant dense<0.000000e+00> : vector<64x128xf32>
    %948 = tpu.matmul %943, %945, %cst_177 {dimension_numbers = #tpu.dot_dimension_numbers<[1], [0], [0], [1], [0, 0, 1, 1], [], []>} : vector<64x32xf32>, vector<32x128xf32>, vector<64x128xf32> -> vector<64x128xf32>
    %c4_178 = arith.constant 4 : index
    %c0_179 = arith.constant 0 : index
    %c0_180 = arith.constant 0 : index
    %949 = vector.load %arg4[%c4_178, %c0_179, %c0_180] : memref<6x1x128xf32, #tpu.memory_space<vmem>>, vector<1x1x128xf32>
    %950 = vector.shape_cast %949 : vector<1x1x128xf32> to vector<1x128xf32>
    %951 = vector.broadcast %950 : vector<1x128xf32> to vector<64x128xf32>
    %952 = arith.addf %948, %951 : vector<64x128xf32>
    %cst_181 = arith.constant 0.000000e+00 : f32
    %953 = vector.broadcast %cst_181 : f32 to vector<8x32xf32>
    %cst_182 = arith.constant 0.000000e+00 : f32
    %954 = vector.broadcast %cst_182 : f32 to vector<8x32xf32>
    %cst_183 = arith.constant dense<0.000000e+00> : vector<8x128xf32>
    %955 = tpu.matmul %953, %947, %cst_183 {dimension_numbers = #tpu.dot_dimension_numbers<[1], [0], [0], [1], [0, 0, 1, 1], [], []>} : vector<8x32xf32>, vector<32x128xf32>, vector<8x128xf32> -> vector<8x128xf32>
    %956 = vector.extract_strided_slice %952 {offsets = [0, 0], sizes = [8, 128], strides = [1, 1]} : vector<64x128xf32> to vector<8x128xf32>
    %957 = arith.addf %955, %956 : vector<8x128xf32>
    %958 = vector.extract_strided_slice %957 {offsets = [0, 0], sizes = [8, 32], strides = [1, 1]} : vector<8x128xf32> to vector<8x32xf32>
    %959 = arith.negf %958 : vector<8x32xf32>
    %960 = math.exp %959 : vector<8x32xf32>
    %cst_184 = arith.constant 1.000000e+00 : f32
    %961 = vector.broadcast %cst_184 : f32 to vector<8x32xf32>
    %962 = arith.addf %961, %960 : vector<8x32xf32>
    %963 = arith.divf %961, %962 : vector<8x32xf32>
    %964 = vector.extract_strided_slice %957 {offsets = [0, 32], sizes = [8, 32], strides = [1, 1]} : vector<8x128xf32> to vector<8x32xf32>
    %965 = arith.negf %964 : vector<8x32xf32>
    %966 = math.exp %965 : vector<8x32xf32>
    %cst_185 = arith.constant 1.000000e+00 : f32
    %967 = vector.broadcast %cst_185 : f32 to vector<8x32xf32>
    %968 = arith.addf %967, %966 : vector<8x32xf32>
    %969 = arith.divf %967, %968 : vector<8x32xf32>
    %970 = vector.extract_strided_slice %957 {offsets = [0, 64], sizes = [8, 32], strides = [1, 1]} : vector<8x128xf32> to vector<8x32xf32>
    %971 = math.tanh %970 : vector<8x32xf32>
    %972 = vector.extract_strided_slice %957 {offsets = [0, 96], sizes = [8, 32], strides = [1, 1]} : vector<8x128xf32> to vector<8x32xf32>
    %973 = arith.negf %972 : vector<8x32xf32>
    %974 = math.exp %973 : vector<8x32xf32>
    %cst_186 = arith.constant 1.000000e+00 : f32
    %975 = vector.broadcast %cst_186 : f32 to vector<8x32xf32>
    %976 = arith.addf %975, %974 : vector<8x32xf32>
    %977 = arith.divf %975, %976 : vector<8x32xf32>
    %978 = arith.mulf %969, %954 : vector<8x32xf32>
    %979 = arith.mulf %963, %971 : vector<8x32xf32>
    %980 = arith.addf %978, %979 : vector<8x32xf32>
    %981 = math.tanh %980 : vector<8x32xf32>
    %982 = arith.mulf %977, %981 : vector<8x32xf32>
    %cst_187 = arith.constant dense<0.000000e+00> : vector<8x128xf32>
    %983 = tpu.matmul %982, %947, %cst_187 {dimension_numbers = #tpu.dot_dimension_numbers<[1], [0], [0], [1], [0, 0, 1, 1], [], []>} : vector<8x32xf32>, vector<32x128xf32>, vector<8x128xf32> -> vector<8x128xf32>
    %984 = vector.extract_strided_slice %952 {offsets = [8, 0], sizes = [8, 128], strides = [1, 1]} : vector<64x128xf32> to vector<8x128xf32>
    %985 = arith.addf %983, %984 : vector<8x128xf32>
    %986 = vector.extract_strided_slice %985 {offsets = [0, 0], sizes = [8, 32], strides = [1, 1]} : vector<8x128xf32> to vector<8x32xf32>
    %987 = arith.negf %986 : vector<8x32xf32>
    %988 = math.exp %987 : vector<8x32xf32>
    %cst_188 = arith.constant 1.000000e+00 : f32
    %989 = vector.broadcast %cst_188 : f32 to vector<8x32xf32>
    %990 = arith.addf %989, %988 : vector<8x32xf32>
    %991 = arith.divf %989, %990 : vector<8x32xf32>
    %992 = vector.extract_strided_slice %985 {offsets = [0, 32], sizes = [8, 32], strides = [1, 1]} : vector<8x128xf32> to vector<8x32xf32>
    %993 = arith.negf %992 : vector<8x32xf32>
    %994 = math.exp %993 : vector<8x32xf32>
    %cst_189 = arith.constant 1.000000e+00 : f32
    %995 = vector.broadcast %cst_189 : f32 to vector<8x32xf32>
    %996 = arith.addf %995, %994 : vector<8x32xf32>
    %997 = arith.divf %995, %996 : vector<8x32xf32>
    %998 = vector.extract_strided_slice %985 {offsets = [0, 64], sizes = [8, 32], strides = [1, 1]} : vector<8x128xf32> to vector<8x32xf32>
    %999 = math.tanh %998 : vector<8x32xf32>
    %1000 = vector.extract_strided_slice %985 {offsets = [0, 96], sizes = [8, 32], strides = [1, 1]} : vector<8x128xf32> to vector<8x32xf32>
    %1001 = arith.negf %1000 : vector<8x32xf32>
    %1002 = math.exp %1001 : vector<8x32xf32>
    %cst_190 = arith.constant 1.000000e+00 : f32
    %1003 = vector.broadcast %cst_190 : f32 to vector<8x32xf32>
    %1004 = arith.addf %1003, %1002 : vector<8x32xf32>
    %1005 = arith.divf %1003, %1004 : vector<8x32xf32>
    %1006 = arith.mulf %997, %980 : vector<8x32xf32>
    %1007 = arith.mulf %991, %999 : vector<8x32xf32>
    %1008 = arith.addf %1006, %1007 : vector<8x32xf32>
    %1009 = math.tanh %1008 : vector<8x32xf32>
    %1010 = arith.mulf %1005, %1009 : vector<8x32xf32>
    %cst_191 = arith.constant dense<0.000000e+00> : vector<8x128xf32>
    %1011 = tpu.matmul %1010, %947, %cst_191 {dimension_numbers = #tpu.dot_dimension_numbers<[1], [0], [0], [1], [0, 0, 1, 1], [], []>} : vector<8x32xf32>, vector<32x128xf32>, vector<8x128xf32> -> vector<8x128xf32>
    %1012 = vector.extract_strided_slice %952 {offsets = [16, 0], sizes = [8, 128], strides = [1, 1]} : vector<64x128xf32> to vector<8x128xf32>
    %1013 = arith.addf %1011, %1012 : vector<8x128xf32>
    %1014 = vector.extract_strided_slice %1013 {offsets = [0, 0], sizes = [8, 32], strides = [1, 1]} : vector<8x128xf32> to vector<8x32xf32>
    %1015 = arith.negf %1014 : vector<8x32xf32>
    %1016 = math.exp %1015 : vector<8x32xf32>
    %cst_192 = arith.constant 1.000000e+00 : f32
    %1017 = vector.broadcast %cst_192 : f32 to vector<8x32xf32>
    %1018 = arith.addf %1017, %1016 : vector<8x32xf32>
    %1019 = arith.divf %1017, %1018 : vector<8x32xf32>
    %1020 = vector.extract_strided_slice %1013 {offsets = [0, 32], sizes = [8, 32], strides = [1, 1]} : vector<8x128xf32> to vector<8x32xf32>
    %1021 = arith.negf %1020 : vector<8x32xf32>
    %1022 = math.exp %1021 : vector<8x32xf32>
    %cst_193 = arith.constant 1.000000e+00 : f32
    %1023 = vector.broadcast %cst_193 : f32 to vector<8x32xf32>
    %1024 = arith.addf %1023, %1022 : vector<8x32xf32>
    %1025 = arith.divf %1023, %1024 : vector<8x32xf32>
    %1026 = vector.extract_strided_slice %1013 {offsets = [0, 64], sizes = [8, 32], strides = [1, 1]} : vector<8x128xf32> to vector<8x32xf32>
    %1027 = math.tanh %1026 : vector<8x32xf32>
    %1028 = vector.extract_strided_slice %1013 {offsets = [0, 96], sizes = [8, 32], strides = [1, 1]} : vector<8x128xf32> to vector<8x32xf32>
    %1029 = arith.negf %1028 : vector<8x32xf32>
    %1030 = math.exp %1029 : vector<8x32xf32>
    %cst_194 = arith.constant 1.000000e+00 : f32
    %1031 = vector.broadcast %cst_194 : f32 to vector<8x32xf32>
    %1032 = arith.addf %1031, %1030 : vector<8x32xf32>
    %1033 = arith.divf %1031, %1032 : vector<8x32xf32>
    %1034 = arith.mulf %1025, %1008 : vector<8x32xf32>
    %1035 = arith.mulf %1019, %1027 : vector<8x32xf32>
    %1036 = arith.addf %1034, %1035 : vector<8x32xf32>
    %1037 = math.tanh %1036 : vector<8x32xf32>
    %1038 = arith.mulf %1033, %1037 : vector<8x32xf32>
    %cst_195 = arith.constant dense<0.000000e+00> : vector<8x128xf32>
    %1039 = tpu.matmul %1038, %947, %cst_195 {dimension_numbers = #tpu.dot_dimension_numbers<[1], [0], [0], [1], [0, 0, 1, 1], [], []>} : vector<8x32xf32>, vector<32x128xf32>, vector<8x128xf32> -> vector<8x128xf32>
    %1040 = vector.extract_strided_slice %952 {offsets = [24, 0], sizes = [8, 128], strides = [1, 1]} : vector<64x128xf32> to vector<8x128xf32>
    %1041 = arith.addf %1039, %1040 : vector<8x128xf32>
    %1042 = vector.extract_strided_slice %1041 {offsets = [0, 0], sizes = [8, 32], strides = [1, 1]} : vector<8x128xf32> to vector<8x32xf32>
    %1043 = arith.negf %1042 : vector<8x32xf32>
    %1044 = math.exp %1043 : vector<8x32xf32>
    %cst_196 = arith.constant 1.000000e+00 : f32
    %1045 = vector.broadcast %cst_196 : f32 to vector<8x32xf32>
    %1046 = arith.addf %1045, %1044 : vector<8x32xf32>
    %1047 = arith.divf %1045, %1046 : vector<8x32xf32>
    %1048 = vector.extract_strided_slice %1041 {offsets = [0, 32], sizes = [8, 32], strides = [1, 1]} : vector<8x128xf32> to vector<8x32xf32>
    %1049 = arith.negf %1048 : vector<8x32xf32>
    %1050 = math.exp %1049 : vector<8x32xf32>
    %cst_197 = arith.constant 1.000000e+00 : f32
    %1051 = vector.broadcast %cst_197 : f32 to vector<8x32xf32>
    %1052 = arith.addf %1051, %1050 : vector<8x32xf32>
    %1053 = arith.divf %1051, %1052 : vector<8x32xf32>
    %1054 = vector.extract_strided_slice %1041 {offsets = [0, 64], sizes = [8, 32], strides = [1, 1]} : vector<8x128xf32> to vector<8x32xf32>
    %1055 = math.tanh %1054 : vector<8x32xf32>
    %1056 = vector.extract_strided_slice %1041 {offsets = [0, 96], sizes = [8, 32], strides = [1, 1]} : vector<8x128xf32> to vector<8x32xf32>
    %1057 = arith.negf %1056 : vector<8x32xf32>
    %1058 = math.exp %1057 : vector<8x32xf32>
    %cst_198 = arith.constant 1.000000e+00 : f32
    %1059 = vector.broadcast %cst_198 : f32 to vector<8x32xf32>
    %1060 = arith.addf %1059, %1058 : vector<8x32xf32>
    %1061 = arith.divf %1059, %1060 : vector<8x32xf32>
    %1062 = arith.mulf %1053, %1036 : vector<8x32xf32>
    %1063 = arith.mulf %1047, %1055 : vector<8x32xf32>
    %1064 = arith.addf %1062, %1063 : vector<8x32xf32>
    %1065 = math.tanh %1064 : vector<8x32xf32>
    %1066 = arith.mulf %1061, %1065 : vector<8x32xf32>
    %cst_199 = arith.constant dense<0.000000e+00> : vector<8x128xf32>
    %1067 = tpu.matmul %1066, %947, %cst_199 {dimension_numbers = #tpu.dot_dimension_numbers<[1], [0], [0], [1], [0, 0, 1, 1], [], []>} : vector<8x32xf32>, vector<32x128xf32>, vector<8x128xf32> -> vector<8x128xf32>
    %1068 = vector.extract_strided_slice %952 {offsets = [32, 0], sizes = [8, 128], strides = [1, 1]} : vector<64x128xf32> to vector<8x128xf32>
    %1069 = arith.addf %1067, %1068 : vector<8x128xf32>
    %1070 = vector.extract_strided_slice %1069 {offsets = [0, 0], sizes = [8, 32], strides = [1, 1]} : vector<8x128xf32> to vector<8x32xf32>
    %1071 = arith.negf %1070 : vector<8x32xf32>
    %1072 = math.exp %1071 : vector<8x32xf32>
    %cst_200 = arith.constant 1.000000e+00 : f32
    %1073 = vector.broadcast %cst_200 : f32 to vector<8x32xf32>
    %1074 = arith.addf %1073, %1072 : vector<8x32xf32>
    %1075 = arith.divf %1073, %1074 : vector<8x32xf32>
    %1076 = vector.extract_strided_slice %1069 {offsets = [0, 32], sizes = [8, 32], strides = [1, 1]} : vector<8x128xf32> to vector<8x32xf32>
    %1077 = arith.negf %1076 : vector<8x32xf32>
    %1078 = math.exp %1077 : vector<8x32xf32>
    %cst_201 = arith.constant 1.000000e+00 : f32
    %1079 = vector.broadcast %cst_201 : f32 to vector<8x32xf32>
    %1080 = arith.addf %1079, %1078 : vector<8x32xf32>
    %1081 = arith.divf %1079, %1080 : vector<8x32xf32>
    %1082 = vector.extract_strided_slice %1069 {offsets = [0, 64], sizes = [8, 32], strides = [1, 1]} : vector<8x128xf32> to vector<8x32xf32>
    %1083 = math.tanh %1082 : vector<8x32xf32>
    %1084 = vector.extract_strided_slice %1069 {offsets = [0, 96], sizes = [8, 32], strides = [1, 1]} : vector<8x128xf32> to vector<8x32xf32>
    %1085 = arith.negf %1084 : vector<8x32xf32>
    %1086 = math.exp %1085 : vector<8x32xf32>
    %cst_202 = arith.constant 1.000000e+00 : f32
    %1087 = vector.broadcast %cst_202 : f32 to vector<8x32xf32>
    %1088 = arith.addf %1087, %1086 : vector<8x32xf32>
    %1089 = arith.divf %1087, %1088 : vector<8x32xf32>
    %1090 = arith.mulf %1081, %1064 : vector<8x32xf32>
    %1091 = arith.mulf %1075, %1083 : vector<8x32xf32>
    %1092 = arith.addf %1090, %1091 : vector<8x32xf32>
    %1093 = math.tanh %1092 : vector<8x32xf32>
    %1094 = arith.mulf %1089, %1093 : vector<8x32xf32>
    %cst_203 = arith.constant dense<0.000000e+00> : vector<8x128xf32>
    %1095 = tpu.matmul %1094, %947, %cst_203 {dimension_numbers = #tpu.dot_dimension_numbers<[1], [0], [0], [1], [0, 0, 1, 1], [], []>} : vector<8x32xf32>, vector<32x128xf32>, vector<8x128xf32> -> vector<8x128xf32>
    %1096 = vector.extract_strided_slice %952 {offsets = [40, 0], sizes = [8, 128], strides = [1, 1]} : vector<64x128xf32> to vector<8x128xf32>
    %1097 = arith.addf %1095, %1096 : vector<8x128xf32>
    %1098 = vector.extract_strided_slice %1097 {offsets = [0, 0], sizes = [8, 32], strides = [1, 1]} : vector<8x128xf32> to vector<8x32xf32>
    %1099 = arith.negf %1098 : vector<8x32xf32>
    %1100 = math.exp %1099 : vector<8x32xf32>
    %cst_204 = arith.constant 1.000000e+00 : f32
    %1101 = vector.broadcast %cst_204 : f32 to vector<8x32xf32>
    %1102 = arith.addf %1101, %1100 : vector<8x32xf32>
    %1103 = arith.divf %1101, %1102 : vector<8x32xf32>
    %1104 = vector.extract_strided_slice %1097 {offsets = [0, 32], sizes = [8, 32], strides = [1, 1]} : vector<8x128xf32> to vector<8x32xf32>
    %1105 = arith.negf %1104 : vector<8x32xf32>
    %1106 = math.exp %1105 : vector<8x32xf32>
    %cst_205 = arith.constant 1.000000e+00 : f32
    %1107 = vector.broadcast %cst_205 : f32 to vector<8x32xf32>
    %1108 = arith.addf %1107, %1106 : vector<8x32xf32>
    %1109 = arith.divf %1107, %1108 : vector<8x32xf32>
    %1110 = vector.extract_strided_slice %1097 {offsets = [0, 64], sizes = [8, 32], strides = [1, 1]} : vector<8x128xf32> to vector<8x32xf32>
    %1111 = math.tanh %1110 : vector<8x32xf32>
    %1112 = vector.extract_strided_slice %1097 {offsets = [0, 96], sizes = [8, 32], strides = [1, 1]} : vector<8x128xf32> to vector<8x32xf32>
    %1113 = arith.negf %1112 : vector<8x32xf32>
    %1114 = math.exp %1113 : vector<8x32xf32>
    %cst_206 = arith.constant 1.000000e+00 : f32
    %1115 = vector.broadcast %cst_206 : f32 to vector<8x32xf32>
    %1116 = arith.addf %1115, %1114 : vector<8x32xf32>
    %1117 = arith.divf %1115, %1116 : vector<8x32xf32>
    %1118 = arith.mulf %1109, %1092 : vector<8x32xf32>
    %1119 = arith.mulf %1103, %1111 : vector<8x32xf32>
    %1120 = arith.addf %1118, %1119 : vector<8x32xf32>
    %1121 = math.tanh %1120 : vector<8x32xf32>
    %1122 = arith.mulf %1117, %1121 : vector<8x32xf32>
    %cst_207 = arith.constant dense<0.000000e+00> : vector<8x128xf32>
    %1123 = tpu.matmul %1122, %947, %cst_207 {dimension_numbers = #tpu.dot_dimension_numbers<[1], [0], [0], [1], [0, 0, 1, 1], [], []>} : vector<8x32xf32>, vector<32x128xf32>, vector<8x128xf32> -> vector<8x128xf32>
    %1124 = vector.extract_strided_slice %952 {offsets = [48, 0], sizes = [8, 128], strides = [1, 1]} : vector<64x128xf32> to vector<8x128xf32>
    %1125 = arith.addf %1123, %1124 : vector<8x128xf32>
    %1126 = vector.extract_strided_slice %1125 {offsets = [0, 0], sizes = [8, 32], strides = [1, 1]} : vector<8x128xf32> to vector<8x32xf32>
    %1127 = arith.negf %1126 : vector<8x32xf32>
    %1128 = math.exp %1127 : vector<8x32xf32>
    %cst_208 = arith.constant 1.000000e+00 : f32
    %1129 = vector.broadcast %cst_208 : f32 to vector<8x32xf32>
    %1130 = arith.addf %1129, %1128 : vector<8x32xf32>
    %1131 = arith.divf %1129, %1130 : vector<8x32xf32>
    %1132 = vector.extract_strided_slice %1125 {offsets = [0, 32], sizes = [8, 32], strides = [1, 1]} : vector<8x128xf32> to vector<8x32xf32>
    %1133 = arith.negf %1132 : vector<8x32xf32>
    %1134 = math.exp %1133 : vector<8x32xf32>
    %cst_209 = arith.constant 1.000000e+00 : f32
    %1135 = vector.broadcast %cst_209 : f32 to vector<8x32xf32>
    %1136 = arith.addf %1135, %1134 : vector<8x32xf32>
    %1137 = arith.divf %1135, %1136 : vector<8x32xf32>
    %1138 = vector.extract_strided_slice %1125 {offsets = [0, 64], sizes = [8, 32], strides = [1, 1]} : vector<8x128xf32> to vector<8x32xf32>
    %1139 = math.tanh %1138 : vector<8x32xf32>
    %1140 = vector.extract_strided_slice %1125 {offsets = [0, 96], sizes = [8, 32], strides = [1, 1]} : vector<8x128xf32> to vector<8x32xf32>
    %1141 = arith.negf %1140 : vector<8x32xf32>
    %1142 = math.exp %1141 : vector<8x32xf32>
    %cst_210 = arith.constant 1.000000e+00 : f32
    %1143 = vector.broadcast %cst_210 : f32 to vector<8x32xf32>
    %1144 = arith.addf %1143, %1142 : vector<8x32xf32>
    %1145 = arith.divf %1143, %1144 : vector<8x32xf32>
    %1146 = arith.mulf %1137, %1120 : vector<8x32xf32>
    %1147 = arith.mulf %1131, %1139 : vector<8x32xf32>
    %1148 = arith.addf %1146, %1147 : vector<8x32xf32>
    %1149 = math.tanh %1148 : vector<8x32xf32>
    %1150 = arith.mulf %1145, %1149 : vector<8x32xf32>
    %cst_211 = arith.constant dense<0.000000e+00> : vector<8x128xf32>
    %1151 = tpu.matmul %1150, %947, %cst_211 {dimension_numbers = #tpu.dot_dimension_numbers<[1], [0], [0], [1], [0, 0, 1, 1], [], []>} : vector<8x32xf32>, vector<32x128xf32>, vector<8x128xf32> -> vector<8x128xf32>
    %1152 = vector.extract_strided_slice %952 {offsets = [56, 0], sizes = [8, 128], strides = [1, 1]} : vector<64x128xf32> to vector<8x128xf32>
    %1153 = arith.addf %1151, %1152 : vector<8x128xf32>
    %1154 = vector.extract_strided_slice %1153 {offsets = [0, 0], sizes = [8, 32], strides = [1, 1]} : vector<8x128xf32> to vector<8x32xf32>
    %1155 = arith.negf %1154 : vector<8x32xf32>
    %1156 = math.exp %1155 : vector<8x32xf32>
    %cst_212 = arith.constant 1.000000e+00 : f32
    %1157 = vector.broadcast %cst_212 : f32 to vector<8x32xf32>
    %1158 = arith.addf %1157, %1156 : vector<8x32xf32>
    %1159 = arith.divf %1157, %1158 : vector<8x32xf32>
    %1160 = vector.extract_strided_slice %1153 {offsets = [0, 32], sizes = [8, 32], strides = [1, 1]} : vector<8x128xf32> to vector<8x32xf32>
    %1161 = arith.negf %1160 : vector<8x32xf32>
    %1162 = math.exp %1161 : vector<8x32xf32>
    %cst_213 = arith.constant 1.000000e+00 : f32
    %1163 = vector.broadcast %cst_213 : f32 to vector<8x32xf32>
    %1164 = arith.addf %1163, %1162 : vector<8x32xf32>
    %1165 = arith.divf %1163, %1164 : vector<8x32xf32>
    %1166 = vector.extract_strided_slice %1153 {offsets = [0, 64], sizes = [8, 32], strides = [1, 1]} : vector<8x128xf32> to vector<8x32xf32>
    %1167 = math.tanh %1166 : vector<8x32xf32>
    %1168 = vector.extract_strided_slice %1153 {offsets = [0, 96], sizes = [8, 32], strides = [1, 1]} : vector<8x128xf32> to vector<8x32xf32>
    %1169 = arith.negf %1168 : vector<8x32xf32>
    %1170 = math.exp %1169 : vector<8x32xf32>
    %cst_214 = arith.constant 1.000000e+00 : f32
    %1171 = vector.broadcast %cst_214 : f32 to vector<8x32xf32>
    %1172 = arith.addf %1171, %1170 : vector<8x32xf32>
    %1173 = arith.divf %1171, %1172 : vector<8x32xf32>
    %1174 = arith.mulf %1165, %1148 : vector<8x32xf32>
    %1175 = arith.mulf %1159, %1167 : vector<8x32xf32>
    %1176 = arith.addf %1174, %1175 : vector<8x32xf32>
    %1177 = math.tanh %1176 : vector<8x32xf32>
    %1178 = arith.mulf %1173, %1177 : vector<8x32xf32>
    %1179 = tpu.concatenate %982, %1010, %1038, %1066, %1094, %1122, %1150, %1178 in 0 : vector<8x32xf32>, vector<8x32xf32>, vector<8x32xf32>, vector<8x32xf32>, vector<8x32xf32>, vector<8x32xf32>, vector<8x32xf32>, vector<8x32xf32> -> vector<64x32xf32>
    %c4_215 = arith.constant 4 : index
    %c0_216 = arith.constant 0 : index
    %c0_217 = arith.constant 0 : index
    %1180 = vector.load %arg2[%c4_215, %c0_216, %c0_217] : memref<5x32x128xf32, #tpu.memory_space<vmem>>, vector<1x32x128xf32>
    %1181 = vector.shape_cast %1180 : vector<1x32x128xf32> to vector<32x128xf32>
    %c5 = arith.constant 5 : index
    %c0_218 = arith.constant 0 : index
    %c0_219 = arith.constant 0 : index
    %1182 = vector.load %arg3[%c5, %c0_218, %c0_219] : memref<6x32x128xf32, #tpu.memory_space<vmem>>, vector<1x32x128xf32>
    %1183 = vector.shape_cast %1182 : vector<1x32x128xf32> to vector<32x128xf32>
    %cst_220 = arith.constant dense<0.000000e+00> : vector<64x128xf32>
    %1184 = tpu.matmul %1179, %1181, %cst_220 {dimension_numbers = #tpu.dot_dimension_numbers<[1], [0], [0], [1], [0, 0, 1, 1], [], []>} : vector<64x32xf32>, vector<32x128xf32>, vector<64x128xf32> -> vector<64x128xf32>
    %c5_221 = arith.constant 5 : index
    %c0_222 = arith.constant 0 : index
    %c0_223 = arith.constant 0 : index
    %1185 = vector.load %arg4[%c5_221, %c0_222, %c0_223] : memref<6x1x128xf32, #tpu.memory_space<vmem>>, vector<1x1x128xf32>
    %1186 = vector.shape_cast %1185 : vector<1x1x128xf32> to vector<1x128xf32>
    %1187 = vector.broadcast %1186 : vector<1x128xf32> to vector<64x128xf32>
    %1188 = arith.addf %1184, %1187 : vector<64x128xf32>
    %cst_224 = arith.constant 0.000000e+00 : f32
    %1189 = vector.broadcast %cst_224 : f32 to vector<8x32xf32>
    %cst_225 = arith.constant 0.000000e+00 : f32
    %1190 = vector.broadcast %cst_225 : f32 to vector<8x32xf32>
    %cst_226 = arith.constant dense<0.000000e+00> : vector<8x128xf32>
    %1191 = tpu.matmul %1189, %1183, %cst_226 {dimension_numbers = #tpu.dot_dimension_numbers<[1], [0], [0], [1], [0, 0, 1, 1], [], []>} : vector<8x32xf32>, vector<32x128xf32>, vector<8x128xf32> -> vector<8x128xf32>
    %1192 = vector.extract_strided_slice %1188 {offsets = [0, 0], sizes = [8, 128], strides = [1, 1]} : vector<64x128xf32> to vector<8x128xf32>
    %1193 = arith.addf %1191, %1192 : vector<8x128xf32>
    %1194 = vector.extract_strided_slice %1193 {offsets = [0, 0], sizes = [8, 32], strides = [1, 1]} : vector<8x128xf32> to vector<8x32xf32>
    %1195 = arith.negf %1194 : vector<8x32xf32>
    %1196 = math.exp %1195 : vector<8x32xf32>
    %cst_227 = arith.constant 1.000000e+00 : f32
    %1197 = vector.broadcast %cst_227 : f32 to vector<8x32xf32>
    %1198 = arith.addf %1197, %1196 : vector<8x32xf32>
    %1199 = arith.divf %1197, %1198 : vector<8x32xf32>
    %1200 = vector.extract_strided_slice %1193 {offsets = [0, 32], sizes = [8, 32], strides = [1, 1]} : vector<8x128xf32> to vector<8x32xf32>
    %1201 = arith.negf %1200 : vector<8x32xf32>
    %1202 = math.exp %1201 : vector<8x32xf32>
    %cst_228 = arith.constant 1.000000e+00 : f32
    %1203 = vector.broadcast %cst_228 : f32 to vector<8x32xf32>
    %1204 = arith.addf %1203, %1202 : vector<8x32xf32>
    %1205 = arith.divf %1203, %1204 : vector<8x32xf32>
    %1206 = vector.extract_strided_slice %1193 {offsets = [0, 64], sizes = [8, 32], strides = [1, 1]} : vector<8x128xf32> to vector<8x32xf32>
    %1207 = math.tanh %1206 : vector<8x32xf32>
    %1208 = vector.extract_strided_slice %1193 {offsets = [0, 96], sizes = [8, 32], strides = [1, 1]} : vector<8x128xf32> to vector<8x32xf32>
    %1209 = arith.negf %1208 : vector<8x32xf32>
    %1210 = math.exp %1209 : vector<8x32xf32>
    %cst_229 = arith.constant 1.000000e+00 : f32
    %1211 = vector.broadcast %cst_229 : f32 to vector<8x32xf32>
    %1212 = arith.addf %1211, %1210 : vector<8x32xf32>
    %1213 = arith.divf %1211, %1212 : vector<8x32xf32>
    %1214 = arith.mulf %1205, %1190 : vector<8x32xf32>
    %1215 = arith.mulf %1199, %1207 : vector<8x32xf32>
    %1216 = arith.addf %1214, %1215 : vector<8x32xf32>
    %1217 = math.tanh %1216 : vector<8x32xf32>
    %1218 = arith.mulf %1213, %1217 : vector<8x32xf32>
    %cst_230 = arith.constant dense<0.000000e+00> : vector<8x128xf32>
    %1219 = tpu.matmul %1218, %1183, %cst_230 {dimension_numbers = #tpu.dot_dimension_numbers<[1], [0], [0], [1], [0, 0, 1, 1], [], []>} : vector<8x32xf32>, vector<32x128xf32>, vector<8x128xf32> -> vector<8x128xf32>
    %1220 = vector.extract_strided_slice %1188 {offsets = [8, 0], sizes = [8, 128], strides = [1, 1]} : vector<64x128xf32> to vector<8x128xf32>
    %1221 = arith.addf %1219, %1220 : vector<8x128xf32>
    %1222 = vector.extract_strided_slice %1221 {offsets = [0, 0], sizes = [8, 32], strides = [1, 1]} : vector<8x128xf32> to vector<8x32xf32>
    %1223 = arith.negf %1222 : vector<8x32xf32>
    %1224 = math.exp %1223 : vector<8x32xf32>
    %cst_231 = arith.constant 1.000000e+00 : f32
    %1225 = vector.broadcast %cst_231 : f32 to vector<8x32xf32>
    %1226 = arith.addf %1225, %1224 : vector<8x32xf32>
    %1227 = arith.divf %1225, %1226 : vector<8x32xf32>
    %1228 = vector.extract_strided_slice %1221 {offsets = [0, 32], sizes = [8, 32], strides = [1, 1]} : vector<8x128xf32> to vector<8x32xf32>
    %1229 = arith.negf %1228 : vector<8x32xf32>
    %1230 = math.exp %1229 : vector<8x32xf32>
    %cst_232 = arith.constant 1.000000e+00 : f32
    %1231 = vector.broadcast %cst_232 : f32 to vector<8x32xf32>
    %1232 = arith.addf %1231, %1230 : vector<8x32xf32>
    %1233 = arith.divf %1231, %1232 : vector<8x32xf32>
    %1234 = vector.extract_strided_slice %1221 {offsets = [0, 64], sizes = [8, 32], strides = [1, 1]} : vector<8x128xf32> to vector<8x32xf32>
    %1235 = math.tanh %1234 : vector<8x32xf32>
    %1236 = vector.extract_strided_slice %1221 {offsets = [0, 96], sizes = [8, 32], strides = [1, 1]} : vector<8x128xf32> to vector<8x32xf32>
    %1237 = arith.negf %1236 : vector<8x32xf32>
    %1238 = math.exp %1237 : vector<8x32xf32>
    %cst_233 = arith.constant 1.000000e+00 : f32
    %1239 = vector.broadcast %cst_233 : f32 to vector<8x32xf32>
    %1240 = arith.addf %1239, %1238 : vector<8x32xf32>
    %1241 = arith.divf %1239, %1240 : vector<8x32xf32>
    %1242 = arith.mulf %1233, %1216 : vector<8x32xf32>
    %1243 = arith.mulf %1227, %1235 : vector<8x32xf32>
    %1244 = arith.addf %1242, %1243 : vector<8x32xf32>
    %1245 = math.tanh %1244 : vector<8x32xf32>
    %1246 = arith.mulf %1241, %1245 : vector<8x32xf32>
    %cst_234 = arith.constant dense<0.000000e+00> : vector<8x128xf32>
    %1247 = tpu.matmul %1246, %1183, %cst_234 {dimension_numbers = #tpu.dot_dimension_numbers<[1], [0], [0], [1], [0, 0, 1, 1], [], []>} : vector<8x32xf32>, vector<32x128xf32>, vector<8x128xf32> -> vector<8x128xf32>
    %1248 = vector.extract_strided_slice %1188 {offsets = [16, 0], sizes = [8, 128], strides = [1, 1]} : vector<64x128xf32> to vector<8x128xf32>
    %1249 = arith.addf %1247, %1248 : vector<8x128xf32>
    %1250 = vector.extract_strided_slice %1249 {offsets = [0, 0], sizes = [8, 32], strides = [1, 1]} : vector<8x128xf32> to vector<8x32xf32>
    %1251 = arith.negf %1250 : vector<8x32xf32>
    %1252 = math.exp %1251 : vector<8x32xf32>
    %cst_235 = arith.constant 1.000000e+00 : f32
    %1253 = vector.broadcast %cst_235 : f32 to vector<8x32xf32>
    %1254 = arith.addf %1253, %1252 : vector<8x32xf32>
    %1255 = arith.divf %1253, %1254 : vector<8x32xf32>
    %1256 = vector.extract_strided_slice %1249 {offsets = [0, 32], sizes = [8, 32], strides = [1, 1]} : vector<8x128xf32> to vector<8x32xf32>
    %1257 = arith.negf %1256 : vector<8x32xf32>
    %1258 = math.exp %1257 : vector<8x32xf32>
    %cst_236 = arith.constant 1.000000e+00 : f32
    %1259 = vector.broadcast %cst_236 : f32 to vector<8x32xf32>
    %1260 = arith.addf %1259, %1258 : vector<8x32xf32>
    %1261 = arith.divf %1259, %1260 : vector<8x32xf32>
    %1262 = vector.extract_strided_slice %1249 {offsets = [0, 64], sizes = [8, 32], strides = [1, 1]} : vector<8x128xf32> to vector<8x32xf32>
    %1263 = math.tanh %1262 : vector<8x32xf32>
    %1264 = vector.extract_strided_slice %1249 {offsets = [0, 96], sizes = [8, 32], strides = [1, 1]} : vector<8x128xf32> to vector<8x32xf32>
    %1265 = arith.negf %1264 : vector<8x32xf32>
    %1266 = math.exp %1265 : vector<8x32xf32>
    %cst_237 = arith.constant 1.000000e+00 : f32
    %1267 = vector.broadcast %cst_237 : f32 to vector<8x32xf32>
    %1268 = arith.addf %1267, %1266 : vector<8x32xf32>
    %1269 = arith.divf %1267, %1268 : vector<8x32xf32>
    %1270 = arith.mulf %1261, %1244 : vector<8x32xf32>
    %1271 = arith.mulf %1255, %1263 : vector<8x32xf32>
    %1272 = arith.addf %1270, %1271 : vector<8x32xf32>
    %1273 = math.tanh %1272 : vector<8x32xf32>
    %1274 = arith.mulf %1269, %1273 : vector<8x32xf32>
    %cst_238 = arith.constant dense<0.000000e+00> : vector<8x128xf32>
    %1275 = tpu.matmul %1274, %1183, %cst_238 {dimension_numbers = #tpu.dot_dimension_numbers<[1], [0], [0], [1], [0, 0, 1, 1], [], []>} : vector<8x32xf32>, vector<32x128xf32>, vector<8x128xf32> -> vector<8x128xf32>
    %1276 = vector.extract_strided_slice %1188 {offsets = [24, 0], sizes = [8, 128], strides = [1, 1]} : vector<64x128xf32> to vector<8x128xf32>
    %1277 = arith.addf %1275, %1276 : vector<8x128xf32>
    %1278 = vector.extract_strided_slice %1277 {offsets = [0, 0], sizes = [8, 32], strides = [1, 1]} : vector<8x128xf32> to vector<8x32xf32>
    %1279 = arith.negf %1278 : vector<8x32xf32>
    %1280 = math.exp %1279 : vector<8x32xf32>
    %cst_239 = arith.constant 1.000000e+00 : f32
    %1281 = vector.broadcast %cst_239 : f32 to vector<8x32xf32>
    %1282 = arith.addf %1281, %1280 : vector<8x32xf32>
    %1283 = arith.divf %1281, %1282 : vector<8x32xf32>
    %1284 = vector.extract_strided_slice %1277 {offsets = [0, 32], sizes = [8, 32], strides = [1, 1]} : vector<8x128xf32> to vector<8x32xf32>
    %1285 = arith.negf %1284 : vector<8x32xf32>
    %1286 = math.exp %1285 : vector<8x32xf32>
    %cst_240 = arith.constant 1.000000e+00 : f32
    %1287 = vector.broadcast %cst_240 : f32 to vector<8x32xf32>
    %1288 = arith.addf %1287, %1286 : vector<8x32xf32>
    %1289 = arith.divf %1287, %1288 : vector<8x32xf32>
    %1290 = vector.extract_strided_slice %1277 {offsets = [0, 64], sizes = [8, 32], strides = [1, 1]} : vector<8x128xf32> to vector<8x32xf32>
    %1291 = math.tanh %1290 : vector<8x32xf32>
    %1292 = vector.extract_strided_slice %1277 {offsets = [0, 96], sizes = [8, 32], strides = [1, 1]} : vector<8x128xf32> to vector<8x32xf32>
    %1293 = arith.negf %1292 : vector<8x32xf32>
    %1294 = math.exp %1293 : vector<8x32xf32>
    %cst_241 = arith.constant 1.000000e+00 : f32
    %1295 = vector.broadcast %cst_241 : f32 to vector<8x32xf32>
    %1296 = arith.addf %1295, %1294 : vector<8x32xf32>
    %1297 = arith.divf %1295, %1296 : vector<8x32xf32>
    %1298 = arith.mulf %1289, %1272 : vector<8x32xf32>
    %1299 = arith.mulf %1283, %1291 : vector<8x32xf32>
    %1300 = arith.addf %1298, %1299 : vector<8x32xf32>
    %1301 = math.tanh %1300 : vector<8x32xf32>
    %1302 = arith.mulf %1297, %1301 : vector<8x32xf32>
    %cst_242 = arith.constant dense<0.000000e+00> : vector<8x128xf32>
    %1303 = tpu.matmul %1302, %1183, %cst_242 {dimension_numbers = #tpu.dot_dimension_numbers<[1], [0], [0], [1], [0, 0, 1, 1], [], []>} : vector<8x32xf32>, vector<32x128xf32>, vector<8x128xf32> -> vector<8x128xf32>
    %1304 = vector.extract_strided_slice %1188 {offsets = [32, 0], sizes = [8, 128], strides = [1, 1]} : vector<64x128xf32> to vector<8x128xf32>
    %1305 = arith.addf %1303, %1304 : vector<8x128xf32>
    %1306 = vector.extract_strided_slice %1305 {offsets = [0, 0], sizes = [8, 32], strides = [1, 1]} : vector<8x128xf32> to vector<8x32xf32>
    %1307 = arith.negf %1306 : vector<8x32xf32>
    %1308 = math.exp %1307 : vector<8x32xf32>
    %cst_243 = arith.constant 1.000000e+00 : f32
    %1309 = vector.broadcast %cst_243 : f32 to vector<8x32xf32>
    %1310 = arith.addf %1309, %1308 : vector<8x32xf32>
    %1311 = arith.divf %1309, %1310 : vector<8x32xf32>
    %1312 = vector.extract_strided_slice %1305 {offsets = [0, 32], sizes = [8, 32], strides = [1, 1]} : vector<8x128xf32> to vector<8x32xf32>
    %1313 = arith.negf %1312 : vector<8x32xf32>
    %1314 = math.exp %1313 : vector<8x32xf32>
    %cst_244 = arith.constant 1.000000e+00 : f32
    %1315 = vector.broadcast %cst_244 : f32 to vector<8x32xf32>
    %1316 = arith.addf %1315, %1314 : vector<8x32xf32>
    %1317 = arith.divf %1315, %1316 : vector<8x32xf32>
    %1318 = vector.extract_strided_slice %1305 {offsets = [0, 64], sizes = [8, 32], strides = [1, 1]} : vector<8x128xf32> to vector<8x32xf32>
    %1319 = math.tanh %1318 : vector<8x32xf32>
    %1320 = vector.extract_strided_slice %1305 {offsets = [0, 96], sizes = [8, 32], strides = [1, 1]} : vector<8x128xf32> to vector<8x32xf32>
    %1321 = arith.negf %1320 : vector<8x32xf32>
    %1322 = math.exp %1321 : vector<8x32xf32>
    %cst_245 = arith.constant 1.000000e+00 : f32
    %1323 = vector.broadcast %cst_245 : f32 to vector<8x32xf32>
    %1324 = arith.addf %1323, %1322 : vector<8x32xf32>
    %1325 = arith.divf %1323, %1324 : vector<8x32xf32>
    %1326 = arith.mulf %1317, %1300 : vector<8x32xf32>
    %1327 = arith.mulf %1311, %1319 : vector<8x32xf32>
    %1328 = arith.addf %1326, %1327 : vector<8x32xf32>
    %1329 = math.tanh %1328 : vector<8x32xf32>
    %1330 = arith.mulf %1325, %1329 : vector<8x32xf32>
    %cst_246 = arith.constant dense<0.000000e+00> : vector<8x128xf32>
    %1331 = tpu.matmul %1330, %1183, %cst_246 {dimension_numbers = #tpu.dot_dimension_numbers<[1], [0], [0], [1], [0, 0, 1, 1], [], []>} : vector<8x32xf32>, vector<32x128xf32>, vector<8x128xf32> -> vector<8x128xf32>
    %1332 = vector.extract_strided_slice %1188 {offsets = [40, 0], sizes = [8, 128], strides = [1, 1]} : vector<64x128xf32> to vector<8x128xf32>
    %1333 = arith.addf %1331, %1332 : vector<8x128xf32>
    %1334 = vector.extract_strided_slice %1333 {offsets = [0, 0], sizes = [8, 32], strides = [1, 1]} : vector<8x128xf32> to vector<8x32xf32>
    %1335 = arith.negf %1334 : vector<8x32xf32>
    %1336 = math.exp %1335 : vector<8x32xf32>
    %cst_247 = arith.constant 1.000000e+00 : f32
    %1337 = vector.broadcast %cst_247 : f32 to vector<8x32xf32>
    %1338 = arith.addf %1337, %1336 : vector<8x32xf32>
    %1339 = arith.divf %1337, %1338 : vector<8x32xf32>
    %1340 = vector.extract_strided_slice %1333 {offsets = [0, 32], sizes = [8, 32], strides = [1, 1]} : vector<8x128xf32> to vector<8x32xf32>
    %1341 = arith.negf %1340 : vector<8x32xf32>
    %1342 = math.exp %1341 : vector<8x32xf32>
    %cst_248 = arith.constant 1.000000e+00 : f32
    %1343 = vector.broadcast %cst_248 : f32 to vector<8x32xf32>
    %1344 = arith.addf %1343, %1342 : vector<8x32xf32>
    %1345 = arith.divf %1343, %1344 : vector<8x32xf32>
    %1346 = vector.extract_strided_slice %1333 {offsets = [0, 64], sizes = [8, 32], strides = [1, 1]} : vector<8x128xf32> to vector<8x32xf32>
    %1347 = math.tanh %1346 : vector<8x32xf32>
    %1348 = vector.extract_strided_slice %1333 {offsets = [0, 96], sizes = [8, 32], strides = [1, 1]} : vector<8x128xf32> to vector<8x32xf32>
    %1349 = arith.negf %1348 : vector<8x32xf32>
    %1350 = math.exp %1349 : vector<8x32xf32>
    %cst_249 = arith.constant 1.000000e+00 : f32
    %1351 = vector.broadcast %cst_249 : f32 to vector<8x32xf32>
    %1352 = arith.addf %1351, %1350 : vector<8x32xf32>
    %1353 = arith.divf %1351, %1352 : vector<8x32xf32>
    %1354 = arith.mulf %1345, %1328 : vector<8x32xf32>
    %1355 = arith.mulf %1339, %1347 : vector<8x32xf32>
    %1356 = arith.addf %1354, %1355 : vector<8x32xf32>
    %1357 = math.tanh %1356 : vector<8x32xf32>
    %1358 = arith.mulf %1353, %1357 : vector<8x32xf32>
    %cst_250 = arith.constant dense<0.000000e+00> : vector<8x128xf32>
    %1359 = tpu.matmul %1358, %1183, %cst_250 {dimension_numbers = #tpu.dot_dimension_numbers<[1], [0], [0], [1], [0, 0, 1, 1], [], []>} : vector<8x32xf32>, vector<32x128xf32>, vector<8x128xf32> -> vector<8x128xf32>
    %1360 = vector.extract_strided_slice %1188 {offsets = [48, 0], sizes = [8, 128], strides = [1, 1]} : vector<64x128xf32> to vector<8x128xf32>
    %1361 = arith.addf %1359, %1360 : vector<8x128xf32>
    %1362 = vector.extract_strided_slice %1361 {offsets = [0, 0], sizes = [8, 32], strides = [1, 1]} : vector<8x128xf32> to vector<8x32xf32>
    %1363 = arith.negf %1362 : vector<8x32xf32>
    %1364 = math.exp %1363 : vector<8x32xf32>
    %cst_251 = arith.constant 1.000000e+00 : f32
    %1365 = vector.broadcast %cst_251 : f32 to vector<8x32xf32>
    %1366 = arith.addf %1365, %1364 : vector<8x32xf32>
    %1367 = arith.divf %1365, %1366 : vector<8x32xf32>
    %1368 = vector.extract_strided_slice %1361 {offsets = [0, 32], sizes = [8, 32], strides = [1, 1]} : vector<8x128xf32> to vector<8x32xf32>
    %1369 = arith.negf %1368 : vector<8x32xf32>
    %1370 = math.exp %1369 : vector<8x32xf32>
    %cst_252 = arith.constant 1.000000e+00 : f32
    %1371 = vector.broadcast %cst_252 : f32 to vector<8x32xf32>
    %1372 = arith.addf %1371, %1370 : vector<8x32xf32>
    %1373 = arith.divf %1371, %1372 : vector<8x32xf32>
    %1374 = vector.extract_strided_slice %1361 {offsets = [0, 64], sizes = [8, 32], strides = [1, 1]} : vector<8x128xf32> to vector<8x32xf32>
    %1375 = math.tanh %1374 : vector<8x32xf32>
    %1376 = vector.extract_strided_slice %1361 {offsets = [0, 96], sizes = [8, 32], strides = [1, 1]} : vector<8x128xf32> to vector<8x32xf32>
    %1377 = arith.negf %1376 : vector<8x32xf32>
    %1378 = math.exp %1377 : vector<8x32xf32>
    %cst_253 = arith.constant 1.000000e+00 : f32
    %1379 = vector.broadcast %cst_253 : f32 to vector<8x32xf32>
    %1380 = arith.addf %1379, %1378 : vector<8x32xf32>
    %1381 = arith.divf %1379, %1380 : vector<8x32xf32>
    %1382 = arith.mulf %1373, %1356 : vector<8x32xf32>
    %1383 = arith.mulf %1367, %1375 : vector<8x32xf32>
    %1384 = arith.addf %1382, %1383 : vector<8x32xf32>
    %1385 = math.tanh %1384 : vector<8x32xf32>
    %1386 = arith.mulf %1381, %1385 : vector<8x32xf32>
    %cst_254 = arith.constant dense<0.000000e+00> : vector<8x128xf32>
    %1387 = tpu.matmul %1386, %1183, %cst_254 {dimension_numbers = #tpu.dot_dimension_numbers<[1], [0], [0], [1], [0, 0, 1, 1], [], []>} : vector<8x32xf32>, vector<32x128xf32>, vector<8x128xf32> -> vector<8x128xf32>
    %1388 = vector.extract_strided_slice %1188 {offsets = [56, 0], sizes = [8, 128], strides = [1, 1]} : vector<64x128xf32> to vector<8x128xf32>
    %1389 = arith.addf %1387, %1388 : vector<8x128xf32>
    %1390 = vector.extract_strided_slice %1389 {offsets = [0, 0], sizes = [8, 32], strides = [1, 1]} : vector<8x128xf32> to vector<8x32xf32>
    %1391 = arith.negf %1390 : vector<8x32xf32>
    %1392 = math.exp %1391 : vector<8x32xf32>
    %cst_255 = arith.constant 1.000000e+00 : f32
    %1393 = vector.broadcast %cst_255 : f32 to vector<8x32xf32>
    %1394 = arith.addf %1393, %1392 : vector<8x32xf32>
    %1395 = arith.divf %1393, %1394 : vector<8x32xf32>
    %1396 = vector.extract_strided_slice %1389 {offsets = [0, 32], sizes = [8, 32], strides = [1, 1]} : vector<8x128xf32> to vector<8x32xf32>
    %1397 = arith.negf %1396 : vector<8x32xf32>
    %1398 = math.exp %1397 : vector<8x32xf32>
    %cst_256 = arith.constant 1.000000e+00 : f32
    %1399 = vector.broadcast %cst_256 : f32 to vector<8x32xf32>
    %1400 = arith.addf %1399, %1398 : vector<8x32xf32>
    %1401 = arith.divf %1399, %1400 : vector<8x32xf32>
    %1402 = vector.extract_strided_slice %1389 {offsets = [0, 64], sizes = [8, 32], strides = [1, 1]} : vector<8x128xf32> to vector<8x32xf32>
    %1403 = math.tanh %1402 : vector<8x32xf32>
    %1404 = vector.extract_strided_slice %1389 {offsets = [0, 96], sizes = [8, 32], strides = [1, 1]} : vector<8x128xf32> to vector<8x32xf32>
    %1405 = arith.negf %1404 : vector<8x32xf32>
    %1406 = math.exp %1405 : vector<8x32xf32>
    %cst_257 = arith.constant 1.000000e+00 : f32
    %1407 = vector.broadcast %cst_257 : f32 to vector<8x32xf32>
    %1408 = arith.addf %1407, %1406 : vector<8x32xf32>
    %1409 = arith.divf %1407, %1408 : vector<8x32xf32>
    %1410 = arith.mulf %1401, %1384 : vector<8x32xf32>
    %1411 = arith.mulf %1395, %1403 : vector<8x32xf32>
    %1412 = arith.addf %1410, %1411 : vector<8x32xf32>
    %1413 = math.tanh %1412 : vector<8x32xf32>
    %1414 = arith.mulf %1409, %1413 : vector<8x32xf32>
    %c0_258 = arith.constant 0 : index
    %c0_259 = arith.constant 0 : index
    %1415 = vector.load %arg5[%c0_258, %c0_259] : memref<1x32xf32, #tpu.memory_space<vmem>>, vector<1x32xf32>
    %1416 = vector.broadcast %1415 : vector<1x32xf32> to vector<8x32xf32>
    %1417 = arith.mulf %1414, %1416 : vector<8x32xf32>
    %cst_260 = arith.constant dense<0.000000e+00> : vector<8xf32>
    %1418 = vector.multi_reduction <add>, %1417, %cst_260 [1] : vector<8x32xf32> to vector<8xf32>
    %1419 = vector.shape_cast %1418 : vector<8xf32> to vector<8x1xf32>
    %c0_261 = arith.constant 0 : index
    %c0_262 = arith.constant 0 : index
    %1420 = vector.load %arg6[%c0_261, %c0_262] : memref<1x1xf32, #tpu.memory_space<vmem>>, vector<1x1xf32>
    %1421 = vector.broadcast %1420 : vector<1x1xf32> to vector<8x1xf32>
    %1422 = arith.addf %1419, %1421 : vector<8x1xf32>
    %c0_263 = arith.constant 0 : index
    %c0_264 = arith.constant 0 : index
    %1423 = vector.load %arg7[%c0_263, %c0_264] : memref<8x1xf32, #tpu.memory_space<vmem>>, vector<8x1xf32>
    tpu.vector_store %arg7[%c0_263, %c0_264], %1422 {strides = array<i32>} : memref<8x1xf32, #tpu.memory_space<vmem>>, vector<8x1xf32>,
    return
  }
}

</mosaic_0001>

<bundles_post_ra>
// kernel: lstm_model_forward.1
= control target key start
LH: loop header
LB: loop body
LE: loop exit
PB: predicated region body
PF: predicated region fallthrough
CT: control target
= control target key end

     0   :  { %s8487_s0 = inlined_call_operand.vmem [shape: f32[64,4], index: 0, kind: input, shape index: {}]   ;;  %s8488_s1 = inlined_call_operand.vmem [shape: f32[4,128], index: 1, kind: input, shape index: {}]   ;;  %s8489_s2 = inlined_call_operand.hbm [shape: f32[5,32,128], index: 2, kind: input, shape index: {}]   ;;  %s8490_s3 = inlined_call_operand.hbm [shape: f32[6,32,128], index: 3, kind: input, shape index: {}]   ;;  %s8491_s4 = inlined_call_operand.vmem [shape: f32[6,1,128], index: 4, kind: input, shape index: {}]   ;;  %s8492_s5 = inlined_call_operand.vmem [shape: f32[1,32], index: 5, kind: input, shape index: {}]   ;;  %s8493_s6 = inlined_call_operand.<no memory space> [shape: f32[1,1], index: 6, kind: input, shape index: {}]   ;;  %s8494_s7 = inlined_call_operand.vmem [shape: f32[8,1], index: 7, kind: output, shape index: {}]  }
   0x1   :  { %v12_v0 = vstv %s8493_s6 }
   0x2   :  { %13 = vst [vmem:[#allocation2] sm:$0x1] %v12_v0 }
   0x3   :  { %14 = vsyncpa [#allocation4], 0 }
   0x4   :  { %15 = vsyncpa [#allocation6], 0  ;;  %s7481_s26 = smov [#allocation3]   ;;  %s7433_s30 = scalar_lea.hbm %s8489_s2, 2560 }
   0x5   :  { %s25_s27 = sshll.u32 %s7481_s26, 4  ;;  %p7434_p0 = scmp.ne.s32.totalorder %s8489_s2, %s7433_s30  ;;  %s26_s27 = int_to_ptr.vmem [resolvable:$true] %s25_s27 }
   0x6   :  { %p7437_p1 = scmp.lt.u32.totalorder %s7433_s30, %s8489_s2 }
   0x8   :  { %p7439_p2 = pnand %p7437_p1, %p7434_p0 }
   0xa   :  { %7442 = shalt.err (!%p7439_p2)
}
   0xb   :  { %s7443_s6 = scalar_lea.vmem %s26_s27, 2560  ;;  %p7448_p4 = scmp.lt.s32.totalorder %s26_s27, %s26_s27 }
   0xc   :  { %p7444_p3 = scmp.ne.s32.totalorder %s26_s27, %s7443_s6  ;;  %p7449_p5 = scmp.lt.s32.totalorder %s7443_s6, %s7443_s6 }
   0xe   :  { %p7450_p6 = por %p7449_p5, %p7448_p4 }
  0x10   :  { %p7451_p7 = pnand %p7450_p6, %p7444_p3 }
  0x12   :  { %7454 = shalt.err (!%p7451_p7)
}
  0x13   :  { %s7482_s12 = smov 128   ;;  %s7483_s13 = smov 8  }
  0x14   :  { %31 = dma.hbm_to_vmem [thread:$0]  %s8489_s2, 2560, %s26_s27, [#allocation4], %s7482_s12, %s7482_s12, %s7483_s13  }
  0x15   :  { %s7484_s16 = smov [#allocation5]   ;;  %s7455_s20 = scalar_lea.hbm %s8490_s3, 3072 }
  0x16   :  { %s37_s17 = sshll.u32 %s7484_s16, 4  ;;  %p7456_p8 = scmp.ne.s32.totalorder %s8490_s3, %s7455_s20  ;;  %s38_s17 = int_to_ptr.vmem [resolvable:$true] %s37_s17 }
  0x17   :  { %p7459_p9 = scmp.lt.u32.totalorder %s7455_s20, %s8490_s3 }
  0x19   :  { %p7461_p10 = pnand %p7459_p9, %p7456_p8 }
  0x1b   :  { %7464 = shalt.err (!%p7461_p10)
}
  0x1c   :  { %s7465_s25 = scalar_lea.vmem %s38_s17, 3072  ;;  %p7470_p12 = scmp.lt.s32.totalorder %s38_s17, %s38_s17 }
  0x1d   :  { %p7466_p11 = scmp.ne.s32.totalorder %s38_s17, %s7465_s25  ;;  %p7471_p13 = scmp.lt.s32.totalorder %s7465_s25, %s7465_s25 }
  0x1f   :  { %p7472_p0 = por %p7471_p13, %p7470_p12 }
  0x21   :  { %p7473_p1 = pnand %p7472_p0, %p7466_p11 }
  0x23   :  { %7476 = shalt.err (!%p7473_p1)
}
  0x24   :  { %43 = dma.hbm_to_vmem [thread:$0]  %s8490_s3, 3072, %s38_s17, [#allocation6], %s7482_s12, %s7482_s12, %s7483_s13  }
  0x25   :  { %7477 = dma.done.wait [#allocation4], 2560  }
  0x26   :  { %7478 = vsyncadd [#allocation4], 4294964736 }
  0x27   :  { %7479 = dma.done.wait [#allocation6], 3072  }
  0x28   :  { %7480 = vsyncadd [#allocation6], 4294964224  ;;  %v7485_v1 = vmov 0.0|0.0   ;;  %vm7486_vm0 = vmmov 0   ;;  %v7487_v2 = vmov 0.0   ;;  %vm101_vm1 = vcmask 1043456  }
  0x29   :  { %6711 = vmatprep.subr.bf16.mxu1 %v7485_v1  ;;  %6091 = vmatprep.mubr.msk.f32.mxu1 %vm7486_vm0, %v7487_v2  ;;  %vm76_vm2 = vcmask 31744   ;;  %v65_v3 = vld [vmem:[#allocation5] sm:$0xff]  ;;  %v66_v4 = vld [vmem:[#allocation5 + $0x8] sm:$0xff]  ;;  %v67_v9 = vld [vmem:[#allocation5 + $0x10] sm:$0xff]  ;;  %s7488_s10 = smov 64   ;;  %s7489_s11 = smov 32  }
  0x2a   :  { %v64_v5 = vld [vmem:[%s8488_s1] sm:$0xf]  ;;  %v7564_v6 = vpack.c.bf16 %v66_v4, %v65_v3  ;;  %v57_v8 = vld [vmem:[%s8487_s0 + $0x8] sm:$0xff]  ;;  %vm210_vm3 = vcmask 261120   ;;  %v58_v47 = vld [vmem:[%s8487_s0 + $0x10] sm:$0xff]  ;;  %s7490_s8 = smov 96  }
  0x2b   :  { %6069 = vmatprep.subr.msk.mxu0 %vm101_vm1, %v64_v5  ;;  %v56_v7 = vld [vmem:[%s8487_s0] sm:$0xff]  ;;  %v59_v48 = vld [vmem:[%s8487_s0 + $0x18] sm:$0xff]  ;;  %v61_v50 = vld [vmem:[%s8487_s0 + $0x28] sm:$0xff]  ;;  %vm5600_vm4 = vcmask 7168  }
  0x2c   :  { %6070 = vmatpush3.msk.msra.mxu0 %vm101_vm1, %v64_v5  ;;  %6071 = vmatprep.mubr.msk.f32.mxu0 %vm76_vm2, %v56_v7  ;;  %v68_v10 = vld [vmem:[#allocation5 + $0x18] sm:$0xff]  ;;  %v62_v51 = vld [vmem:[%s8487_s0 + $0x30] sm:$0xff] }
  0x2d   :  { %6713 = vmatpush3.bf16.msra.mxu1 %v7564_v6  ;;  %6072 = vmatmul.mubr.msk.f32.vlgmr.msra.gmra.mrb[0].mxu0 %vm76_vm2, %v57_v8  ;;  %v7575_v11 = vpack.c.bf16 %v68_v10, %v67_v9  ;;  %v7595_v13 = vld [vmem:[%s8491_s4] ss:$0 sm:$0xff]  ;;  %v63_v52 = vld [vmem:[%s8487_s0 + $0x38] sm:$0xff] }
  0x2e   :  { %6714 = vmatprep.subr.bf16.mxu1 %v7485_v1  ;;  %6723 = vmatprep.subr.bf16.mxu0 %v7485_v1  ;;  %v60_v49 = vld [vmem:[%s8487_s0 + $0x20] sm:$0xff] }
  0x2f   :  { %6725 = vmatpush3.bf16.msra.mxu0 %v7564_v6  ;;  %6074 = vmatprep.mubr.msk.f32.mxu0 %vm76_vm2, %v58_v47 }
  0x30   :  { %6726 = vmatprep.subr.bf16.mxu0 %v7485_v1 }
  0x31   :  { %6716 = vmatpush3.bf16.msra.mxu1 %v7575_v11  ;;  %6075 = vmatmul.mubr.msk.f32.gmra.mrb[2].mxu0 %vm76_vm2, %v59_v48 }
  0x32   :  { %6717 = vmatprep.subr.bf16.mxu1 %v7485_v1  ;;  %6077 = vmatprep.mubr.msk.f32.mxu0 %vm76_vm2, %v60_v49 }
  0x33   :  { %6728 = vmatpush3.bf16.msra.mxu0 %v7575_v11 }
  0x34   :  { %6092 = vmatmul.mubr.f32.vlgmr.msra.gmra.mrb[0].mxu1 %v7487_v2  ;;  %6735 = vmatprep.subr.bf16.mxu0 %v7485_v1 }
  0x35   :  { %6719 = vmatpush3.bf16.msra.mxu1 %v7564_v6  ;;  %6102 = vmatprep.mubr.msk.f32.mxu1 %vm7486_vm0, %v7487_v2 }
  0x36   :  { %6720 = vmatprep.subr.bf16.mxu1 %v7485_v1  ;;  %6078 = vmatmul.mubr.msk.f32.gmra.mrb[4].mxu0 %vm76_vm2, %v61_v50 }
  0x37   :  { %6080 = vmatprep.mubr.msk.f32.mxu0 %vm76_vm2, %v62_v51 }
  0x39   :  { %6722 = vmatpush3.bf16.msra.mxu1 %v7575_v11 }
  0x3a   :  { %6729 = vmatprep.subr.bf16.mxu1 %v7485_v1  ;;  %6081 = vmatmul.mubr.msk.f32.gmra.mrb[6].mxu0 %vm76_vm2, %v63_v52 }
  0x3b   :  { %6113 = vmatprep.mubr.msk.f32.mxu0 %vm7486_vm0, %v7487_v2 }
 0x100   :  { %v6073_v12 = vpop.f32.mrb[0].mxu0 }
 0x101   :  { %v171_v14 = vpop.f32.mrb[1].mxu0  ;;  %v177_v33 = vadd.f32 %v6073_v12, %v7595_v13 }
 0x102   :  { %v172_v15 = vadd.f32 %v7595_v13, %v171_v14 }
 0x104   :  { %v6076_v56 = vpop.f32.mrb[2].mxu0 }
 0x105   :  { %v181_v57 = vpop.f32.mrb[3].mxu0 }
 0x106   :  { %v182_v63 = vadd.f32 %v7595_v13, %v181_v57 }
 0x107   :  { %v280_v16 = vpop.f32.mrb[0].mxu1 }
 0x108   :  { %v281_v17 = vadd.f32 %v280_v16, %v172_v15  ;;  %v6093_v18 = vpop.f32.mrb[1].mxu1 }
 0x109   :  { %v7643_v58 = vpop.f32.mrb[4].mxu0 }
 0x10a   :  { %7049 = vtanh.f32 %v281_v17  ;;  %v5618_v20 = vmul.f32 -1.442695, %v281_v17  ;;  %v7645_v59 = vpop.f32.mrb[5].mxu0 }
 0x10c   :  { %7051 = vpow2.f32 %v5618_v20 }
 0x10d   :  { %v7647_v60 = vpop.f32.mrb[6].mxu0 }
 0x10e   :  { %v7649_v61 = vpop.f32.mrb[7].mxu0 }
 0x114   :  { %v7050_v19 = vpop.eup %7049 }
 0x115   :  { %293 = vrot.lane.b32.xlu0 %v7050_v19, %s7488_s10 }
 0x116   :  { %v7052_v21 = vpop.eup %7051 }
 0x117   :  { %v287_v22 = vadd.f32 1.0, %v7052_v21 }
 0x119   :  { %7053 = vrcp.f32 %v287_v22  ;;  %v187_v22 = vadd.f32 %v6076_v56, %v7595_v13 }
 0x123   :  { %v7054_v23 = vpop.eup %7053 }
 0x124   :  { %v291_v26 = vmul.f32 0.0, %v7054_v23 }
 0x187   :  { %v294_v24 = vpop.permute.xlu0 %293 }
 0x188   :  { %v296_v25 = vmul.f32 %v7054_v23, %v294_v24 }
 0x18a   :  { %298 = vrot.lane.b32.xlu0 %v296_v25, %s7489_s11 }
 0x1fc   :  { %v299_v27 = vpop.permute.xlu0 %298 }
 0x1fd   :  { %v301_v28 = vadd.f32 %v299_v27, %v291_v26 }
 0x1ff   :  { %7055 = vtanh.f32 %v301_v28 }
 0x209   :  { %v7056_v29 = vpop.eup %7055 }
 0x20a   :  { %304 = vrot.lane.b32.xlu1 %v7056_v29, %s7488_s10 }
 0x27c   :  { %v305_v30 = vpop.permute.xlu1 %304 }
 0x27d   :  { %v307_v31 = vmul.f32 %v7054_v23, %v305_v30 }
 0x27f   :  { %309 = vrot.lane.b32.xlu1 %v307_v31, %s7489_s11 }
 0x2f1   :  { %v7602_v32 = vpop.permute.xlu1 %309 }
 0x2f2   :  { %6103 = vmatmul.mubr.msk.f32.vlgmr.msra.gmra.mrb[2].mxu1 %vm210_vm3, %v7602_v32 }
 0x2f3   :  { %6731 = vmatpush3.bf16.msra.mxu1 %v7564_v6  ;;  %6124 = vmatprep.mubr.msk.f32.mxu1 %vm7486_vm0, %v7487_v2 }
 0x2f4   :  { %6732 = vmatprep.subr.bf16.mxu1 %v7485_v1 }
 0x2f7   :  { %6734 = vmatpush3.bf16.msra.mxu1 %v7575_v11 }
 0x2f8   :  { %6741 = vmatprep.subr.bf16.mxu1 %v7485_v1 }
 0x3c5   :  { %v379_v34 = vpop.f32.mrb[2].mxu1 }
 0x3c6   :  { %v380_v35 = vadd.f32 %v379_v34, %v177_v33  ;;  %v6104_v36 = vpop.f32.mrb[3].mxu1 }
 0x3c8   :  { %7057 = vtanh.f32 %v380_v35  ;;  %v5620_v38 = vmul.f32 -1.442695, %v380_v35 }
 0x3ca   :  { %7059 = vpow2.f32 %v5620_v38 }
 0x3d2   :  { %v7058_v37 = vpop.eup %7057 }
 0x3d3   :  { %392 = vrot.lane.b32.xlu0 %v7058_v37, %s7488_s10 }
 0x3d4   :  { %v7060_v39 = vpop.eup %7059 }
 0x3d5   :  { %v386_v40 = vadd.f32 1.0, %v7060_v39 }
 0x3d7   :  { %7061 = vrcp.f32 %v386_v40 }
 0x3e1   :  { %v7062_v41 = vpop.eup %7061 }
 0x3e2   :  { %v390_v44 = vmul.f32 %v7062_v41, %v301_v28 }
 0x445   :  { %v393_v42 = vpop.permute.xlu0 %392 }
 0x446   :  { %v395_v43 = vmul.f32 %v7062_v41, %v393_v42 }
 0x448   :  { %397 = vrot.lane.b32.xlu1 %v395_v43, %s7489_s11 }
 0x4ba   :  { %v398_v45 = vpop.permute.xlu1 %397 }
 0x4bb   :  { %v400_v46 = vadd.f32 %v398_v45, %v390_v44 }
 0x4bd   :  { %7063 = vtanh.f32 %v400_v46 }
 0x4c7   :  { %v7064_v53 = vpop.eup %7063 }
 0x4c8   :  { %403 = vrot.lane.b32.xlu0 %v7064_v53, %s7488_s10 }
 0x53a   :  { %v404_v54 = vpop.permute.xlu0 %403 }
 0x53b   :  { %v406_v55 = vmul.f32 %v7062_v41, %v404_v54  ;;  %v192_v41 = vadd.f32 %v7595_v13, %v7645_v59 }
 0x53d   :  { %408 = vrot.lane.b32.xlu1 %v406_v55, %s7489_s11 }
 0x5af   :  { %v7651_v62 = vpop.permute.xlu1 %408 }
 0x5b0   :  { %6114 = vmatmul.mubr.msk.f32.vlgmr.msra.gmra.mrb[8].mxu0 %vm210_vm3, %v7651_v62 }
 0x5b1   :  { %6737 = vmatpush3.bf16.msra.mxu0 %v7564_v6  ;;  %6135 = vmatprep.mubr.msk.f32.mxu0 %vm7486_vm0, %v7487_v2 }
 0x5b2   :  { %6738 = vmatprep.subr.bf16.mxu0 %v7485_v1 }
 0x5b5   :  { %6740 = vmatpush3.bf16.msra.mxu0 %v7575_v11 }
 0x5b6   :  { %6747 = vmatprep.subr.bf16.mxu0 %v7485_v1 }
 0x683   :  { %v478_v0 = vpop.f32.mrb[8].mxu0 }
 0x684   :  { %v479_v3 = vadd.f32 %v478_v0, %v182_v63  ;;  %v6115_v4 = vpop.f32.mrb[9].mxu0  ;;  %v197_v63 = vadd.f32 %v7643_v58, %v7595_v13 }
 0x686   :  { %7065 = vtanh.f32 %v479_v3  ;;  %v5622_v7 = vmul.f32 -1.442695, %v479_v3 }
 0x688   :  { %7067 = vpow2.f32 %v5622_v7 }
 0x690   :  { %v7066_v5 = vpop.eup %7065 }
 0x691   :  { %491 = vrot.lane.b32.xlu0 %v7066_v5, %s7488_s10 }
 0x692   :  { %v7068_v8 = vpop.eup %7067 }
 0x693   :  { %v485_v9 = vadd.f32 1.0, %v7068_v8 }
 0x695   :  { %7069 = vrcp.f32 %v485_v9 }
 0x69f   :  { %v7070_v10 = vpop.eup %7069 }
 0x6a0   :  { %v489_v15 = vmul.f32 %v7070_v10, %v400_v46 }
 0x703   :  { %v492_v12 = vpop.permute.xlu0 %491 }
 0x704   :  { %v494_v14 = vmul.f32 %v7070_v10, %v492_v12 }
 0x706   :  { %496 = vrot.lane.b32.xlu1 %v494_v14, %s7489_s11 }
 0x778   :  { %v497_v16 = vpop.permute.xlu1 %496 }
 0x779   :  { %v499_v17 = vadd.f32 %v497_v16, %v489_v15  ;;  %v1001_v15 = vld [vmem:[#allocation3] sm:$0xff]  ;;  %v1002_v16 = vld [vmem:[#allocation3 + $0x8] sm:$0xff] }
 0x77b   :  { %7071 = vtanh.f32 %v499_v17 }
 0x785   :  { %v7072_v18 = vpop.eup %7071 }
 0x786   :  { %502 = vrot.lane.b32.xlu0 %v7072_v18, %s7488_s10 }
 0x7f8   :  { %v503_v19 = vpop.permute.xlu0 %502 }
 0x7f9   :  { %v505_v20 = vmul.f32 %v7070_v10, %v503_v19 }
 0x7fb   :  { %507 = vrot.lane.b32.xlu1 %v505_v20, %s7489_s11 }
 0x86d   :  { %v7666_v21 = vpop.permute.xlu1 %507 }
 0x86e   :  { %6125 = vmatmul.mubr.msk.f32.vlgmr.msra.gmra.mrb[4].mxu1 %vm210_vm3, %v7666_v21 }
 0x86f   :  { %6743 = vmatpush3.bf16.msra.mxu1 %v7564_v6  ;;  %6146 = vmatprep.mubr.msk.f32.mxu1 %vm7486_vm0, %v7487_v2 }
 0x870   :  { %6744 = vmatprep.subr.bf16.mxu1 %v7485_v1 }
 0x873   :  { %6746 = vmatpush3.bf16.msra.mxu1 %v7575_v11 }
 0x874   :  { %6753 = vmatprep.subr.bf16.mxu1 %v7485_v1 }
 0x941   :  { %v577_v23 = vpop.f32.mrb[4].mxu1 }
 0x942   :  { %v578_v24 = vadd.f32 %v577_v23, %v187_v22  ;;  %v6126_v25 = vpop.f32.mrb[5].mxu1  ;;  %v1003_v22 = vld [vmem:[#allocation3 + $0x10] sm:$0xff]  ;;  %v1004_v23 = vld [vmem:[#allocation3 + $0x18] sm:$0xff] }
 0x944   :  { %7073 = vtanh.f32 %v578_v24  ;;  %v5624_v27 = vmul.f32 -1.442695, %v578_v24  ;;  %v6763_v24 = vpack.c.bf16 %v1004_v23, %v1003_v22 }
 0x946   :  { %7075 = vpow2.f32 %v5624_v27 }
 0x94e   :  { %v7074_v26 = vpop.eup %7073 }
 0x94f   :  { %590 = vrot.lane.b32.xlu0 %v7074_v26, %s7488_s10 }
 0x950   :  { %v7076_v28 = vpop.eup %7075 }
 0x951   :  { %v584_v29 = vadd.f32 1.0, %v7076_v28 }
 0x953   :  { %7077 = vrcp.f32 %v584_v29 }
 0x95d   :  { %v7078_v30 = vpop.eup %7077 }
 0x95e   :  { %v588_v34 = vmul.f32 %v7078_v30, %v499_v17  ;;  %v6759_v17 = vpack.c.bf16 %v1002_v16, %v1001_v15 }
 0x9c1   :  { %v591_v31 = vpop.permute.xlu0 %590 }
 0x9c2   :  { %v593_v33 = vmul.f32 %v7078_v30, %v591_v31 }
 0x9c4   :  { %595 = vrot.lane.b32.xlu1 %v593_v33, %s7489_s11 }
 0xa36   :  { %v596_v35 = vpop.permute.xlu1 %595 }
 0xa37   :  { %v598_v36 = vadd.f32 %v596_v35, %v588_v34 }
 0xa39   :  { %7079 = vtanh.f32 %v598_v36 }
 0xa43   :  { %v7080_v37 = vpop.eup %7079 }
 0xa44   :  { %601 = vrot.lane.b32.xlu0 %v7080_v37, %s7488_s10 }
 0xab6   :  { %v602_v38 = vpop.permute.xlu0 %601 }
 0xab7   :  { %v604_v39 = vmul.f32 %v7078_v30, %v602_v38 }
 0xab9   :  { %606 = vrot.lane.b32.xlu1 %v604_v39, %s7489_s11 }
 0xb2b   :  { %v7681_v40 = vpop.permute.xlu1 %606 }
 0xb2c   :  { %6136 = vmatmul.mubr.msk.f32.vlgmr.msra.gmra.mrb[10].mxu0 %vm210_vm3, %v7681_v40 }
 0xb2d   :  { %6749 = vmatpush3.bf16.msra.mxu0 %v7564_v6  ;;  %6157 = vmatprep.mubr.msk.f32.mxu0 %vm7486_vm0, %v7487_v2 }
 0xb2e   :  { %6750 = vmatprep.subr.bf16.mxu0 %v7485_v1 }
 0xb31   :  { %6752 = vmatpush3.bf16.msra.mxu0 %v7575_v11 }
 0xb32   :  { %6760 = vmatprep.subr.bf16.mxu0 %v6759_v17 }
 0xbff   :  { %v676_v42 = vpop.f32.mrb[10].mxu0 }
 0xc00   :  { %v677_v43 = vadd.f32 %v676_v42, %v192_v41  ;;  %v6137_v44 = vpop.f32.mrb[11].mxu0 }
 0xc01   :  { %v1006_v44 = vld [vmem:[#allocation5 + $0x20] sm:$0xff] }
 0xc02   :  { %7081 = vtanh.f32 %v677_v43  ;;  %v5626_v46 = vmul.f32 -1.442695, %v677_v43 }
 0xc04   :  { %7083 = vpow2.f32 %v5626_v46 }
 0xc0c   :  { %v7082_v45 = vpop.eup %7081 }
 0xc0d   :  { %689 = vrot.lane.b32.xlu0 %v7082_v45, %s7488_s10  ;;  %v1007_v45 = vld [vmem:[#allocation5 + $0x28] sm:$0xff] }
 0xc0e   :  { %v7084_v47 = vpop.eup %7083  ;;  %v7739_v46 = vpack.c.bf16 %v1007_v45, %v1006_v44 }
 0xc0f   :  { %v683_v48 = vadd.f32 1.0, %v7084_v47  ;;  %v1008_v47 = vld [vmem:[#allocation5 + $0x30] sm:$0xff] }
 0xc11   :  { %7085 = vrcp.f32 %v683_v48  ;;  %v1009_v48 = vld [vmem:[#allocation5 + $0x38] sm:$0xff] }
 0xc1b   :  { %v7086_v49 = vpop.eup %7085 }
 0xc1c   :  { %v687_v52 = vmul.f32 %v7086_v49, %v598_v36 }
 0xc7f   :  { %v690_v50 = vpop.permute.xlu0 %689 }
 0xc80   :  { %v692_v51 = vmul.f32 %v7086_v49, %v690_v50 }
 0xc82   :  { %694 = vrot.lane.b32.xlu1 %v692_v51, %s7489_s11 }
 0xcf4   :  { %v695_v53 = vpop.permute.xlu1 %694 }
 0xcf5   :  { %v697_v54 = vadd.f32 %v695_v53, %v687_v52  ;;  %v207_v53 = vadd.f32 %v7647_v60, %v7595_v13 }
 0xcf7   :  { %7087 = vtanh.f32 %v697_v54 }
 0xd01   :  { %v7088_v55 = vpop.eup %7087 }
 0xd02   :  { %700 = vrot.lane.b32.xlu0 %v7088_v55, %s7488_s10 }
 0xd74   :  { %v701_v56 = vpop.permute.xlu0 %700 }
 0xd75   :  { %v703_v57 = vmul.f32 %v7086_v49, %v701_v56  ;;  %v7743_v49 = vpack.c.bf16 %v1009_v48, %v1008_v47 }
 0xd77   :  { %705 = vrot.lane.b32.xlu1 %v703_v57, %s7489_s11  ;;  %v7768_v57 = vld [vmem:[%s8491_s4 + $0x1] ss:$0 sm:$0xff] }
 0xde9   :  { %v706_v59 = vpop.permute.xlu1 %705 }
 0xdea   :  { %6147 = vmatmul.mubr.msk.f32.vlgmr.msra.gmra.mrb[6].mxu1 %vm210_vm3, %v706_v59 }
 0xdeb   :  { %6755 = vmatpush3.bf16.msra.mxu1 %v7564_v6  ;;  %6168 = vmatprep.mubr.msk.f32.mxu1 %vm7486_vm0, %v7487_v2 }
 0xdec   :  { %6756 = vmatprep.subr.bf16.mxu1 %v7485_v1 }
 0xdef   :  { %6758 = vmatpush3.bf16.msra.mxu1 %v7575_v11 }
 0xdf0   :  { %6767 = vmatprep.subr.bf16.mxu1 %v7485_v1 }
 0xebd   :  { %v775_v0 = vpop.f32.mrb[6].mxu1 }
 0xebe   :  { %v776_v3 = vadd.f32 %v775_v0, %v197_v63  ;;  %v6148_v4 = vpop.f32.mrb[7].mxu1 }
 0xec0   :  { %7089 = vtanh.f32 %v776_v3  ;;  %v5628_v6 = vmul.f32 -1.442695, %v776_v3 }
 0xec2   :  { %7091 = vpow2.f32 %v5628_v6 }
 0xeca   :  { %v7090_v5 = vpop.eup %7089 }
 0xecb   :  { %788 = vrot.lane.b32.xlu0 %v7090_v5, %s7488_s10 }
 0xecc   :  { %v7092_v7 = vpop.eup %7091 }
 0xecd   :  { %v782_v8 = vadd.f32 1.0, %v7092_v7 }
 0xecf   :  { %7093 = vrcp.f32 %v782_v8 }
 0xed9   :  { %v7094_v9 = vpop.eup %7093 }
 0xeda   :  { %v786_v12 = vmul.f32 %v7094_v9, %v697_v54 }
 0xf3d   :  { %v789_v10 = vpop.permute.xlu0 %788 }
 0xf3e   :  { %v791_v11 = vmul.f32 %v7094_v9, %v789_v10 }
 0xf40   :  { %793 = vrot.lane.b32.xlu1 %v791_v11, %s7489_s11 }
 0xfb2   :  { %v794_v14 = vpop.permute.xlu1 %793 }
 0xfb3   :  { %v796_v58 = vadd.f32 %v794_v14, %v786_v12 }
 0xfb5   :  { %7095 = vtanh.f32 %v796_v58 }
 0xfbf   :  { %v7096_v18 = vpop.eup %7095 }
 0xfc0   :  { %799 = vrot.lane.b32.xlu0 %v7096_v18, %s7488_s10 }
0x1032   :  { %v800_v19 = vpop.permute.xlu0 %799 }
0x1033   :  { %v802_v20 = vmul.f32 %v7094_v9, %v800_v19 }
0x1035   :  { %804 = vrot.lane.b32.xlu1 %v802_v20, %s7489_s11 }
0x10a7   :  { %v805_v25 = vpop.permute.xlu1 %804 }
0x10a8   :  { %6158 = vmatmul.mubr.msk.f32.vlgmr.msra.gmra.mrb[12].mxu0 %vm210_vm3, %v805_v25 }
0x10a9   :  { %6762 = vmatpush3.bf16.msra.mxu0 %v6759_v17  ;;  %6179 = vmatprep.mubr.msk.f32.mxu0 %vm210_vm3, %v7602_v32  ;;  %v202_v32 = vadd.f32 %v7595_v13, %v7649_v61 }
0x10aa   :  { %6764 = vmatprep.subr.bf16.mxu0 %v6763_v24 }
0x10ad   :  { %6766 = vmatpush3.bf16.msra.mxu0 %v6763_v24 }
0x10ae   :  { %6779 = vmatprep.subr.bf16.mxu0 %v7485_v1 }
0x10b0   :  { %6180 = vmatmul.mubr.msk.f32.vlgmr.msra.gmra.mrb[14].mxu0 %vm210_vm3, %v7651_v62 }
0x10b1   :  { %6182 = vmatprep.mubr.msk.f32.mxu0 %vm210_vm3, %v7666_v21  ;;  %6781 = vmatpush3.bf16.msra.mxu0 %v7739_v46 }
0x10b2   :  { %6782 = vmatprep.subr.bf16.mxu0 %v7485_v1 }
0x10b4   :  { %6183 = vmatmul.mubr.msk.f32.gmra.mrb[16].mxu0 %vm210_vm3, %v7681_v40 }
0x10b5   :  { %6185 = vmatprep.mubr.msk.f32.mxu0 %vm210_vm3, %v706_v59  ;;  %6784 = vmatpush3.bf16.msra.mxu0 %v7743_v49 }
0x10b6   :  { %6791 = vmatprep.subr.bf16.mxu0 %v7485_v1 }
0x10b8   :  { %6186 = vmatmul.mubr.msk.f32.gmra.mrb[18].mxu0 %vm210_vm3, %v805_v25 }
0x117b   :  { %v874_v26 = vpop.f32.mrb[12].mxu0 }
0x117c   :  { %v875_v27 = vadd.f32 %v874_v26, %v202_v32  ;;  %v6159_v28 = vpop.f32.mrb[13].mxu0 }
0x117e   :  { %7097 = vtanh.f32 %v875_v27  ;;  %v5630_v35 = vmul.f32 -1.442695, %v875_v27 }
0x1180   :  { %7099 = vpow2.f32 %v5630_v35 }
0x1183   :  { %v7723_v29 = vpop.f32.mrb[14].mxu0 }
0x1184   :  { %v1089_v62 = vpop.f32.mrb[15].mxu0 }
0x1185   :  { %v1090_v59 = vadd.f32 %v7768_v57, %v1089_v62  ;;  %v1095_v62 = vadd.f32 %v7723_v29, %v7768_v57 }
0x1187   :  { %v7725_v30 = vpop.f32.mrb[16].mxu0 }
0x1188   :  { %v7098_v21 = vpop.eup %7097  ;;  %v7727_v31 = vpop.f32.mrb[17].mxu0 }
0x1189   :  { %887 = vrot.lane.b32.xlu0 %v7098_v21, %s7488_s10 }
0x118a   :  { %v7100_v61 = vpop.eup %7099 }
0x118b   :  { %v7730_v33 = vpop.f32.mrb[18].mxu0  ;;  %v881_v36 = vadd.f32 1.0, %v7100_v61 }
0x118c   :  { %v7732_v34 = vpop.f32.mrb[19].mxu0 }
0x118d   :  { %7101 = vrcp.f32 %v881_v36 }
0x1197   :  { %v7102_v37 = vpop.eup %7101 }
0x1198   :  { %v885_v40 = vmul.f32 %v7102_v37, %v796_v58 }
0x11fb   :  { %v888_v38 = vpop.permute.xlu0 %887 }
0x11fc   :  { %v890_v39 = vmul.f32 %v7102_v37, %v888_v38 }
0x11fe   :  { %892 = vrot.lane.b32.xlu1 %v890_v39, %s7489_s11 }
0x1270   :  { %v893_v41 = vpop.permute.xlu1 %892 }
0x1271   :  { %v7735_v42 = vadd.f32 %v893_v41, %v885_v40 }
0x1273   :  { %7103 = vtanh.f32 %v7735_v42 }
0x127d   :  { %v7104_v43 = vpop.eup %7103 }
0x127e   :  { %898 = vrot.lane.b32.xlu0 %v7104_v43, %s7488_s10 }
0x12f0   :  { %v899_v50 = vpop.permute.xlu0 %898 }
0x12f1   :  { %v901_v51 = vmul.f32 %v7102_v37, %v899_v50 }
0x12f3   :  { %903 = vrot.lane.b32.xlu1 %v901_v51, %s7489_s11 }
0x1365   :  { %v904_v52 = vpop.permute.xlu1 %903 }
0x1366   :  { %6169 = vmatmul.mubr.msk.f32.vlgmr.msra.gmra.mrb[8].mxu1 %vm210_vm3, %v904_v52  ;;  %6188 = vmatprep.mubr.msk.f32.mxu0 %vm210_vm3, %v904_v52 }
0x1367   :  { %6769 = vmatpush3.bf16.msra.mxu1 %v7739_v46  ;;  %6199 = vmatprep.mubr.msk.f32.mxu1 %vm7486_vm0, %v7487_v2 }
0x1368   :  { %6770 = vmatprep.subr.bf16.mxu1 %v7485_v1 }
0x136b   :  { %6772 = vmatpush3.bf16.msra.mxu1 %v7743_v49 }
0x136c   :  { %6773 = vmatprep.subr.bf16.mxu1 %v7485_v1 }
0x136e   :  { %6200 = vmatmul.mubr.f32.vlgmr.msra.gmra.mrb[10].mxu1 %v7487_v2 }
0x136f   :  { %6775 = vmatpush3.bf16.msra.mxu1 %v7739_v46  ;;  %6210 = vmatprep.mubr.msk.f32.mxu1 %vm7486_vm0, %v7487_v2 }
0x1370   :  { %6776 = vmatprep.subr.bf16.mxu1 %v7485_v1 }
0x1373   :  { %6778 = vmatpush3.bf16.msra.mxu1 %v7743_v49 }
0x1374   :  { %6785 = vmatprep.subr.bf16.mxu1 %v7485_v1 }
0x1439   :  { %v973_v54 = vpop.f32.mrb[8].mxu1 }
0x143a   :  { %v974_v55 = vadd.f32 %v973_v54, %v207_v53  ;;  %v6170_v56 = vpop.f32.mrb[9].mxu1  ;;  %v1100_v54 = vadd.f32 %v7768_v57, %v7727_v31 }
0x143c   :  { %v5632_v58 = vmul.f32 -1.442695, %v974_v55 }
0x1441   :  { %v1194_v63 = vpop.f32.mrb[10].mxu1 }
0x1442   :  { %v1195_v0 = vadd.f32 %v1194_v63, %v1090_v59  ;;  %v6201_v3 = vpop.f32.mrb[11].mxu1 }
0x1444   :  { %7105 = vtanh.f32 %v1195_v0  ;;  %v5643_v5 = vmul.f32 -1.442695, %v1195_v0 }
0x1446   :  { %7107 = vpow2.f32 %v5643_v5 }
0x144e   :  { %v7106_v4 = vpop.eup %7105 }
0x144f   :  { %1207 = vrot.lane.b32.xlu0 %v7106_v4, %s7488_s10 }
0x1450   :  { %v7108_v13 = vpop.eup %7107 }
0x1451   :  { %v1201_v60 = vadd.f32 1.0, %v7108_v13 }
0x1453   :  { %7109 = vrcp.f32 %v1201_v60 }
0x145d   :  { %v7110_v6 = vpop.eup %7109 }
0x145e   :  { %v1205_v9 = vmul.f32 0.0, %v7110_v6 }
0x14c1   :  { %v1208_v7 = vpop.permute.xlu0 %1207 }
0x14c2   :  { %v1210_v8 = vmul.f32 %v7110_v6, %v1208_v7 }
0x14c4   :  { %1212 = vrot.lane.b32.xlu1 %v1210_v8, %s7489_s11 }
0x1536   :  { %v1213_v10 = vpop.permute.xlu1 %1212 }
0x1537   :  { %v1215_v11 = vadd.f32 %v1213_v10, %v1205_v9 }
0x1539   :  { %7111 = vtanh.f32 %v1215_v11 }
0x153a   :  { %7113 = vtanh.f32 %v974_v55 }
0x153b   :  { %7115 = vpow2.f32 %v5632_v58 }
0x1543   :  { %v7112_v12 = vpop.eup %7111 }
0x1544   :  { %1218 = vrot.lane.b32.xlu0 %v7112_v12, %s7488_s10  ;;  %v7114_v14 = vpop.eup %7113  ;;  %v1105_v12 = vadd.f32 %v7725_v30, %v7768_v57 }
0x1545   :  { %v7116_v15 = vpop.eup %7115 }
0x1546   :  { %v980_v16 = vadd.f32 1.0, %v7116_v15 }
0x1548   :  { %986 = vrot.lane.b32.xlu0 %v7114_v14, %s7488_s10  ;;  %7117 = vrcp.f32 %v980_v16 }
0x1552   :  { %v7118_v19 = vpop.eup %7117 }
0x1553   :  { %v984_v24 = vmul.f32 %v7118_v19, %v7735_v42 }
0x15b6   :  { %v1219_v17 = vpop.permute.xlu0 %1218 }
0x15b7   :  { %v1221_v18 = vmul.f32 %v7110_v6, %v1219_v17 }
0x15b9   :  { %1223 = vrot.lane.b32.xlu1 %v1221_v18, %s7489_s11 }
0x15ba   :  { %v987_v20 = vpop.permute.xlu0 %986 }
0x15bb   :  { %v989_v22 = vmul.f32 %v7118_v19, %v987_v20 }
0x15bd   :  { %991 = vrot.lane.b32.xlu0 %v989_v22, %s7489_s11 }
0x162b   :  { %v7777_v23 = vpop.permute.xlu1 %1223 }
0x162c   :  { %6211 = vmatmul.mubr.msk.f32.vlgmr.msra.gmra.mrb[12].mxu1 %vm210_vm3, %v7777_v23 }
0x162d   :  { %6787 = vmatpush3.bf16.msra.mxu1 %v7739_v46  ;;  %6232 = vmatprep.mubr.msk.f32.mxu1 %vm7486_vm0, %v7487_v2 }
0x162e   :  { %6788 = vmatprep.subr.bf16.mxu1 %v7485_v1 }
0x162f   :  { %v992_v25 = vpop.permute.xlu0 %991 }
0x1630   :  { %v994_v32 = vadd.f32 %v992_v25, %v984_v24 }
0x1631   :  { %6790 = vmatpush3.bf16.msra.mxu1 %v7743_v49 }
0x1632   :  { %7119 = vtanh.f32 %v994_v32  ;;  %6797 = vmatprep.subr.bf16.mxu1 %v7485_v1 }
0x163c   :  { %v7120_v26 = vpop.eup %7119 }
0x163d   :  { %997 = vrot.lane.b32.xlu0 %v7120_v26, %s7488_s10 }
0x16af   :  { %v998_v27 = vpop.permute.xlu0 %997 }
0x16b0   :  { %v1000_v28 = vmul.f32 %v7118_v19, %v998_v27 }
0x16b2   :  { %1019 = vrot.lane.b32.xlu0 %v1000_v28, %s7489_s11 }
0x16ff   :  { %v1293_v21 = vpop.f32.mrb[12].mxu1 }
0x1700   :  { %v1294_v35 = vadd.f32 %v1293_v21, %v1095_v62  ;;  %v6212_v61 = vpop.f32.mrb[13].mxu1  ;;  %v1110_v21 = vadd.f32 %v7768_v57, %v7732_v34 }
0x1702   :  { %7121 = vtanh.f32 %v1294_v35  ;;  %v5645_v38 = vmul.f32 -1.442695, %v1294_v35 }
0x1704   :  { %7123 = vpow2.f32 %v5645_v38 }
0x170c   :  { %v7122_v36 = vpop.eup %7121 }
0x170d   :  { %1306 = vrot.lane.b32.xlu1 %v7122_v36, %s7488_s10 }
0x170e   :  { %v7124_v39 = vpop.eup %7123 }
0x170f   :  { %v1300_v40 = vadd.f32 1.0, %v7124_v39 }
0x1711   :  { %7125 = vrcp.f32 %v1300_v40 }
0x171b   :  { %v7126_v41 = vpop.eup %7125 }
0x171c   :  { %v1304_v43 = vmul.f32 %v7126_v41, %v1215_v11 }
0x1724   :  { %v1020_v37 = vpop.permute.xlu0 %1019 }
0x1725   :  { %6189 = vmatmul.mubr.msk.f32.gmra.mrb[20].mxu0 %vm210_vm3, %v1020_v37 }
0x1726   :  { %6221 = vmatprep.mubr.msk.f32.mxu0 %vm7486_vm0, %v7487_v2 }
0x177f   :  { %v1307_v29 = vpop.permute.xlu1 %1306 }
0x1780   :  { %v1309_v42 = vmul.f32 %v7126_v41, %v1307_v29 }
0x1782   :  { %1311 = vrot.lane.b32.xlu1 %v1309_v42, %s7489_s11 }
0x17f4   :  { %v1312_v44 = vpop.permute.xlu1 %1311 }
0x17f5   :  { %v1314_v45 = vadd.f32 %v1312_v44, %v1304_v43 }
0x17f7   :  { %7127 = vtanh.f32 %v1314_v45 }
0x17f8   :  { %v7797_v47 = vpop.f32.mrb[20].mxu0 }
0x17f9   :  { %v7799_v48 = vpop.f32.mrb[21].mxu0 }
0x1801   :  { %v7128_v50 = vpop.eup %7127 }
0x1802   :  { %1317 = vrot.lane.b32.xlu1 %v7128_v50, %s7488_s10 }
0x1874   :  { %v1318_v51 = vpop.permute.xlu1 %1317 }
0x1875   :  { %v1320_v52 = vmul.f32 %v7126_v41, %v1318_v51 }
0x1877   :  { %1322 = vrot.lane.b32.xlu1 %v1320_v52, %s7489_s11 }
0x18e9   :  { %v7803_v53 = vpop.permute.xlu1 %1322 }
0x18ea   :  { %6222 = vmatmul.mubr.msk.f32.vlgmr.msra.gmra.mrb[22].mxu0 %vm210_vm3, %v7803_v53 }
0x18eb   :  { %6793 = vmatpush3.bf16.msra.mxu0 %v7739_v46  ;;  %6243 = vmatprep.mubr.msk.f32.mxu0 %vm7486_vm0, %v7487_v2 }
0x18ec   :  { %6794 = vmatprep.subr.bf16.mxu0 %v7485_v1 }
0x18ef   :  { %6796 = vmatpush3.bf16.msra.mxu0 %v7743_v49 }
0x18f0   :  { %6803 = vmatprep.subr.bf16.mxu0 %v7485_v1 }
0x19bd   :  { %v1392_v55 = vpop.f32.mrb[22].mxu0 }
0x19be   :  { %v1393_v56 = vadd.f32 %v1392_v55, %v1100_v54  ;;  %v6223_v59 = vpop.f32.mrb[23].mxu0  ;;  %v1115_v54 = vadd.f32 %v7730_v33, %v7768_v57 }
0x19c0   :  { %7129 = vtanh.f32 %v1393_v56  ;;  %v5647_v0 = vmul.f32 -1.442695, %v1393_v56 }
0x19c2   :  { %7131 = vpow2.f32 %v5647_v0 }
0x19ca   :  { %v7130_v63 = vpop.eup %7129 }
0x19cb   :  { %1405 = vrot.lane.b32.xlu0 %v7130_v63, %s7488_s10 }
0x19cc   :  { %v7132_v3 = vpop.eup %7131 }
0x19cd   :  { %v1399_v4 = vadd.f32 1.0, %v7132_v3 }
0x19cf   :  { %7133 = vrcp.f32 %v1399_v4 }
0x19d9   :  { %v7134_v5 = vpop.eup %7133 }
0x19da   :  { %v1403_v6 = vmul.f32 %v7134_v5, %v1314_v45 }
0x1a3d   :  { %v1406_v13 = vpop.permute.xlu0 %1405 }
0x1a3e   :  { %v1408_v60 = vmul.f32 %v7134_v5, %v1406_v13 }
0x1a40   :  { %1410 = vrot.lane.b32.xlu1 %v1408_v60, %s7489_s11 }
0x1ab2   :  { %v1411_v7 = vpop.permute.xlu1 %1410 }
0x1ab3   :  { %v1413_v31 = vadd.f32 %v1411_v7, %v1403_v6  ;;  %v1916_v6 = vld [vmem:[#allocation3 + $0x20] sm:$0xff]  ;;  %v1917_v7 = vld [vmem:[#allocation3 + $0x28] sm:$0xff] }
0x1ab5   :  { %7135 = vtanh.f32 %v1413_v31 }
0x1abf   :  { %v7136_v8 = vpop.eup %7135 }
0x1ac0   :  { %1416 = vrot.lane.b32.xlu0 %v7136_v8, %s7488_s10 }
0x1b32   :  { %v1417_v9 = vpop.permute.xlu0 %1416 }
0x1b33   :  { %v1419_v10 = vmul.f32 %v7134_v5, %v1417_v9 }
0x1b35   :  { %1421 = vrot.lane.b32.xlu1 %v1419_v10, %s7489_s11 }
0x1ba7   :  { %v7819_v11 = vpop.permute.xlu1 %1421 }
0x1ba8   :  { %6233 = vmatmul.mubr.msk.f32.vlgmr.msra.gmra.mrb[14].mxu1 %vm210_vm3, %v7819_v11 }
0x1ba9   :  { %6799 = vmatpush3.bf16.msra.mxu1 %v7739_v46  ;;  %6254 = vmatprep.mubr.msk.f32.mxu1 %vm7486_vm0, %v7487_v2 }
0x1baa   :  { %6800 = vmatprep.subr.bf16.mxu1 %v7485_v1 }
0x1bad   :  { %6802 = vmatpush3.bf16.msra.mxu1 %v7743_v49 }
0x1bae   :  { %6809 = vmatprep.subr.bf16.mxu1 %v7485_v1 }
0x1c7b   :  { %v1491_v14 = vpop.f32.mrb[14].mxu1 }
0x1c7c   :  { %v1492_v58 = vadd.f32 %v1491_v14, %v1105_v12  ;;  %v6234_v15 = vpop.f32.mrb[15].mxu1  ;;  %v1918_v12 = vld [vmem:[#allocation3 + $0x30] sm:$0xff]  ;;  %v1919_v14 = vld [vmem:[#allocation3 + $0x38] sm:$0xff] }
0x1c7e   :  { %7137 = vtanh.f32 %v1492_v58  ;;  %v5649_v17 = vmul.f32 -1.442695, %v1492_v58  ;;  %v6819_v58 = vpack.c.bf16 %v1919_v14, %v1918_v12 }
0x1c80   :  { %7139 = vpow2.f32 %v5649_v17 }
0x1c88   :  { %v7138_v16 = vpop.eup %7137 }
0x1c89   :  { %1504 = vrot.lane.b32.xlu0 %v7138_v16, %s7488_s10 }
0x1c8a   :  { %v7140_v18 = vpop.eup %7139 }
0x1c8b   :  { %v1498_v19 = vadd.f32 1.0, %v7140_v18 }
0x1c8d   :  { %7141 = vrcp.f32 %v1498_v19 }
0x1c97   :  { %v7142_v20 = vpop.eup %7141 }
0x1c98   :  { %v1502_v25 = vmul.f32 %v7142_v20, %v1413_v31  ;;  %v6815_v31 = vpack.c.bf16 %v1917_v7, %v1916_v6 }
0x1cfb   :  { %v1505_v22 = vpop.permute.xlu0 %1504 }
0x1cfc   :  { %v1507_v24 = vmul.f32 %v7142_v20, %v1505_v22 }
0x1cfe   :  { %1509 = vrot.lane.b32.xlu1 %v1507_v24, %s7489_s11 }
0x1d70   :  { %v1510_v32 = vpop.permute.xlu1 %1509 }
0x1d71   :  { %v1512_v30 = vadd.f32 %v1510_v32, %v1502_v25 }
0x1d73   :  { %7143 = vtanh.f32 %v1512_v30 }
0x1d7d   :  { %v7144_v26 = vpop.eup %7143 }
0x1d7e   :  { %1515 = vrot.lane.b32.xlu0 %v7144_v26, %s7488_s10 }
0x1df0   :  { %v1516_v27 = vpop.permute.xlu0 %1515 }
0x1df1   :  { %v1518_v28 = vmul.f32 %v7142_v20, %v1516_v27 }
0x1df3   :  { %1520 = vrot.lane.b32.xlu1 %v1518_v28, %s7489_s11 }
0x1e65   :  { %v7835_v62 = vpop.permute.xlu1 %1520 }
0x1e66   :  { %6244 = vmatmul.mubr.msk.f32.vlgmr.msra.gmra.mrb[24].mxu0 %vm210_vm3, %v7835_v62 }
0x1e67   :  { %6805 = vmatpush3.bf16.msra.mxu0 %v7739_v46  ;;  %6265 = vmatprep.mubr.msk.f32.mxu0 %vm7486_vm0, %v7487_v2 }
0x1e68   :  { %6806 = vmatprep.subr.bf16.mxu0 %v7485_v1 }
0x1e6b   :  { %6808 = vmatpush3.bf16.msra.mxu0 %v7743_v49 }
0x1e6c   :  { %6816 = vmatprep.subr.bf16.mxu0 %v6815_v31 }
0x1f39   :  { %v1590_v35 = vpop.f32.mrb[24].mxu0 }
0x1f3a   :  { %v1591_v61 = vadd.f32 %v1590_v35, %v1110_v21  ;;  %v6245_v36 = vpop.f32.mrb[25].mxu0 }
0x1f3b   :  { %v1921_v36 = vld [vmem:[#allocation5 + $0x40] sm:$0xff] }
0x1f3c   :  { %7145 = vtanh.f32 %v1591_v61  ;;  %v5651_v38 = vmul.f32 -1.442695, %v1591_v61 }
0x1f3e   :  { %7147 = vpow2.f32 %v5651_v38 }
0x1f46   :  { %v7146_v37 = vpop.eup %7145 }
0x1f47   :  { %1603 = vrot.lane.b32.xlu0 %v7146_v37, %s7488_s10  ;;  %v1922_v37 = vld [vmem:[#allocation5 + $0x48] sm:$0xff] }
0x1f48   :  { %v7148_v39 = vpop.eup %7147  ;;  %v7893_v38 = vpack.c.bf16 %v1922_v37, %v1921_v36 }
0x1f49   :  { %v1597_v40 = vadd.f32 1.0, %v7148_v39  ;;  %v1923_v39 = vld [vmem:[#allocation5 + $0x50] sm:$0xff] }
0x1f4b   :  { %7149 = vrcp.f32 %v1597_v40  ;;  %v1924_v40 = vld [vmem:[#allocation5 + $0x58] sm:$0xff] }
0x1f55   :  { %v7150_v41 = vpop.eup %7149 }
0x1f56   :  { %v1601_v43 = vmul.f32 %v7150_v41, %v1512_v30 }
0x1fb9   :  { %v1604_v29 = vpop.permute.xlu0 %1603 }
0x1fba   :  { %v1606_v42 = vmul.f32 %v7150_v41, %v1604_v29 }
0x1fbc   :  { %1608 = vrot.lane.b32.xlu1 %v1606_v42, %s7489_s11 }
0x202e   :  { %v1609_v44 = vpop.permute.xlu1 %1608 }
0x202f   :  { %v1611_v34 = vadd.f32 %v1609_v44, %v1601_v43  ;;  %v1125_v44 = vadd.f32 %v7797_v47, %v7768_v57 }
0x2031   :  { %7151 = vtanh.f32 %v1611_v34 }
0x203b   :  { %v7152_v45 = vpop.eup %7151 }
0x203c   :  { %1614 = vrot.lane.b32.xlu0 %v7152_v45, %s7488_s10 }
0x20ae   :  { %v1615_v50 = vpop.permute.xlu0 %1614 }
0x20af   :  { %v1617_v51 = vmul.f32 %v7150_v41, %v1615_v50  ;;  %v7897_v41 = vpack.c.bf16 %v1924_v40, %v1923_v39 }
0x20b1   :  { %1619 = vrot.lane.b32.xlu1 %v1617_v51, %s7489_s11  ;;  %v7922_v51 = vld [vmem:[%s8491_s4 + $0x2] ss:$0 sm:$0xff] }
0x2123   :  { %v1620_v52 = vpop.permute.xlu1 %1619 }
0x2124   :  { %6255 = vmatmul.mubr.msk.f32.vlgmr.msra.gmra.mrb[16].mxu1 %vm210_vm3, %v1620_v52 }
0x2125   :  { %6811 = vmatpush3.bf16.msra.mxu1 %v7739_v46  ;;  %6276 = vmatprep.mubr.msk.f32.mxu1 %vm7486_vm0, %v7487_v2 }
0x2126   :  { %6812 = vmatprep.subr.bf16.mxu1 %v7485_v1 }
0x2129   :  { %6814 = vmatpush3.bf16.msra.mxu1 %v7743_v49 }
0x212a   :  { %6823 = vmatprep.subr.bf16.mxu1 %v7485_v1 }
0x21f7   :  { %v1689_v55 = vpop.f32.mrb[16].mxu1 }
0x21f8   :  { %v1690_v56 = vadd.f32 %v1689_v55, %v1115_v54  ;;  %v6256_v59 = vpop.f32.mrb[17].mxu1 }
0x21fa   :  { %7153 = vtanh.f32 %v1690_v56  ;;  %v5653_v46 = vmul.f32 -1.442695, %v1690_v56 }
0x21fc   :  { %7155 = vpow2.f32 %v5653_v46 }
0x2204   :  { %v7154_v63 = vpop.eup %7153 }
0x2205   :  { %1702 = vrot.lane.b32.xlu0 %v7154_v63, %s7488_s10 }
0x2206   :  { %v7156_v0 = vpop.eup %7155 }
0x2207   :  { %v1696_v3 = vadd.f32 1.0, %v7156_v0 }
0x2209   :  { %7157 = vrcp.f32 %v1696_v3 }
0x2213   :  { %v7158_v4 = vpop.eup %7157 }
0x2214   :  { %v1700_v13 = vmul.f32 %v7158_v4, %v1611_v34 }
0x2277   :  { %v1703_v5 = vpop.permute.xlu0 %1702 }
0x2278   :  { %v1705_v49 = vmul.f32 %v7158_v4, %v1703_v5 }
0x227a   :  { %1707 = vrot.lane.b32.xlu1 %v1705_v49, %s7489_s11 }
0x22ec   :  { %v1708_v60 = vpop.permute.xlu1 %1707 }
0x22ed   :  { %v1710_v33 = vadd.f32 %v1708_v60, %v1700_v13 }
0x22ef   :  { %7159 = vtanh.f32 %v1710_v33 }
0x22f9   :  { %v7160_v8 = vpop.eup %7159 }
0x22fa   :  { %1713 = vrot.lane.b32.xlu0 %v7160_v8, %s7488_s10 }
0x236c   :  { %v1714_v9 = vpop.permute.xlu0 %1713 }
0x236d   :  { %v1716_v10 = vmul.f32 %v7158_v4, %v1714_v9 }
0x236f   :  { %1718 = vrot.lane.b32.xlu1 %v1716_v10, %s7489_s11 }
0x23e1   :  { %v1719_v15 = vpop.permute.xlu1 %1718 }
0x23e2   :  { %6266 = vmatmul.mubr.msk.f32.vlgmr.msra.gmra.mrb[26].mxu0 %vm210_vm3, %v1719_v15 }
0x23e3   :  { %6818 = vmatpush3.bf16.msra.mxu0 %v6815_v31  ;;  %6287 = vmatprep.mubr.msk.f32.mxu0 %vm210_vm3, %v7777_v23  ;;  %v1120_v23 = vadd.f32 %v7768_v57, %v7799_v48 }
0x23e4   :  { %6820 = vmatprep.subr.bf16.mxu0 %v6819_v58 }
0x23e7   :  { %6822 = vmatpush3.bf16.msra.mxu0 %v6819_v58 }
0x23e8   :  { %6835 = vmatprep.subr.bf16.mxu0 %v7485_v1 }
0x23ea   :  { %6288 = vmatmul.mubr.msk.f32.vlgmr.msra.gmra.mrb[28].mxu0 %vm210_vm3, %v7803_v53 }
0x23eb   :  { %6290 = vmatprep.mubr.msk.f32.mxu0 %vm210_vm3, %v7819_v11  ;;  %6837 = vmatpush3.bf16.msra.mxu0 %v7893_v38 }
0x23ec   :  { %6838 = vmatprep.subr.bf16.mxu0 %v7485_v1 }
0x23ee   :  { %6291 = vmatmul.mubr.msk.f32.gmra.mrb[30].mxu0 %vm210_vm3, %v7835_v62 }
0x23ef   :  { %6293 = vmatprep.mubr.msk.f32.mxu0 %vm210_vm3, %v1620_v52  ;;  %6840 = vmatpush3.bf16.msra.mxu0 %v7897_v41 }
0x23f0   :  { %6847 = vmatprep.subr.bf16.mxu0 %v7485_v1 }
0x23f2   :  { %6294 = vmatmul.mubr.msk.f32.gmra.mrb[32].mxu0 %vm210_vm3, %v1719_v15 }
0x24b5   :  { %v1788_v16 = vpop.f32.mrb[26].mxu0 }
0x24b6   :  { %v1789_v17 = vadd.f32 %v1788_v16, %v1120_v23  ;;  %v6267_v18 = vpop.f32.mrb[27].mxu0 }
0x24b8   :  { %7161 = vtanh.f32 %v1789_v17  ;;  %v5655_v32 = vmul.f32 -1.442695, %v1789_v17 }
0x24ba   :  { %7163 = vpow2.f32 %v5655_v32 }
0x24bd   :  { %v7877_v19 = vpop.f32.mrb[28].mxu0 }
0x24be   :  { %v2004_v53 = vpop.f32.mrb[29].mxu0 }
0x24bf   :  { %v2005_v52 = vadd.f32 %v7922_v51, %v2004_v53  ;;  %v2010_v53 = vadd.f32 %v7877_v19, %v7922_v51 }
0x24c1   :  { %v7879_v20 = vpop.f32.mrb[30].mxu0 }
0x24c2   :  { %v7162_v11 = vpop.eup %7161  ;;  %v7881_v22 = vpop.f32.mrb[31].mxu0 }
0x24c3   :  { %1801 = vrot.lane.b32.xlu0 %v7162_v11, %s7488_s10 }
0x24c4   :  { %v7164_v48 = vpop.eup %7163 }
0x24c5   :  { %v7884_v24 = vpop.f32.mrb[32].mxu0  ;;  %v1795_v30 = vadd.f32 1.0, %v7164_v48 }
0x24c6   :  { %v7886_v25 = vpop.f32.mrb[33].mxu0 }
0x24c7   :  { %7165 = vrcp.f32 %v1795_v30 }
0x24d1   :  { %v7166_v26 = vpop.eup %7165 }
0x24d2   :  { %v1799_v62 = vmul.f32 %v7166_v26, %v1710_v33 }
0x2535   :  { %v1802_v27 = vpop.permute.xlu0 %1801 }
0x2536   :  { %v1804_v28 = vmul.f32 %v7166_v26, %v1802_v27 }
0x2538   :  { %1806 = vrot.lane.b32.xlu1 %v1804_v28, %s7489_s11 }
0x25aa   :  { %v1807_v21 = vpop.permute.xlu1 %1806 }
0x25ab   :  { %v7889_v35 = vadd.f32 %v1807_v21, %v1799_v62 }
0x25ad   :  { %7167 = vtanh.f32 %v7889_v35 }
0x25b7   :  { %v7168_v61 = vpop.eup %7167 }
0x25b8   :  { %1812 = vrot.lane.b32.xlu0 %v7168_v61, %s7488_s10 }
0x262a   :  { %v1813_v29 = vpop.permute.xlu0 %1812 }
0x262b   :  { %v1815_v42 = vmul.f32 %v7166_v26, %v1813_v29 }
0x262d   :  { %1817 = vrot.lane.b32.xlu1 %v1815_v42, %s7489_s11 }
0x269f   :  { %v1818_v43 = vpop.permute.xlu1 %1817 }
0x26a0   :  { %6277 = vmatmul.mubr.msk.f32.vlgmr.msra.gmra.mrb[18].mxu1 %vm210_vm3, %v1818_v43  ;;  %6296 = vmatprep.mubr.msk.f32.mxu0 %vm210_vm3, %v1818_v43 }
0x26a1   :  { %6825 = vmatpush3.bf16.msra.mxu1 %v7893_v38  ;;  %6307 = vmatprep.mubr.msk.f32.mxu1 %vm7486_vm0, %v7487_v2 }
0x26a2   :  { %6826 = vmatprep.subr.bf16.mxu1 %v7485_v1 }
0x26a5   :  { %6828 = vmatpush3.bf16.msra.mxu1 %v7897_v41 }
0x26a6   :  { %6829 = vmatprep.subr.bf16.mxu1 %v7485_v1 }
0x26a8   :  { %6308 = vmatmul.mubr.f32.vlgmr.msra.gmra.mrb[20].mxu1 %v7487_v2 }
0x26a9   :  { %6831 = vmatpush3.bf16.msra.mxu1 %v7893_v38  ;;  %6318 = vmatprep.mubr.msk.f32.mxu1 %vm7486_vm0, %v7487_v2 }
0x26aa   :  { %6832 = vmatprep.subr.bf16.mxu1 %v7485_v1 }
0x26ad   :  { %6834 = vmatpush3.bf16.msra.mxu1 %v7897_v41 }
0x26ae   :  { %6841 = vmatprep.subr.bf16.mxu1 %v7485_v1 }
0x2773   :  { %v1887_v34 = vpop.f32.mrb[18].mxu1 }
0x2774   :  { %v1888_v45 = vadd.f32 %v1887_v34, %v1125_v44  ;;  %v6278_v50 = vpop.f32.mrb[19].mxu1  ;;  %v2015_v34 = vadd.f32 %v7922_v51, %v7881_v22 }
0x2776   :  { %v5657_v33 = vmul.f32 -1.442695, %v1888_v45 }
0x277b   :  { %v2109_v54 = vpop.f32.mrb[20].mxu1 }
0x277c   :  { %v2110_v55 = vadd.f32 %v2109_v54, %v2005_v52  ;;  %v6309_v56 = vpop.f32.mrb[21].mxu1 }
0x277e   :  { %7169 = vtanh.f32 %v2110_v55  ;;  %v5668_v63 = vmul.f32 -1.442695, %v2110_v55 }
0x2780   :  { %7171 = vpow2.f32 %v5668_v63 }
0x2788   :  { %v7170_v59 = vpop.eup %7169 }
0x2789   :  { %2122 = vrot.lane.b32.xlu0 %v7170_v59, %s7488_s10 }
0x278a   :  { %v7172_v57 = vpop.eup %7171 }
0x278b   :  { %v2116_v47 = vadd.f32 1.0, %v7172_v57 }
0x278d   :  { %7173 = vrcp.f32 %v2116_v47 }
0x2797   :  { %v7174_v46 = vpop.eup %7173 }
0x2798   :  { %v2120_v4 = vmul.f32 0.0, %v7174_v46 }
0x27fb   :  { %v2123_v0 = vpop.permute.xlu0 %2122 }
0x27fc   :  { %v2125_v3 = vmul.f32 %v7174_v46, %v2123_v0 }
0x27fe   :  { %2127 = vrot.lane.b32.xlu1 %v2125_v3, %s7489_s11 }
0x2870   :  { %v2128_v5 = vpop.permute.xlu1 %2127 }
0x2871   :  { %v2130_v49 = vadd.f32 %v2128_v5, %v2120_v4 }
0x2873   :  { %7175 = vtanh.f32 %v2130_v49 }
0x2874   :  { %7177 = vtanh.f32 %v1888_v45 }
0x2875   :  { %7179 = vpow2.f32 %v5657_v33 }
0x287d   :  { %v7176_v13 = vpop.eup %7175 }
0x287e   :  { %2133 = vrot.lane.b32.xlu0 %v7176_v13, %s7488_s10  ;;  %v7178_v60 = vpop.eup %7177  ;;  %v2020_v13 = vadd.f32 %v7879_v20, %v7922_v51 }
0x287f   :  { %v7180_v6 = vpop.eup %7179 }
0x2880   :  { %v1894_v7 = vadd.f32 1.0, %v7180_v6 }
0x2882   :  { %1900 = vrot.lane.b32.xlu0 %v7178_v60, %s7488_s10  ;;  %7181 = vrcp.f32 %v1894_v7 }
0x288c   :  { %v7182_v9 = vpop.eup %7181 }
0x288d   :  { %v1898_v58 = vmul.f32 %v7182_v9, %v7889_v35 }
0x28f0   :  { %v2134_v31 = vpop.permute.xlu0 %2133 }
0x28f1   :  { %v2136_v8 = vmul.f32 %v7174_v46, %v2134_v31 }
0x28f3   :  { %2138 = vrot.lane.b32.xlu1 %v2136_v8, %s7489_s11 }
0x28f4   :  { %v1901_v10 = vpop.permute.xlu0 %1900 }
0x28f5   :  { %v1903_v12 = vmul.f32 %v7182_v9, %v1901_v10 }
0x28f7   :  { %1905 = vrot.lane.b32.xlu0 %v1903_v12, %s7489_s11 }
0x2965   :  { %v7931_v14 = vpop.permute.xlu1 %2138 }
0x2966   :  { %6319 = vmatmul.mubr.msk.f32.vlgmr.msra.gmra.mrb[22].mxu1 %vm210_vm3, %v7931_v14 }
0x2967   :  { %6843 = vmatpush3.bf16.msra.mxu1 %v7893_v38  ;;  %6340 = vmatprep.mubr.msk.f32.mxu1 %vm7486_vm0, %v7487_v2 }
0x2968   :  { %6844 = vmatprep.subr.bf16.mxu1 %v7485_v1 }
0x2969   :  { %v1906_v15 = vpop.permute.xlu0 %1905 }
0x296a   :  { %v1908_v23 = vadd.f32 %v1906_v15, %v1898_v58 }
0x296b   :  { %6846 = vmatpush3.bf16.msra.mxu1 %v7897_v41 }
0x296c   :  { %7183 = vtanh.f32 %v1908_v23  ;;  %6853 = vmatprep.subr.bf16.mxu1 %v7485_v1 }
0x2976   :  { %v7184_v16 = vpop.eup %7183 }
0x2977   :  { %1911 = vrot.lane.b32.xlu0 %v7184_v16, %s7488_s10 }
0x29e9   :  { %v1912_v17 = vpop.permute.xlu0 %1911 }
0x29ea   :  { %v1914_v18 = vmul.f32 %v7182_v9, %v1912_v17 }
0x29ec   :  { %1934 = vrot.lane.b32.xlu0 %v1914_v18, %s7489_s11 }
0x2a39   :  { %v2208_v11 = vpop.f32.mrb[22].mxu1 }
0x2a3a   :  { %v2209_v32 = vadd.f32 %v2208_v11, %v2010_v53  ;;  %v6320_v48 = vpop.f32.mrb[23].mxu1  ;;  %v2025_v11 = vadd.f32 %v7922_v51, %v7886_v25 }
0x2a3c   :  { %7185 = vtanh.f32 %v2209_v32  ;;  %v5670_v27 = vmul.f32 -1.442695, %v2209_v32 }
0x2a3e   :  { %7187 = vpow2.f32 %v5670_v27 }
0x2a46   :  { %v7186_v30 = vpop.eup %7185 }
0x2a47   :  { %2221 = vrot.lane.b32.xlu1 %v7186_v30, %s7488_s10 }
0x2a48   :  { %v7188_v28 = vpop.eup %7187 }
0x2a49   :  { %v2215_v62 = vadd.f32 1.0, %v7188_v28 }
0x2a4b   :  { %7189 = vrcp.f32 %v2215_v62 }
0x2a55   :  { %v7190_v21 = vpop.eup %7189 }
0x2a56   :  { %v2219_v61 = vmul.f32 %v7190_v21, %v2130_v49 }
0x2a5e   :  { %v1935_v26 = vpop.permute.xlu0 %1934 }
0x2a5f   :  { %6297 = vmatmul.mubr.msk.f32.gmra.mrb[34].mxu0 %vm210_vm3, %v1935_v26 }
0x2a60   :  { %6329 = vmatprep.mubr.msk.f32.mxu0 %vm7486_vm0, %v7487_v2 }
0x2ab9   :  { %v2222_v19 = vpop.permute.xlu1 %2221 }
0x2aba   :  { %v2224_v35 = vmul.f32 %v7190_v21, %v2222_v19 }
0x2abc   :  { %2226 = vrot.lane.b32.xlu1 %v2224_v35, %s7489_s11 }
0x2b2e   :  { %v2227_v36 = vpop.permute.xlu1 %2226 }
0x2b2f   :  { %v2229_v37 = vadd.f32 %v2227_v36, %v2219_v61 }
0x2b31   :  { %7191 = vtanh.f32 %v2229_v37 }
0x2b32   :  { %v7951_v39 = vpop.f32.mrb[34].mxu0 }
0x2b33   :  { %v7953_v40 = vpop.f32.mrb[35].mxu0 }
0x2b3b   :  { %v7192_v29 = vpop.eup %7191 }
0x2b3c   :  { %2232 = vrot.lane.b32.xlu1 %v7192_v29, %s7488_s10 }
0x2bae   :  { %v2233_v42 = vpop.permute.xlu1 %2232 }
0x2baf   :  { %v2235_v43 = vmul.f32 %v7190_v21, %v2233_v42 }
0x2bb1   :  { %2237 = vrot.lane.b32.xlu1 %v2235_v43, %s7489_s11 }
0x2c23   :  { %v7957_v44 = vpop.permute.xlu1 %2237 }
0x2c24   :  { %6330 = vmatmul.mubr.msk.f32.vlgmr.msra.gmra.mrb[36].mxu0 %vm210_vm3, %v7957_v44 }
0x2c25   :  { %6849 = vmatpush3.bf16.msra.mxu0 %v7893_v38  ;;  %6351 = vmatprep.mubr.msk.f32.mxu0 %vm7486_vm0, %v7487_v2 }
0x2c26   :  { %6850 = vmatprep.subr.bf16.mxu0 %v7485_v1 }
0x2c29   :  { %6852 = vmatpush3.bf16.msra.mxu0 %v7897_v41 }
0x2c2a   :  { %6859 = vmatprep.subr.bf16.mxu0 %v7485_v1 }
0x2cf7   :  { %v2307_v45 = vpop.f32.mrb[36].mxu0 }
0x2cf8   :  { %v2308_v50 = vadd.f32 %v2307_v45, %v2015_v34  ;;  %v6331_v52 = vpop.f32.mrb[37].mxu0  ;;  %v2030_v34 = vadd.f32 %v7884_v24, %v7922_v51 }
0x2cfa   :  { %7193 = vtanh.f32 %v2308_v50  ;;  %v5672_v55 = vmul.f32 -1.442695, %v2308_v50 }
0x2cfc   :  { %7195 = vpow2.f32 %v5672_v55 }
0x2d04   :  { %v7194_v54 = vpop.eup %7193 }
0x2d05   :  { %2320 = vrot.lane.b32.xlu0 %v7194_v54, %s7488_s10 }
0x2d06   :  { %v7196_v56 = vpop.eup %7195 }
0x2d07   :  { %v2314_v59 = vadd.f32 1.0, %v7196_v56 }
0x2d09   :  { %7197 = vrcp.f32 %v2314_v59 }
0x2d13   :  { %v7198_v63 = vpop.eup %7197 }
0x2d14   :  { %v2318_v46 = vmul.f32 %v7198_v63, %v2229_v37 }
0x2d77   :  { %v2321_v57 = vpop.permute.xlu0 %2320 }
0x2d78   :  { %v2323_v47 = vmul.f32 %v7198_v63, %v2321_v57 }
0x2d7a   :  { %2325 = vrot.lane.b32.xlu1 %v2323_v47, %s7489_s11 }
0x2dec   :  { %v2326_v0 = vpop.permute.xlu1 %2325 }
0x2ded   :  { %v2328_v22 = vadd.f32 %v2326_v0, %v2318_v46  ;;  %v2831_v46 = vld [vmem:[#allocation3 + $0x40] sm:$0xff]  ;;  %v2832_v0 = vld [vmem:[#allocation3 + $0x48] sm:$0xff] }
0x2def   :  { %7199 = vtanh.f32 %v2328_v22 }
0x2df9   :  { %v7200_v3 = vpop.eup %7199 }
0x2dfa   :  { %2331 = vrot.lane.b32.xlu0 %v7200_v3, %s7488_s10 }
0x2e6c   :  { %v2332_v4 = vpop.permute.xlu0 %2331 }
0x2e6d   :  { %v2334_v5 = vmul.f32 %v7198_v63, %v2332_v4 }
0x2e6f   :  { %2336 = vrot.lane.b32.xlu1 %v2334_v5, %s7489_s11 }
0x2ee1   :  { %v7973_v49 = vpop.permute.xlu1 %2336 }
0x2ee2   :  { %6341 = vmatmul.mubr.msk.f32.vlgmr.msra.gmra.mrb[24].mxu1 %vm210_vm3, %v7973_v49 }
0x2ee3   :  { %6855 = vmatpush3.bf16.msra.mxu1 %v7893_v38  ;;  %6362 = vmatprep.mubr.msk.f32.mxu1 %vm7486_vm0, %v7487_v2 }
0x2ee4   :  { %6856 = vmatprep.subr.bf16.mxu1 %v7485_v1 }
0x2ee7   :  { %6858 = vmatpush3.bf16.msra.mxu1 %v7897_v41 }
0x2ee8   :  { %6865 = vmatprep.subr.bf16.mxu1 %v7485_v1 }
0x2fb5   :  { %v2406_v60 = vpop.f32.mrb[24].mxu1 }
0x2fb6   :  { %v2407_v33 = vadd.f32 %v2406_v60, %v2020_v13  ;;  %v6342_v6 = vpop.f32.mrb[25].mxu1  ;;  %v2833_v13 = vld [vmem:[#allocation3 + $0x50] sm:$0xff]  ;;  %v2834_v60 = vld [vmem:[#allocation3 + $0x58] sm:$0xff] }
0x2fb8   :  { %7201 = vtanh.f32 %v2407_v33  ;;  %v5674_v31 = vmul.f32 -1.442695, %v2407_v33  ;;  %v6875_v33 = vpack.c.bf16 %v2834_v60, %v2833_v13 }
0x2fba   :  { %7203 = vpow2.f32 %v5674_v31 }
0x2fc2   :  { %v7202_v7 = vpop.eup %7201 }
0x2fc3   :  { %2419 = vrot.lane.b32.xlu0 %v7202_v7, %s7488_s10 }
0x2fc4   :  { %v7204_v8 = vpop.eup %7203 }
0x2fc5   :  { %v2413_v9 = vadd.f32 1.0, %v7204_v8 }
0x2fc7   :  { %7205 = vrcp.f32 %v2413_v9 }
0x2fd1   :  { %v7206_v10 = vpop.eup %7205 }
0x2fd2   :  { %v2417_v15 = vmul.f32 %v7206_v10, %v2328_v22  ;;  %v6871_v22 = vpack.c.bf16 %v2832_v0, %v2831_v46 }
0x3035   :  { %v2420_v12 = vpop.permute.xlu0 %2419 }
0x3036   :  { %v2422_v58 = vmul.f32 %v7206_v10, %v2420_v12 }
0x3038   :  { %2424 = vrot.lane.b32.xlu1 %v2422_v58, %s7489_s11 }
0x30aa   :  { %v2425_v23 = vpop.permute.xlu1 %2424 }
0x30ab   :  { %v2427_v20 = vadd.f32 %v2425_v23, %v2417_v15 }
0x30ad   :  { %7207 = vtanh.f32 %v2427_v20 }
0x30b7   :  { %v7208_v16 = vpop.eup %7207 }
0x30b8   :  { %2430 = vrot.lane.b32.xlu0 %v7208_v16, %s7488_s10 }
0x312a   :  { %v2431_v17 = vpop.permute.xlu0 %2430 }
0x312b   :  { %v2433_v18 = vmul.f32 %v7206_v10, %v2431_v17 }
0x312d   :  { %2435 = vrot.lane.b32.xlu1 %v2433_v18, %s7489_s11 }
0x319f   :  { %v7989_v53 = vpop.permute.xlu1 %2435 }
0x31a0   :  { %6352 = vmatmul.mubr.msk.f32.vlgmr.msra.gmra.mrb[38].mxu0 %vm210_vm3, %v7989_v53 }
0x31a1   :  { %6861 = vmatpush3.bf16.msra.mxu0 %v7893_v38  ;;  %6373 = vmatprep.mubr.msk.f32.mxu0 %vm7486_vm0, %v7487_v2 }
0x31a2   :  { %6862 = vmatprep.subr.bf16.mxu0 %v7485_v1 }
0x31a5   :  { %6864 = vmatpush3.bf16.msra.mxu0 %v7897_v41 }
0x31a6   :  { %6872 = vmatprep.subr.bf16.mxu0 %v6871_v22 }
0x3273   :  { %v2505_v32 = vpop.f32.mrb[38].mxu0 }
0x3274   :  { %v2506_v48 = vadd.f32 %v2505_v32, %v2025_v11  ;;  %v6353_v30 = vpop.f32.mrb[39].mxu0 }
0x3275   :  { %v2836_v30 = vld [vmem:[#allocation5 + $0x60] sm:$0xff] }
0x3276   :  { %7209 = vtanh.f32 %v2506_v48  ;;  %v5676_v27 = vmul.f32 -1.442695, %v2506_v48 }
0x3278   :  { %7211 = vpow2.f32 %v5676_v27 }
0x3280   :  { %v7210_v26 = vpop.eup %7209 }
0x3281   :  { %2518 = vrot.lane.b32.xlu0 %v7210_v26, %s7488_s10  ;;  %v2837_v26 = vld [vmem:[#allocation5 + $0x68] sm:$0xff] }
0x3282   :  { %v7212_v28 = vpop.eup %7211  ;;  %v8047_v27 = vpack.c.bf16 %v2837_v26, %v2836_v30 }
0x3283   :  { %v2512_v62 = vadd.f32 1.0, %v7212_v28  ;;  %v2838_v28 = vld [vmem:[#allocation5 + $0x70] sm:$0xff] }
0x3285   :  { %7213 = vrcp.f32 %v2512_v62  ;;  %v2839_v62 = vld [vmem:[#allocation5 + $0x78] sm:$0xff] }
0x328f   :  { %v7214_v21 = vpop.eup %7213 }
0x3290   :  { %v2516_v61 = vmul.f32 %v7214_v21, %v2427_v20 }
0x32f3   :  { %v2519_v19 = vpop.permute.xlu0 %2518 }
0x32f4   :  { %v2521_v35 = vmul.f32 %v7214_v21, %v2519_v19 }
0x32f6   :  { %2523 = vrot.lane.b32.xlu1 %v2521_v35, %s7489_s11 }
0x3368   :  { %v2524_v36 = vpop.permute.xlu1 %2523 }
0x3369   :  { %v2526_v25 = vadd.f32 %v2524_v36, %v2516_v61  ;;  %v2040_v36 = vadd.f32 %v7951_v39, %v7922_v51 }
0x336b   :  { %7215 = vtanh.f32 %v2526_v25 }
0x3375   :  { %v7216_v37 = vpop.eup %7215 }
0x3376   :  { %2529 = vrot.lane.b32.xlu0 %v7216_v37, %s7488_s10 }
0x33e8   :  { %v2530_v29 = vpop.permute.xlu0 %2529 }
0x33e9   :  { %v2532_v42 = vmul.f32 %v7214_v21, %v2530_v29  ;;  %v8051_v21 = vpack.c.bf16 %v2839_v62, %v2838_v28 }
0x33eb   :  { %2534 = vrot.lane.b32.xlu1 %v2532_v42, %s7489_s11  ;;  %v8076_v42 = vld [vmem:[%s8491_s4 + $0x3] ss:$0 sm:$0xff] }
0x345d   :  { %v2535_v43 = vpop.permute.xlu1 %2534 }
0x345e   :  { %6363 = vmatmul.mubr.msk.f32.vlgmr.msra.gmra.mrb[26].mxu1 %vm210_vm3, %v2535_v43 }
0x345f   :  { %6867 = vmatpush3.bf16.msra.mxu1 %v7893_v38  ;;  %6384 = vmatprep.mubr.msk.f32.mxu1 %vm7486_vm0, %v7487_v2 }
0x3460   :  { %6868 = vmatprep.subr.bf16.mxu1 %v7485_v1 }
0x3463   :  { %6870 = vmatpush3.bf16.msra.mxu1 %v7897_v41 }
0x3464   :  { %6879 = vmatprep.subr.bf16.mxu1 %v7485_v1 }
0x3531   :  { %v2604_v45 = vpop.f32.mrb[26].mxu1 }
0x3532   :  { %v2605_v50 = vadd.f32 %v2604_v45, %v2030_v34  ;;  %v6364_v52 = vpop.f32.mrb[27].mxu1 }
0x3534   :  { %7217 = vtanh.f32 %v2605_v50  ;;  %v5678_v38 = vmul.f32 -1.442695, %v2605_v50 }
0x3536   :  { %7219 = vpow2.f32 %v5678_v38 }
0x353e   :  { %v7218_v54 = vpop.eup %7217 }
0x353f   :  { %2617 = vrot.lane.b32.xlu0 %v7218_v54, %s7488_s10 }
0x3540   :  { %v7220_v55 = vpop.eup %7219 }
0x3541   :  { %v2611_v56 = vadd.f32 1.0, %v7220_v55 }
0x3543   :  { %7221 = vrcp.f32 %v2611_v56 }
0x354d   :  { %v7222_v59 = vpop.eup %7221 }
0x354e   :  { %v2615_v57 = vmul.f32 %v7222_v59, %v2526_v25 }
0x35b1   :  { %v2618_v63 = vpop.permute.xlu0 %2617 }
0x35b2   :  { %v2620_v41 = vmul.f32 %v7222_v59, %v2618_v63 }
0x35b4   :  { %2622 = vrot.lane.b32.xlu1 %v2620_v41, %s7489_s11 }
0x3626   :  { %v2623_v47 = vpop.permute.xlu1 %2622 }
0x3627   :  { %v2625_v24 = vadd.f32 %v2623_v47, %v2615_v57 }
0x3629   :  { %7223 = vtanh.f32 %v2625_v24 }
0x3633   :  { %v7224_v3 = vpop.eup %7223 }
0x3634   :  { %2628 = vrot.lane.b32.xlu0 %v7224_v3, %s7488_s10 }
0x36a6   :  { %v2629_v4 = vpop.permute.xlu0 %2628 }
0x36a7   :  { %v2631_v5 = vmul.f32 %v7222_v59, %v2629_v4 }
0x36a9   :  { %2633 = vrot.lane.b32.xlu1 %v2631_v5, %s7489_s11 }
0x371b   :  { %v2634_v6 = vpop.permute.xlu1 %2633 }
0x371c   :  { %6374 = vmatmul.mubr.msk.f32.vlgmr.msra.gmra.mrb[40].mxu0 %vm210_vm3, %v2634_v6 }
0x371d   :  { %6874 = vmatpush3.bf16.msra.mxu0 %v6871_v22  ;;  %6395 = vmatprep.mubr.msk.f32.mxu0 %vm210_vm3, %v7931_v14  ;;  %v2035_v14 = vadd.f32 %v7922_v51, %v7953_v40 }
0x371e   :  { %6876 = vmatprep.subr.bf16.mxu0 %v6875_v33 }
0x3721   :  { %6878 = vmatpush3.bf16.msra.mxu0 %v6875_v33 }
0x3722   :  { %6891 = vmatprep.subr.bf16.mxu0 %v7485_v1 }
0x3724   :  { %6396 = vmatmul.mubr.msk.f32.vlgmr.msra.gmra.mrb[42].mxu0 %vm210_vm3, %v7957_v44 }
0x3725   :  { %6398 = vmatprep.mubr.msk.f32.mxu0 %vm210_vm3, %v7973_v49  ;;  %6893 = vmatpush3.bf16.msra.mxu0 %v8047_v27 }
0x3726   :  { %6894 = vmatprep.subr.bf16.mxu0 %v7485_v1 }
0x3728   :  { %6399 = vmatmul.mubr.msk.f32.gmra.mrb[44].mxu0 %vm210_vm3, %v7989_v53 }
0x3729   :  { %6401 = vmatprep.mubr.msk.f32.mxu0 %vm210_vm3, %v2535_v43  ;;  %6896 = vmatpush3.bf16.msra.mxu0 %v8051_v21 }
0x372a   :  { %6903 = vmatprep.subr.bf16.mxu0 %v7485_v1 }
0x372c   :  { %6402 = vmatmul.mubr.msk.f32.gmra.mrb[46].mxu0 %vm210_vm3, %v2634_v6 }
0x37ef   :  { %v2703_v7 = vpop.f32.mrb[40].mxu0 }
0x37f0   :  { %v2704_v31 = vadd.f32 %v2703_v7, %v2035_v14  ;;  %v6375_v8 = vpop.f32.mrb[41].mxu0 }
0x37f2   :  { %7225 = vtanh.f32 %v2704_v31  ;;  %v5680_v23 = vmul.f32 -1.442695, %v2704_v31 }
0x37f4   :  { %7227 = vpow2.f32 %v5680_v23 }
0x37f7   :  { %v8031_v9 = vpop.f32.mrb[42].mxu0 }
0x37f8   :  { %v2919_v44 = vpop.f32.mrb[43].mxu0 }
0x37f9   :  { %v2920_v43 = vadd.f32 %v8076_v42, %v2919_v44  ;;  %v2925_v44 = vadd.f32 %v8031_v9, %v8076_v42 }
0x37fb   :  { %v8033_v10 = vpop.f32.mrb[44].mxu0 }
0x37fc   :  { %v7226_v49 = vpop.eup %7225  ;;  %v8035_v12 = vpop.f32.mrb[45].mxu0 }
0x37fd   :  { %2716 = vrot.lane.b32.xlu0 %v7226_v49, %s7488_s10 }
0x37fe   :  { %v7228_v40 = vpop.eup %7227 }
0x37ff   :  { %v8038_v58 = vpop.f32.mrb[46].mxu0  ;;  %v2710_v20 = vadd.f32 1.0, %v7228_v40 }
0x3800   :  { %v8040_v15 = vpop.f32.mrb[47].mxu0 }
0x3801   :  { %7229 = vrcp.f32 %v2710_v20 }
0x380b   :  { %v7230_v16 = vpop.eup %7229 }
0x380c   :  { %v2714_v53 = vmul.f32 %v7230_v16, %v2625_v24 }
0x386f   :  { %v2717_v17 = vpop.permute.xlu0 %2716 }
0x3870   :  { %v2719_v18 = vmul.f32 %v7230_v16, %v2717_v17 }
0x3872   :  { %2721 = vrot.lane.b32.xlu1 %v2719_v18, %s7489_s11 }
0x38e4   :  { %v2722_v11 = vpop.permute.xlu1 %2721 }
0x38e5   :  { %v8043_v32 = vadd.f32 %v2722_v11, %v2714_v53 }
0x38e7   :  { %7231 = vtanh.f32 %v8043_v32 }
0x38f1   :  { %v7232_v48 = vpop.eup %7231 }
0x38f2   :  { %2727 = vrot.lane.b32.xlu0 %v7232_v48, %s7488_s10 }
0x3964   :  { %v2728_v19 = vpop.permute.xlu0 %2727 }
0x3965   :  { %v2730_v35 = vmul.f32 %v7230_v16, %v2728_v19 }
0x3967   :  { %2732 = vrot.lane.b32.xlu1 %v2730_v35, %s7489_s11 }
0x39d9   :  { %v2733_v61 = vpop.permute.xlu1 %2732 }
0x39da   :  { %6385 = vmatmul.mubr.msk.f32.vlgmr.msra.gmra.mrb[28].mxu1 %vm210_vm3, %v2733_v61  ;;  %6404 = vmatprep.mubr.msk.f32.mxu0 %vm210_vm3, %v2733_v61 }
0x39db   :  { %6881 = vmatpush3.bf16.msra.mxu1 %v8047_v27  ;;  %6415 = vmatprep.mubr.msk.f32.mxu1 %vm7486_vm0, %v7487_v2 }
0x39dc   :  { %6882 = vmatprep.subr.bf16.mxu1 %v7485_v1 }
0x39df   :  { %6884 = vmatpush3.bf16.msra.mxu1 %v8051_v21 }
0x39e0   :  { %6885 = vmatprep.subr.bf16.mxu1 %v7485_v1 }
0x39e2   :  { %6416 = vmatmul.mubr.f32.vlgmr.msra.gmra.mrb[30].mxu1 %v7487_v2 }
0x39e3   :  { %6887 = vmatpush3.bf16.msra.mxu1 %v8047_v27  ;;  %6426 = vmatprep.mubr.msk.f32.mxu1 %vm7486_vm0, %v7487_v2 }
0x39e4   :  { %6888 = vmatprep.subr.bf16.mxu1 %v7485_v1 }
0x39e7   :  { %6890 = vmatpush3.bf16.msra.mxu1 %v8051_v21 }
0x39e8   :  { %6897 = vmatprep.subr.bf16.mxu1 %v7485_v1 }
0x3aad   :  { %v2802_v25 = vpop.f32.mrb[28].mxu1 }
0x3aae   :  { %v2803_v37 = vadd.f32 %v2802_v25, %v2040_v36  ;;  %v6386_v29 = vpop.f32.mrb[29].mxu1  ;;  %v2930_v25 = vadd.f32 %v8076_v42, %v8035_v12 }
0x3ab0   :  { %v5682_v24 = vmul.f32 -1.442695, %v2803_v37 }
0x3ab5   :  { %v3024_v34 = vpop.f32.mrb[30].mxu1 }
0x3ab6   :  { %v3025_v45 = vadd.f32 %v3024_v34, %v2920_v43  ;;  %v6417_v50 = vpop.f32.mrb[31].mxu1 }
0x3ab8   :  { %7233 = vtanh.f32 %v3025_v45  ;;  %v5693_v54 = vmul.f32 -1.442695, %v3025_v45 }
0x3aba   :  { %7235 = vpow2.f32 %v5693_v54 }
0x3ac2   :  { %v7234_v52 = vpop.eup %7233 }
0x3ac3   :  { %3037 = vrot.lane.b32.xlu0 %v7234_v52, %s7488_s10 }
0x3ac4   :  { %v7236_v51 = vpop.eup %7235 }
0x3ac5   :  { %v3031_v39 = vadd.f32 1.0, %v7236_v51 }
0x3ac7   :  { %7237 = vrcp.f32 %v3031_v39 }
0x3ad1   :  { %v7238_v38 = vpop.eup %7237 }
0x3ad2   :  { %v3035_v59 = vmul.f32 0.0, %v7238_v38 }
0x3b35   :  { %v3038_v55 = vpop.permute.xlu0 %3037 }
0x3b36   :  { %v3040_v56 = vmul.f32 %v7238_v38, %v3038_v55 }
0x3b38   :  { %3042 = vrot.lane.b32.xlu1 %v3040_v56, %s7489_s11 }
0x3baa   :  { %v3043_v63 = vpop.permute.xlu1 %3042 }
0x3bab   :  { %v3045_v41 = vadd.f32 %v3043_v63, %v3035_v59 }
0x3bad   :  { %7239 = vtanh.f32 %v3045_v41 }
0x3bae   :  { %7241 = vtanh.f32 %v2803_v37 }
0x3baf   :  { %7243 = vpow2.f32 %v5682_v24 }
0x3bb7   :  { %v7240_v57 = vpop.eup %7239 }
0x3bb8   :  { %3048 = vrot.lane.b32.xlu0 %v7240_v57, %s7488_s10  ;;  %v7242_v47 = vpop.eup %7241  ;;  %v2935_v57 = vadd.f32 %v8033_v10, %v8076_v42 }
0x3bb9   :  { %v7244_v46 = vpop.eup %7243 }
0x3bba   :  { %v2809_v0 = vadd.f32 1.0, %v7244_v46 }
0x3bbc   :  { %2815 = vrot.lane.b32.xlu0 %v7242_v47, %s7488_s10  ;;  %7245 = vrcp.f32 %v2809_v0 }
0x3bc6   :  { %v7246_v4 = vpop.eup %7245 }
0x3bc7   :  { %v2813_v33 = vmul.f32 %v7246_v4, %v8043_v32 }
0x3c2a   :  { %v3049_v22 = vpop.permute.xlu0 %3048 }
0x3c2b   :  { %v3051_v3 = vmul.f32 %v7238_v38, %v3049_v22 }
0x3c2d   :  { %3053 = vrot.lane.b32.xlu1 %v3051_v3, %s7489_s11 }
0x3c2e   :  { %v2816_v5 = vpop.permute.xlu0 %2815 }
0x3c2f   :  { %v2818_v13 = vmul.f32 %v7246_v4, %v2816_v5 }
0x3c31   :  { %2820 = vrot.lane.b32.xlu0 %v2818_v13, %s7489_s11 }
0x3c9f   :  { %v8085_v60 = vpop.permute.xlu1 %3053 }
0x3ca0   :  { %6427 = vmatmul.mubr.msk.f32.vlgmr.msra.gmra.mrb[32].mxu1 %vm210_vm3, %v8085_v60 }
0x3ca1   :  { %6899 = vmatpush3.bf16.msra.mxu1 %v8047_v27  ;;  %6448 = vmatprep.mubr.msk.f32.mxu1 %vm7486_vm0, %v7487_v2 }
0x3ca2   :  { %6900 = vmatprep.subr.bf16.mxu1 %v7485_v1 }
0x3ca3   :  { %v2821_v6 = vpop.permute.xlu0 %2820 }
0x3ca4   :  { %v2823_v14 = vadd.f32 %v2821_v6, %v2813_v33 }
0x3ca5   :  { %6902 = vmatpush3.bf16.msra.mxu1 %v8051_v21 }
0x3ca6   :  { %7247 = vtanh.f32 %v2823_v14  ;;  %6909 = vmatprep.subr.bf16.mxu1 %v7485_v1 }
0x3cb0   :  { %v7248_v7 = vpop.eup %7247 }
0x3cb1   :  { %2826 = vrot.lane.b32.xlu0 %v7248_v7, %s7488_s10 }
0x3d23   :  { %v2827_v31 = vpop.permute.xlu0 %2826 }
0x3d24   :  { %v2829_v8 = vmul.f32 %v7246_v4, %v2827_v31 }
0x3d26   :  { %2849 = vrot.lane.b32.xlu0 %v2829_v8, %s7489_s11 }
0x3d73   :  { %v3123_v49 = vpop.f32.mrb[32].mxu1 }
0x3d74   :  { %v3124_v23 = vadd.f32 %v3123_v49, %v2925_v44  ;;  %v6428_v40 = vpop.f32.mrb[33].mxu1  ;;  %v2940_v49 = vadd.f32 %v8076_v42, %v8040_v15 }
0x3d76   :  { %7249 = vtanh.f32 %v3124_v23  ;;  %v5695_v17 = vmul.f32 -1.442695, %v3124_v23 }
0x3d78   :  { %7251 = vpow2.f32 %v5695_v17 }
0x3d80   :  { %v7250_v20 = vpop.eup %7249 }
0x3d81   :  { %3136 = vrot.lane.b32.xlu1 %v7250_v20, %s7488_s10 }
0x3d82   :  { %v7252_v18 = vpop.eup %7251 }
0x3d83   :  { %v3130_v53 = vadd.f32 1.0, %v7252_v18 }
0x3d85   :  { %7253 = vrcp.f32 %v3130_v53 }
0x3d8f   :  { %v7254_v11 = vpop.eup %7253 }
0x3d90   :  { %v3134_v48 = vmul.f32 %v7254_v11, %v3045_v41 }
0x3d98   :  { %v2850_v16 = vpop.permute.xlu0 %2849 }
0x3d99   :  { %6405 = vmatmul.mubr.msk.f32.gmra.mrb[48].mxu0 %vm210_vm3, %v2850_v16 }
0x3d9a   :  { %6437 = vmatprep.mubr.msk.f32.mxu0 %vm7486_vm0, %v7487_v2 }
0x3df3   :  { %v3137_v9 = vpop.permute.xlu1 %3136 }
0x3df4   :  { %v3139_v32 = vmul.f32 %v7254_v11, %v3137_v9 }
0x3df6   :  { %3141 = vrot.lane.b32.xlu1 %v3139_v32, %s7489_s11 }
0x3e68   :  { %v3142_v30 = vpop.permute.xlu1 %3141 }
0x3e69   :  { %v3144_v26 = vadd.f32 %v3142_v30, %v3134_v48 }
0x3e6b   :  { %7255 = vtanh.f32 %v3144_v26 }
0x3e6c   :  { %v8105_v28 = vpop.f32.mrb[48].mxu0 }
0x3e6d   :  { %v8107_v62 = vpop.f32.mrb[49].mxu0 }
0x3e75   :  { %v7256_v19 = vpop.eup %7255 }
0x3e76   :  { %3147 = vrot.lane.b32.xlu1 %v7256_v19, %s7488_s10 }
0x3ee8   :  { %v3148_v35 = vpop.permute.xlu1 %3147 }
0x3ee9   :  { %v3150_v61 = vmul.f32 %v7254_v11, %v3148_v35 }
0x3eeb   :  { %3152 = vrot.lane.b32.xlu1 %v3150_v61, %s7489_s11 }
0x3f5d   :  { %v8111_v36 = vpop.permute.xlu1 %3152 }
0x3f5e   :  { %6438 = vmatmul.mubr.msk.f32.vlgmr.msra.gmra.mrb[50].mxu0 %vm210_vm3, %v8111_v36 }
0x3f5f   :  { %6905 = vmatpush3.bf16.msra.mxu0 %v8047_v27  ;;  %6459 = vmatprep.mubr.msk.f32.mxu0 %vm7486_vm0, %v7487_v2 }
0x3f60   :  { %6906 = vmatprep.subr.bf16.mxu0 %v7485_v1 }
0x3f63   :  { %6908 = vmatpush3.bf16.msra.mxu0 %v8051_v21 }
0x3f64   :  { %6915 = vmatprep.subr.bf16.mxu0 %v7485_v1 }
0x4031   :  { %v3222_v37 = vpop.f32.mrb[50].mxu0 }
0x4032   :  { %v3223_v29 = vadd.f32 %v3222_v37, %v2930_v25  ;;  %v6439_v43 = vpop.f32.mrb[51].mxu0  ;;  %v2945_v25 = vadd.f32 %v8038_v58, %v8076_v42 }
0x4034   :  { %7257 = vtanh.f32 %v3223_v29  ;;  %v5697_v45 = vmul.f32 -1.442695, %v3223_v29 }
0x4036   :  { %7259 = vpow2.f32 %v5697_v45 }
0x403e   :  { %v7258_v34 = vpop.eup %7257 }
0x403f   :  { %3235 = vrot.lane.b32.xlu0 %v7258_v34, %s7488_s10 }
0x4040   :  { %v7260_v50 = vpop.eup %7259 }
0x4041   :  { %v3229_v52 = vadd.f32 1.0, %v7260_v50 }
0x4043   :  { %7261 = vrcp.f32 %v3229_v52 }
0x404d   :  { %v7262_v54 = vpop.eup %7261 }
0x404e   :  { %v3233_v38 = vmul.f32 %v7262_v54, %v3144_v26 }
0x40b1   :  { %v3236_v51 = vpop.permute.xlu0 %3235 }
0x40b2   :  { %v3238_v39 = vmul.f32 %v7262_v54, %v3236_v51 }
0x40b4   :  { %3240 = vrot.lane.b32.xlu1 %v3238_v39, %s7489_s11 }
0x4126   :  { %v3241_v55 = vpop.permute.xlu1 %3240 }
0x4127   :  { %v3243_v12 = vadd.f32 %v3241_v55, %v3233_v38  ;;  %v3746_v38 = vld [vmem:[#allocation3 + $0x60] sm:$0xff]  ;;  %v3747_v55 = vld [vmem:[#allocation3 + $0x68] sm:$0xff] }
0x4129   :  { %7263 = vtanh.f32 %v3243_v12 }
0x4133   :  { %v7264_v56 = vpop.eup %7263 }
0x4134   :  { %3246 = vrot.lane.b32.xlu0 %v7264_v56, %s7488_s10 }
0x41a6   :  { %v3247_v59 = vpop.permute.xlu0 %3246 }
0x41a7   :  { %v3249_v63 = vmul.f32 %v7262_v54, %v3247_v59 }
0x41a9   :  { %3251 = vrot.lane.b32.xlu1 %v3249_v63, %s7489_s11 }
0x421b   :  { %v8127_v41 = vpop.permute.xlu1 %3251 }
0x421c   :  { %6449 = vmatmul.mubr.msk.f32.vlgmr.msra.gmra.mrb[34].mxu1 %vm210_vm3, %v8127_v41 }
0x421d   :  { %6911 = vmatpush3.bf16.msra.mxu1 %v8047_v27  ;;  %6470 = vmatprep.mubr.msk.f32.mxu1 %vm7486_vm0, %v7487_v2 }
0x421e   :  { %6912 = vmatprep.subr.bf16.mxu1 %v7485_v1 }
0x4221   :  { %6914 = vmatpush3.bf16.msra.mxu1 %v8051_v21 }
0x4222   :  { %6921 = vmatprep.subr.bf16.mxu1 %v7485_v1 }
0x42ef   :  { %v3321_v47 = vpop.f32.mrb[34].mxu1 }
0x42f0   :  { %v3322_v24 = vadd.f32 %v3321_v47, %v2935_v57  ;;  %v6450_v46 = vpop.f32.mrb[35].mxu1  ;;  %v3748_v57 = vld [vmem:[#allocation3 + $0x70] sm:$0xff]  ;;  %v3749_v47 = vld [vmem:[#allocation3 + $0x78] sm:$0xff] }
0x42f2   :  { %7265 = vtanh.f32 %v3322_v24  ;;  %v5699_v22 = vmul.f32 -1.442695, %v3322_v24  ;;  %v6931_v24 = vpack.c.bf16 %v3749_v47, %v3748_v57 }
0x42f4   :  { %7267 = vpow2.f32 %v5699_v22 }
0x42fc   :  { %v7266_v0 = vpop.eup %7265 }
0x42fd   :  { %3334 = vrot.lane.b32.xlu0 %v7266_v0, %s7488_s10 }
0x42fe   :  { %v7268_v3 = vpop.eup %7267 }
0x42ff   :  { %v3328_v4 = vadd.f32 1.0, %v7268_v3 }
0x4301   :  { %7269 = vrcp.f32 %v3328_v4 }
0x430b   :  { %v7270_v5 = vpop.eup %7269 }
0x430c   :  { %v3332_v6 = vmul.f32 %v7270_v5, %v3243_v12  ;;  %v6927_v12 = vpack.c.bf16 %v3747_v55, %v3746_v38 }
0x436f   :  { %v3335_v13 = vpop.permute.xlu0 %3334 }
0x4370   :  { %v3337_v33 = vmul.f32 %v7270_v5, %v3335_v13 }
0x4372   :  { %3339 = vrot.lane.b32.xlu1 %v3337_v33, %s7489_s11 }
0x43e4   :  { %v3340_v14 = vpop.permute.xlu1 %3339 }
0x43e5   :  { %v3342_v10 = vadd.f32 %v3340_v14, %v3332_v6 }
0x43e7   :  { %7271 = vtanh.f32 %v3342_v10 }
0x43f1   :  { %v7272_v7 = vpop.eup %7271 }
0x43f2   :  { %3345 = vrot.lane.b32.xlu0 %v7272_v7, %s7488_s10 }
0x4464   :  { %v3346_v31 = vpop.permute.xlu0 %3345 }
0x4465   :  { %v3348_v8 = vmul.f32 %v7270_v5, %v3346_v31 }
0x4467   :  { %3350 = vrot.lane.b32.xlu1 %v3348_v8, %s7489_s11 }
0x44d9   :  { %v8143_v44 = vpop.permute.xlu1 %3350 }
0x44da   :  { %6460 = vmatmul.mubr.msk.f32.vlgmr.msra.gmra.mrb[52].mxu0 %vm210_vm3, %v8143_v44 }
0x44db   :  { %6917 = vmatpush3.bf16.msra.mxu0 %v8047_v27  ;;  %6481 = vmatprep.mubr.msk.f32.mxu0 %vm7486_vm0, %v7487_v2 }
0x44dc   :  { %6918 = vmatprep.subr.bf16.mxu0 %v7485_v1 }
0x44df   :  { %6920 = vmatpush3.bf16.msra.mxu0 %v8051_v21 }
0x44e0   :  { %6928 = vmatprep.subr.bf16.mxu0 %v6927_v12 }
0x45ad   :  { %v3420_v23 = vpop.f32.mrb[52].mxu0 }
0x45ae   :  { %v3421_v40 = vadd.f32 %v3420_v23, %v2940_v49  ;;  %v6461_v20 = vpop.f32.mrb[53].mxu0 }
0x45af   :  { %v3751_v20 = vld [vmem:[#allocation5 + $0x80] sm:$0xff] }
0x45b0   :  { %7273 = vtanh.f32 %v3421_v40  ;;  %v5701_v17 = vmul.f32 -1.442695, %v3421_v40 }
0x45b2   :  { %7275 = vpow2.f32 %v5701_v17 }
0x45ba   :  { %v7274_v16 = vpop.eup %7273 }
0x45bb   :  { %3433 = vrot.lane.b32.xlu0 %v7274_v16, %s7488_s10  ;;  %v3752_v16 = vld [vmem:[#allocation5 + $0x88] sm:$0xff] }
0x45bc   :  { %v7276_v18 = vpop.eup %7275  ;;  %v8201_v17 = vpack.c.bf16 %v3752_v16, %v3751_v20 }
0x45bd   :  { %v3427_v53 = vadd.f32 1.0, %v7276_v18  ;;  %v3753_v18 = vld [vmem:[#allocation5 + $0x90] sm:$0xff] }
0x45bf   :  { %7277 = vrcp.f32 %v3427_v53  ;;  %v3754_v53 = vld [vmem:[#allocation5 + $0x98] sm:$0xff] }
0x45c9   :  { %v7278_v11 = vpop.eup %7277 }
0x45ca   :  { %v3431_v48 = vmul.f32 %v7278_v11, %v3342_v10 }
0x462d   :  { %v3434_v9 = vpop.permute.xlu0 %3433 }
0x462e   :  { %v3436_v32 = vmul.f32 %v7278_v11, %v3434_v9 }
0x4630   :  { %3438 = vrot.lane.b32.xlu1 %v3436_v32, %s7489_s11 }
0x46a2   :  { %v3439_v30 = vpop.permute.xlu1 %3438 }
0x46a3   :  { %v3441_v15 = vadd.f32 %v3439_v30, %v3431_v48  ;;  %v2955_v30 = vadd.f32 %v8105_v28, %v8076_v42 }
0x46a5   :  { %7279 = vtanh.f32 %v3441_v15 }
0x46af   :  { %v7280_v26 = vpop.eup %7279 }
0x46b0   :  { %3444 = vrot.lane.b32.xlu0 %v7280_v26, %s7488_s10 }
0x4722   :  { %v3445_v19 = vpop.permute.xlu0 %3444 }
0x4723   :  { %v3447_v35 = vmul.f32 %v7278_v11, %v3445_v19  ;;  %v8205_v11 = vpack.c.bf16 %v3754_v53, %v3753_v18 }
0x4725   :  { %3449 = vrot.lane.b32.xlu1 %v3447_v35, %s7489_s11  ;;  %v8230_v35 = vld [vmem:[%s8491_s4 + $0x4] ss:$0 sm:$0xff] }
0x4797   :  { %v3450_v61 = vpop.permute.xlu1 %3449 }
0x4798   :  { %6471 = vmatmul.mubr.msk.f32.vlgmr.msra.gmra.mrb[36].mxu1 %vm210_vm3, %v3450_v61 }
0x4799   :  { %6923 = vmatpush3.bf16.msra.mxu1 %v8047_v27  ;;  %6492 = vmatprep.mubr.msk.f32.mxu1 %vm7486_vm0, %v7487_v2 }
0x479a   :  { %6924 = vmatprep.subr.bf16.mxu1 %v7485_v1 }
0x479d   :  { %6926 = vmatpush3.bf16.msra.mxu1 %v8051_v21 }
0x479e   :  { %6935 = vmatprep.subr.bf16.mxu1 %v7485_v1 }
0x486b   :  { %v3519_v37 = vpop.f32.mrb[36].mxu1 }
0x486c   :  { %v3520_v29 = vadd.f32 %v3519_v37, %v2945_v25  ;;  %v6472_v43 = vpop.f32.mrb[37].mxu1 }
0x486e   :  { %7281 = vtanh.f32 %v3520_v29  ;;  %v5703_v27 = vmul.f32 -1.442695, %v3520_v29 }
0x4870   :  { %7283 = vpow2.f32 %v5703_v27 }
0x4878   :  { %v7282_v34 = vpop.eup %7281 }
0x4879   :  { %3532 = vrot.lane.b32.xlu0 %v7282_v34, %s7488_s10 }
0x487a   :  { %v7284_v45 = vpop.eup %7283 }
0x487b   :  { %v3526_v50 = vadd.f32 1.0, %v7284_v45 }
0x487d   :  { %7285 = vrcp.f32 %v3526_v50 }
0x4887   :  { %v7286_v52 = vpop.eup %7285 }
0x4888   :  { %v3530_v51 = vmul.f32 %v7286_v52, %v3441_v15 }
0x48eb   :  { %v3533_v54 = vpop.permute.xlu0 %3532 }
0x48ec   :  { %v3535_v21 = vmul.f32 %v7286_v52, %v3533_v54 }
0x48ee   :  { %3537 = vrot.lane.b32.xlu1 %v3535_v21, %s7489_s11 }
0x4960   :  { %v3538_v39 = vpop.permute.xlu1 %3537 }
0x4961   :  { %v3540_v58 = vadd.f32 %v3538_v39, %v3530_v51 }
0x4963   :  { %7287 = vtanh.f32 %v3540_v58 }
0x496d   :  { %v7288_v56 = vpop.eup %7287 }
0x496e   :  { %3543 = vrot.lane.b32.xlu0 %v7288_v56, %s7488_s10 }
0x49e0   :  { %v3544_v59 = vpop.permute.xlu0 %3543 }
0x49e1   :  { %v3546_v63 = vmul.f32 %v7286_v52, %v3544_v59 }
0x49e3   :  { %3548 = vrot.lane.b32.xlu1 %v3546_v63, %s7489_s11 }
0x4a55   :  { %v3549_v46 = vpop.permute.xlu1 %3548 }
0x4a56   :  { %6482 = vmatmul.mubr.msk.f32.vlgmr.msra.gmra.mrb[54].mxu0 %vm210_vm3, %v3549_v46 }
0x4a57   :  { %6930 = vmatpush3.bf16.msra.mxu0 %v6927_v12  ;;  %6503 = vmatprep.mubr.msk.f32.mxu0 %vm210_vm3, %v8085_v60  ;;  %v2950_v60 = vadd.f32 %v8076_v42, %v8107_v62 }
0x4a58   :  { %6932 = vmatprep.subr.bf16.mxu0 %v6931_v24 }
0x4a5b   :  { %6934 = vmatpush3.bf16.msra.mxu0 %v6931_v24 }
0x4a5c   :  { %6947 = vmatprep.subr.bf16.mxu0 %v7485_v1 }
0x4a5e   :  { %6504 = vmatmul.mubr.msk.f32.vlgmr.msra.gmra.mrb[56].mxu0 %vm210_vm3, %v8111_v36 }
0x4a5f   :  { %6506 = vmatprep.mubr.msk.f32.mxu0 %vm210_vm3, %v8127_v41  ;;  %6949 = vmatpush3.bf16.msra.mxu0 %v8201_v17 }
0x4a60   :  { %6950 = vmatprep.subr.bf16.mxu0 %v7485_v1 }
0x4a62   :  { %6507 = vmatmul.mubr.msk.f32.gmra.mrb[58].mxu0 %vm210_vm3, %v8143_v44 }
0x4a63   :  { %6509 = vmatprep.mubr.msk.f32.mxu0 %vm210_vm3, %v3450_v61  ;;  %6952 = vmatpush3.bf16.msra.mxu0 %v8205_v11 }
0x4a64   :  { %6959 = vmatprep.subr.bf16.mxu0 %v7485_v1 }
0x4a66   :  { %6510 = vmatmul.mubr.msk.f32.gmra.mrb[60].mxu0 %vm210_vm3, %v3549_v46 }
0x4b29   :  { %v3618_v0 = vpop.f32.mrb[54].mxu0 }
0x4b2a   :  { %v3619_v22 = vadd.f32 %v3618_v0, %v2950_v60  ;;  %v6483_v3 = vpop.f32.mrb[55].mxu0 }
0x4b2c   :  { %7289 = vtanh.f32 %v3619_v22  ;;  %v5705_v14 = vmul.f32 -1.442695, %v3619_v22 }
0x4b2e   :  { %7291 = vpow2.f32 %v5705_v14 }
0x4b31   :  { %v8185_v4 = vpop.f32.mrb[56].mxu0 }
0x4b32   :  { %v3834_v36 = vpop.f32.mrb[57].mxu0 }
0x4b33   :  { %v3835_v61 = vadd.f32 %v8230_v35, %v3834_v36  ;;  %v3840_v36 = vadd.f32 %v8185_v4, %v8230_v35 }
0x4b35   :  { %v8187_v5 = vpop.f32.mrb[58].mxu0 }
0x4b36   :  { %v7290_v41 = vpop.eup %7289  ;;  %v8189_v13 = vpop.f32.mrb[59].mxu0 }
0x4b37   :  { %3631 = vrot.lane.b32.xlu0 %v7290_v41, %s7488_s10 }
0x4b38   :  { %v7292_v62 = vpop.eup %7291 }
0x4b39   :  { %v8192_v33 = vpop.f32.mrb[60].mxu0  ;;  %v3625_v10 = vadd.f32 1.0, %v7292_v62 }
0x4b3a   :  { %v8194_v6 = vpop.f32.mrb[61].mxu0 }
0x4b3b   :  { %7293 = vrcp.f32 %v3625_v10 }
0x4b45   :  { %v7294_v7 = vpop.eup %7293 }
0x4b46   :  { %v3629_v44 = vmul.f32 %v7294_v7, %v3540_v58 }
0x4ba9   :  { %v3632_v31 = vpop.permute.xlu0 %3631 }
0x4baa   :  { %v3634_v8 = vmul.f32 %v7294_v7, %v3632_v31 }
0x4bac   :  { %3636 = vrot.lane.b32.xlu1 %v3634_v8, %s7489_s11 }
0x4c1e   :  { %v3637_v49 = vpop.permute.xlu1 %3636 }
0x4c1f   :  { %v8197_v23 = vadd.f32 %v3637_v49, %v3629_v44 }
0x4c21   :  { %7295 = vtanh.f32 %v8197_v23 }
0x4c2b   :  { %v7296_v40 = vpop.eup %7295 }
0x4c2c   :  { %3642 = vrot.lane.b32.xlu0 %v7296_v40, %s7488_s10 }
0x4c9e   :  { %v3643_v9 = vpop.permute.xlu0 %3642 }
0x4c9f   :  { %v3645_v32 = vmul.f32 %v7294_v7, %v3643_v9 }
0x4ca1   :  { %3647 = vrot.lane.b32.xlu1 %v3645_v32, %s7489_s11 }
0x4d13   :  { %v3648_v48 = vpop.permute.xlu1 %3647 }
0x4d14   :  { %6493 = vmatmul.mubr.msk.f32.vlgmr.msra.gmra.mrb[38].mxu1 %vm210_vm3, %v3648_v48  ;;  %6512 = vmatprep.mubr.msk.f32.mxu0 %vm210_vm3, %v3648_v48 }
0x4d15   :  { %6937 = vmatpush3.bf16.msra.mxu1 %v8201_v17  ;;  %6523 = vmatprep.mubr.msk.f32.mxu1 %vm7486_vm0, %v7487_v2 }
0x4d16   :  { %6938 = vmatprep.subr.bf16.mxu1 %v7485_v1 }
0x4d19   :  { %6940 = vmatpush3.bf16.msra.mxu1 %v8205_v11 }
0x4d1a   :  { %6941 = vmatprep.subr.bf16.mxu1 %v7485_v1 }
0x4d1c   :  { %6524 = vmatmul.mubr.f32.vlgmr.msra.gmra.mrb[40].mxu1 %v7487_v2 }
0x4d1d   :  { %6943 = vmatpush3.bf16.msra.mxu1 %v8201_v17  ;;  %6534 = vmatprep.mubr.msk.f32.mxu1 %vm7486_vm0, %v7487_v2 }
0x4d1e   :  { %6944 = vmatprep.subr.bf16.mxu1 %v7485_v1 }
0x4d21   :  { %6946 = vmatpush3.bf16.msra.mxu1 %v8205_v11 }
0x4d22   :  { %6953 = vmatprep.subr.bf16.mxu1 %v7485_v1 }
0x4de7   :  { %v3717_v15 = vpop.f32.mrb[38].mxu1 }
0x4de8   :  { %v3718_v26 = vadd.f32 %v3717_v15, %v2955_v30  ;;  %v6494_v19 = vpop.f32.mrb[39].mxu1  ;;  %v3845_v15 = vadd.f32 %v8230_v35, %v8189_v13 }
0x4dea   :  { %v5707_v58 = vmul.f32 -1.442695, %v3718_v26 }
0x4def   :  { %v3939_v25 = vpop.f32.mrb[40].mxu1 }
0x4df0   :  { %v3940_v37 = vadd.f32 %v3939_v25, %v3835_v61  ;;  %v6525_v29 = vpop.f32.mrb[41].mxu1 }
0x4df2   :  { %7297 = vtanh.f32 %v3940_v37  ;;  %v5718_v34 = vmul.f32 -1.442695, %v3940_v37 }
0x4df4   :  { %7299 = vpow2.f32 %v5718_v34 }
0x4dfc   :  { %v7298_v43 = vpop.eup %7297 }
0x4dfd   :  { %3952 = vrot.lane.b32.xlu0 %v7298_v43, %s7488_s10 }
0x4dfe   :  { %v7300_v42 = vpop.eup %7299 }
0x4dff   :  { %v3946_v28 = vadd.f32 1.0, %v7300_v42 }
0x4e01   :  { %7301 = vrcp.f32 %v3946_v28 }
0x4e0b   :  { %v7302_v27 = vpop.eup %7301 }
0x4e0c   :  { %v3950_v52 = vmul.f32 0.0, %v7302_v27 }
0x4e6f   :  { %v3953_v45 = vpop.permute.xlu0 %3952 }
0x4e70   :  { %v3955_v50 = vmul.f32 %v7302_v27, %v3953_v45 }
0x4e72   :  { %3957 = vrot.lane.b32.xlu1 %v3955_v50, %s7489_s11 }
0x4ee4   :  { %v3958_v54 = vpop.permute.xlu1 %3957 }
0x4ee5   :  { %v3960_v21 = vadd.f32 %v3958_v54, %v3950_v52 }
0x4ee7   :  { %7303 = vtanh.f32 %v3960_v21 }
0x4ee8   :  { %7305 = vtanh.f32 %v3718_v26 }
0x4ee9   :  { %7307 = vpow2.f32 %v5707_v58 }
0x4ef1   :  { %v7304_v51 = vpop.eup %7303 }
0x4ef2   :  { %3963 = vrot.lane.b32.xlu0 %v7304_v51, %s7488_s10  ;;  %v7306_v39 = vpop.eup %7305  ;;  %v3850_v51 = vadd.f32 %v8187_v5, %v8230_v35 }
0x4ef3   :  { %v7308_v38 = vpop.eup %7307 }
0x4ef4   :  { %v3724_v55 = vadd.f32 1.0, %v7308_v38 }
0x4ef6   :  { %3730 = vrot.lane.b32.xlu0 %v7306_v39, %s7488_s10  ;;  %7309 = vrcp.f32 %v3724_v55 }
0x4f00   :  { %v7310_v59 = vpop.eup %7309 }
0x4f01   :  { %v3728_v24 = vmul.f32 %v7310_v59, %v8197_v23 }
0x4f64   :  { %v3964_v12 = vpop.permute.xlu0 %3963 }
0x4f65   :  { %v3966_v56 = vmul.f32 %v7302_v27, %v3964_v12 }
0x4f67   :  { %3968 = vrot.lane.b32.xlu1 %v3966_v56, %s7489_s11 }
0x4f68   :  { %v3731_v63 = vpop.permute.xlu0 %3730 }
0x4f69   :  { %v3733_v57 = vmul.f32 %v7310_v59, %v3731_v63 }
0x4f6b   :  { %3735 = vrot.lane.b32.xlu0 %v3733_v57, %s7489_s11 }
0x4fd9   :  { %v8239_v47 = vpop.permute.xlu1 %3968 }
0x4fda   :  { %6535 = vmatmul.mubr.msk.f32.vlgmr.msra.gmra.mrb[42].mxu1 %vm210_vm3, %v8239_v47 }
0x4fdb   :  { %6955 = vmatpush3.bf16.msra.mxu1 %v8201_v17  ;;  %6556 = vmatprep.mubr.msk.f32.mxu1 %vm7486_vm0, %v7487_v2 }
0x4fdc   :  { %6956 = vmatprep.subr.bf16.mxu1 %v7485_v1 }
0x4fdd   :  { %v3736_v46 = vpop.permute.xlu0 %3735 }
0x4fde   :  { %v3738_v60 = vadd.f32 %v3736_v46, %v3728_v24 }
0x4fdf   :  { %6958 = vmatpush3.bf16.msra.mxu1 %v8205_v11 }
0x4fe0   :  { %7311 = vtanh.f32 %v3738_v60  ;;  %6965 = vmatprep.subr.bf16.mxu1 %v7485_v1 }
0x4fea   :  { %v7312_v0 = vpop.eup %7311 }
0x4feb   :  { %3741 = vrot.lane.b32.xlu0 %v7312_v0, %s7488_s10 }
0x505d   :  { %v3742_v22 = vpop.permute.xlu0 %3741 }
0x505e   :  { %v3744_v3 = vmul.f32 %v7310_v59, %v3742_v22 }
0x5060   :  { %3764 = vrot.lane.b32.xlu0 %v3744_v3, %s7489_s11 }
0x50ad   :  { %v4038_v41 = vpop.f32.mrb[42].mxu1 }
0x50ae   :  { %v4039_v14 = vadd.f32 %v4038_v41, %v3840_v36  ;;  %v6536_v62 = vpop.f32.mrb[43].mxu1  ;;  %v3855_v41 = vadd.f32 %v8230_v35, %v8194_v6 }
0x50b0   :  { %7313 = vtanh.f32 %v4039_v14  ;;  %v5720_v31 = vmul.f32 -1.442695, %v4039_v14 }
0x50b2   :  { %7315 = vpow2.f32 %v5720_v31 }
0x50ba   :  { %v7314_v10 = vpop.eup %7313 }
0x50bb   :  { %4051 = vrot.lane.b32.xlu1 %v7314_v10, %s7488_s10 }
0x50bc   :  { %v7316_v8 = vpop.eup %7315 }
0x50bd   :  { %v4045_v44 = vadd.f32 1.0, %v7316_v8 }
0x50bf   :  { %7317 = vrcp.f32 %v4045_v44 }
0x50c9   :  { %v7318_v49 = vpop.eup %7317 }
0x50ca   :  { %v4049_v40 = vmul.f32 %v7318_v49, %v3960_v21 }
0x50d2   :  { %v3765_v7 = vpop.permute.xlu0 %3764 }
0x50d3   :  { %6513 = vmatmul.mubr.msk.f32.gmra.mrb[62].mxu0 %vm210_vm3, %v3765_v7 }
0x50d4   :  { %6545 = vmatprep.mubr.msk.f32.mxu0 %vm7486_vm0, %v7487_v2 }
0x512d   :  { %v4052_v4 = vpop.permute.xlu1 %4051 }
0x512e   :  { %v4054_v23 = vmul.f32 %v7318_v49, %v4052_v4 }
0x5130   :  { %4056 = vrot.lane.b32.xlu1 %v4054_v23, %s7489_s11 }
0x51a2   :  { %v4057_v20 = vpop.permute.xlu1 %4056 }
0x51a3   :  { %v4059_v16 = vadd.f32 %v4057_v20, %v4049_v40 }
0x51a5   :  { %7319 = vtanh.f32 %v4059_v16 }
0x51a6   :  { %v8259_v18 = vpop.f32.mrb[62].mxu0 }
0x51a7   :  { %v8261_v53 = vpop.f32.mrb[63].mxu0 }
0x51af   :  { %v7320_v9 = vpop.eup %7319 }
0x51b0   :  { %4062 = vrot.lane.b32.xlu1 %v7320_v9, %s7488_s10 }
0x5222   :  { %v4063_v32 = vpop.permute.xlu1 %4062 }
0x5223   :  { %v4065_v48 = vmul.f32 %v7318_v49, %v4063_v32 }
0x5225   :  { %4067 = vrot.lane.b32.xlu1 %v4065_v48, %s7489_s11 }
0x5297   :  { %v8265_v30 = vpop.permute.xlu1 %4067 }
0x5298   :  { %6546 = vmatmul.mubr.msk.f32.vlgmr.msra.gmra.mrb[64].mxu0 %vm210_vm3, %v8265_v30 }
0x5299   :  { %6961 = vmatpush3.bf16.msra.mxu0 %v8201_v17  ;;  %6567 = vmatprep.mubr.msk.f32.mxu0 %vm7486_vm0, %v7487_v2 }
0x529a   :  { %6962 = vmatprep.subr.bf16.mxu0 %v7485_v1 }
0x529d   :  { %6964 = vmatpush3.bf16.msra.mxu0 %v8205_v11 }
0x529e   :  { %6971 = vmatprep.subr.bf16.mxu0 %v7485_v1 }
0x536b   :  { %v4137_v26 = vpop.f32.mrb[64].mxu0 }
0x536c   :  { %v4138_v19 = vadd.f32 %v4137_v26, %v3845_v15  ;;  %v6547_v61 = vpop.f32.mrb[65].mxu0  ;;  %v3860_v15 = vadd.f32 %v8192_v33, %v8230_v35 }
0x536e   :  { %7321 = vtanh.f32 %v4138_v19  ;;  %v5722_v37 = vmul.f32 -1.442695, %v4138_v19 }
0x5370   :  { %7323 = vpow2.f32 %v5722_v37 }
0x5378   :  { %v7322_v25 = vpop.eup %7321 }
0x5379   :  { %4150 = vrot.lane.b32.xlu0 %v7322_v25, %s7488_s10 }
0x537a   :  { %v7324_v29 = vpop.eup %7323 }
0x537b   :  { %v4144_v43 = vadd.f32 1.0, %v7324_v29 }
0x537d   :  { %7325 = vrcp.f32 %v4144_v43 }
0x5387   :  { %v7326_v34 = vpop.eup %7325 }
0x5388   :  { %v4148_v27 = vmul.f32 %v7326_v34, %v4059_v16 }
0x53eb   :  { %v4151_v42 = vpop.permute.xlu0 %4150 }
0x53ec   :  { %v4153_v28 = vmul.f32 %v7326_v34, %v4151_v42 }
0x53ee   :  { %4155 = vrot.lane.b32.xlu1 %v4153_v28, %s7489_s11 }
0x5460   :  { %v4156_v45 = vpop.permute.xlu1 %4155 }
0x5461   :  { %v4158_v13 = vadd.f32 %v4156_v45, %v4148_v27  ;;  %v4661_v27 = vld [vmem:[#allocation3 + $0x80] sm:$0xff]  ;;  %v4662_v45 = vld [vmem:[#allocation3 + $0x88] sm:$0xff] }
0x5463   :  { %7327 = vtanh.f32 %v4158_v13 }
0x546d   :  { %v7328_v50 = vpop.eup %7327 }
0x546e   :  { %4161 = vrot.lane.b32.xlu0 %v7328_v50, %s7488_s10 }
0x54e0   :  { %v4162_v52 = vpop.permute.xlu0 %4161 }
0x54e1   :  { %v4164_v54 = vmul.f32 %v7326_v34, %v4162_v52 }
0x54e3   :  { %4166 = vrot.lane.b32.xlu1 %v4164_v54, %s7489_s11 }
0x5555   :  { %v8281_v21 = vpop.permute.xlu1 %4166 }
0x5556   :  { %6557 = vmatmul.mubr.msk.f32.vlgmr.msra.gmra.mrb[44].mxu1 %vm210_vm3, %v8281_v21 }
0x5557   :  { %6967 = vmatpush3.bf16.msra.mxu1 %v8201_v17  ;;  %6578 = vmatprep.mubr.msk.f32.mxu1 %vm7486_vm0, %v7487_v2 }
0x5558   :  { %6968 = vmatprep.subr.bf16.mxu1 %v7485_v1 }
0x555b   :  { %6970 = vmatpush3.bf16.msra.mxu1 %v8205_v11 }
0x555c   :  { %6977 = vmatprep.subr.bf16.mxu1 %v7485_v1 }
0x5629   :  { %v4236_v39 = vpop.f32.mrb[44].mxu1 }
0x562a   :  { %v4237_v58 = vadd.f32 %v4236_v39, %v3850_v51  ;;  %v6558_v38 = vpop.f32.mrb[45].mxu1  ;;  %v4663_v51 = vld [vmem:[#allocation3 + $0x90] sm:$0xff]  ;;  %v4664_v39 = vld [vmem:[#allocation3 + $0x98] sm:$0xff] }
0x562c   :  { %7329 = vtanh.f32 %v4237_v58  ;;  %v5724_v12 = vmul.f32 -1.442695, %v4237_v58  ;;  %v6987_v58 = vpack.c.bf16 %v4664_v39, %v4663_v51 }
0x562e   :  { %7331 = vpow2.f32 %v5724_v12 }
0x5636   :  { %v7330_v55 = vpop.eup %7329 }
0x5637   :  { %4249 = vrot.lane.b32.xlu0 %v7330_v55, %s7488_s10 }
0x5638   :  { %v7332_v56 = vpop.eup %7331 }
0x5639   :  { %v4243_v59 = vadd.f32 1.0, %v7332_v56 }
0x563b   :  { %7333 = vrcp.f32 %v4243_v59 }
0x5645   :  { %v7334_v63 = vpop.eup %7333 }
0x5646   :  { %v4247_v46 = vmul.f32 %v7334_v63, %v4158_v13  ;;  %v6983_v13 = vpack.c.bf16 %v4662_v45, %v4661_v27 }
0x56a9   :  { %v4250_v57 = vpop.permute.xlu0 %4249 }
0x56aa   :  { %v4252_v24 = vmul.f32 %v7334_v63, %v4250_v57 }
0x56ac   :  { %4254 = vrot.lane.b32.xlu1 %v4252_v24, %s7489_s11 }
0x571e   :  { %v4255_v60 = vpop.permute.xlu1 %4254 }
0x571f   :  { %v4257_v5 = vadd.f32 %v4255_v60, %v4247_v46 }
0x5721   :  { %7335 = vtanh.f32 %v4257_v5 }
0x572b   :  { %v7336_v0 = vpop.eup %7335 }
0x572c   :  { %4260 = vrot.lane.b32.xlu0 %v7336_v0, %s7488_s10 }
0x579e   :  { %v4261_v22 = vpop.permute.xlu0 %4260 }
0x579f   :  { %v4263_v3 = vmul.f32 %v7334_v63, %v4261_v22 }
0x57a1   :  { %4265 = vrot.lane.b32.xlu1 %v4263_v3, %s7489_s11 }
0x5813   :  { %v8297_v36 = vpop.permute.xlu1 %4265 }
0x5814   :  { %6568 = vmatmul.mubr.msk.f32.vlgmr.msra.gmra.mrb[66].mxu0 %vm210_vm3, %v8297_v36 }
0x5815   :  { %6973 = vmatpush3.bf16.msra.mxu0 %v8201_v17  ;;  %6589 = vmatprep.mubr.msk.f32.mxu0 %vm7486_vm0, %v7487_v2 }
0x5816   :  { %6974 = vmatprep.subr.bf16.mxu0 %v7485_v1 }
0x5819   :  { %6976 = vmatpush3.bf16.msra.mxu0 %v8205_v11 }
0x581a   :  { %6984 = vmatprep.subr.bf16.mxu0 %v6983_v13 }
0x58e7   :  { %v4335_v14 = vpop.f32.mrb[66].mxu0 }
0x58e8   :  { %v4336_v62 = vadd.f32 %v4335_v14, %v3855_v41  ;;  %v6569_v10 = vpop.f32.mrb[67].mxu0 }
0x58e9   :  { %v4666_v10 = vld [vmem:[#allocation5 + $0xa0] sm:$0xff] }
0x58ea   :  { %7337 = vtanh.f32 %v4336_v62  ;;  %v5726_v31 = vmul.f32 -1.442695, %v4336_v62 }
0x58ec   :  { %7339 = vpow2.f32 %v5726_v31 }
0x58f4   :  { %v7338_v7 = vpop.eup %7337 }
0x58f5   :  { %4348 = vrot.lane.b32.xlu0 %v7338_v7, %s7488_s10  ;;  %v4667_v7 = vld [vmem:[#allocation5 + $0xa8] sm:$0xff] }
0x58f6   :  { %v7340_v8 = vpop.eup %7339  ;;  %v8355_v31 = vpack.c.bf16 %v4667_v7, %v4666_v10 }
0x58f7   :  { %v4342_v44 = vadd.f32 1.0, %v7340_v8  ;;  %v4668_v8 = vld [vmem:[#allocation5 + $0xb0] sm:$0xff] }
0x58f9   :  { %7341 = vrcp.f32 %v4342_v44  ;;  %v4669_v44 = vld [vmem:[#allocation5 + $0xb8] sm:$0xff] }
0x5903   :  { %v7342_v49 = vpop.eup %7341 }
0x5904   :  { %v4346_v40 = vmul.f32 %v7342_v49, %v4257_v5 }
0x5967   :  { %v4349_v4 = vpop.permute.xlu0 %4348 }
0x5968   :  { %v4351_v23 = vmul.f32 %v7342_v49, %v4349_v4 }
0x596a   :  { %4353 = vrot.lane.b32.xlu1 %v4351_v23, %s7489_s11 }
0x59dc   :  { %v4354_v20 = vpop.permute.xlu1 %4353 }
0x59dd   :  { %v4356_v6 = vadd.f32 %v4354_v20, %v4346_v40  ;;  %v3870_v20 = vadd.f32 %v8259_v18, %v8230_v35 }
0x59df   :  { %7343 = vtanh.f32 %v4356_v6 }
0x59e9   :  { %v7344_v16 = vpop.eup %7343 }
0x59ea   :  { %4359 = vrot.lane.b32.xlu0 %v7344_v16, %s7488_s10 }
0x5a5c   :  { %v4360_v9 = vpop.permute.xlu0 %4359 }
0x5a5d   :  { %v4362_v32 = vmul.f32 %v7342_v49, %v4360_v9  ;;  %v8359_v49 = vpack.c.bf16 %v4669_v44, %v4668_v8 }
0x5a5f   :  { %4364 = vrot.lane.b32.xlu1 %v4362_v32, %s7489_s11  ;;  %v8384_v32 = vld [vmem:[%s8491_s4 + $0x5] ss:$0 sm:$0xff] }
0x5ad1   :  { %v4365_v48 = vpop.permute.xlu1 %4364 }
0x5ad2   :  { %6579 = vmatmul.mubr.msk.f32.vlgmr.msra.gmra.mrb[46].mxu1 %vm210_vm3, %v4365_v48 }
0x5ad3   :  { %6979 = vmatpush3.bf16.msra.mxu1 %v8201_v17  ;;  %6600 = vmatprep.mubr.msk.f32.mxu1 %vm7486_vm0, %v7487_v2 }
0x5ad4   :  { %6980 = vmatprep.subr.bf16.mxu1 %v7485_v1 }
0x5ad7   :  { %6982 = vmatpush3.bf16.msra.mxu1 %v8205_v11 }
0x5ad8   :  { %6991 = vmatprep.subr.bf16.mxu1 %v7485_v1 }
0x5ba5   :  { %v4434_v26 = vpop.f32.mrb[46].mxu1 }
0x5ba6   :  { %v4435_v19 = vadd.f32 %v4434_v26, %v3860_v15  ;;  %v6580_v61 = vpop.f32.mrb[47].mxu1 }
0x5ba8   :  { %7345 = vtanh.f32 %v4435_v19  ;;  %v5728_v17 = vmul.f32 -1.442695, %v4435_v19 }
0x5baa   :  { %7347 = vpow2.f32 %v5728_v17 }
0x5bb2   :  { %v7346_v25 = vpop.eup %7345 }
0x5bb3   :  { %4447 = vrot.lane.b32.xlu0 %v7346_v25, %s7488_s10 }
0x5bb4   :  { %v7348_v37 = vpop.eup %7347 }
0x5bb5   :  { %v4441_v29 = vadd.f32 1.0, %v7348_v37 }
0x5bb7   :  { %7349 = vrcp.f32 %v4441_v29 }
0x5bc1   :  { %v7350_v43 = vpop.eup %7349 }
0x5bc2   :  { %v4445_v42 = vmul.f32 %v7350_v43, %v4356_v6 }
0x5c25   :  { %v4448_v34 = vpop.permute.xlu0 %4447 }
0x5c26   :  { %v4450_v11 = vmul.f32 %v7350_v43, %v4448_v34 }
0x5c28   :  { %4452 = vrot.lane.b32.xlu1 %v4450_v11, %s7489_s11 }
0x5c9a   :  { %v4453_v28 = vpop.permute.xlu1 %4452 }
0x5c9b   :  { %v4455_v33 = vadd.f32 %v4453_v28, %v4445_v42 }
0x5c9d   :  { %7351 = vtanh.f32 %v4455_v33 }
0x5ca7   :  { %v7352_v50 = vpop.eup %7351 }
0x5ca8   :  { %4458 = vrot.lane.b32.xlu0 %v7352_v50, %s7488_s10 }
0x5d1a   :  { %v4459_v52 = vpop.permute.xlu0 %4458 }
0x5d1b   :  { %v4461_v54 = vmul.f32 %v7350_v43, %v4459_v52 }
0x5d1d   :  { %4463 = vrot.lane.b32.xlu1 %v4461_v54, %s7489_s11 }
0x5d8f   :  { %v4464_v38 = vpop.permute.xlu1 %4463 }
0x5d90   :  { %6590 = vmatmul.mubr.msk.f32.vlgmr.msra.gmra.mrb[68].mxu0 %vm210_vm3, %v4464_v38 }
0x5d91   :  { %6986 = vmatpush3.bf16.msra.mxu0 %v6983_v13  ;;  %6611 = vmatprep.mubr.msk.f32.mxu0 %vm210_vm3, %v8239_v47  ;;  %v3865_v47 = vadd.f32 %v8230_v35, %v8261_v53 }
0x5d92   :  { %6988 = vmatprep.subr.bf16.mxu0 %v6987_v58 }
0x5d95   :  { %6990 = vmatpush3.bf16.msra.mxu0 %v6987_v58 }
0x5d96   :  { %7003 = vmatprep.subr.bf16.mxu0 %v7485_v1 }
0x5d98   :  { %6612 = vmatmul.mubr.msk.f32.vlgmr.msra.gmra.mrb[70].mxu0 %vm210_vm3, %v8265_v30 }
0x5d99   :  { %6614 = vmatprep.mubr.msk.f32.mxu0 %vm210_vm3, %v8281_v21  ;;  %7005 = vmatpush3.bf16.msra.mxu0 %v8355_v31 }
0x5d9a   :  { %7006 = vmatprep.subr.bf16.mxu0 %v7485_v1 }
0x5d9c   :  { %6615 = vmatmul.mubr.msk.f32.gmra.mrb[72].mxu0 %vm210_vm3, %v8297_v36 }
0x5d9d   :  { %6617 = vmatprep.mubr.msk.f32.mxu0 %vm210_vm3, %v4365_v48  ;;  %7008 = vmatpush3.bf16.msra.mxu0 %v8359_v49 }
0x5d9e   :  { %7015 = vmatprep.subr.bf16.mxu0 %v7485_v1 }
0x5da0   :  { %6618 = vmatmul.mubr.msk.f32.gmra.mrb[74].mxu0 %vm210_vm3, %v4464_v38 }
0x5e63   :  { %v4533_v55 = vpop.f32.mrb[68].mxu0 }
0x5e64   :  { %v4534_v12 = vadd.f32 %v4533_v55, %v3865_v47  ;;  %v6591_v56 = vpop.f32.mrb[69].mxu0 }
0x5e66   :  { %7353 = vtanh.f32 %v4534_v12  ;;  %v5730_v60 = vmul.f32 -1.442695, %v4534_v12 }
0x5e68   :  { %7355 = vpow2.f32 %v5730_v60 }
0x5e6b   :  { %v8339_v59 = vpop.f32.mrb[70].mxu0 }
0x5e6c   :  { %v4749_v30 = vpop.f32.mrb[71].mxu0 }
0x5e6d   :  { %v4750_v48 = vadd.f32 %v8384_v32, %v4749_v30  ;;  %v4755_v30 = vadd.f32 %v8339_v59, %v8384_v32 }
0x5e6f   :  { %v8341_v63 = vpop.f32.mrb[72].mxu0 }
0x5e70   :  { %v7354_v21 = vpop.eup %7353  ;;  %v8343_v57 = vpop.f32.mrb[73].mxu0 }
0x5e71   :  { %4546 = vrot.lane.b32.xlu0 %v7354_v21, %s7488_s10 }
0x5e72   :  { %v7356_v53 = vpop.eup %7355 }
0x5e73   :  { %v8346_v24 = vpop.f32.mrb[74].mxu0  ;;  %v4540_v5 = vadd.f32 1.0, %v7356_v53 }
0x5e74   :  { %v8348_v46 = vpop.f32.mrb[75].mxu0 }
0x5e75   :  { %7357 = vrcp.f32 %v4540_v5 }
0x5e7f   :  { %v7358_v0 = vpop.eup %7357 }
0x5e80   :  { %v4544_v36 = vmul.f32 %v7358_v0, %v4455_v33 }
0x5ee3   :  { %v4547_v22 = vpop.permute.xlu0 %4546 }
0x5ee4   :  { %v4549_v3 = vmul.f32 %v7358_v0, %v4547_v22 }
0x5ee6   :  { %4551 = vrot.lane.b32.xlu1 %v4549_v3, %s7489_s11 }
0x5f58   :  { %v4552_v41 = vpop.permute.xlu1 %4551 }
0x5f59   :  { %v8351_v14 = vadd.f32 %v4552_v41, %v4544_v36 }
0x5f5b   :  { %7359 = vtanh.f32 %v8351_v14 }
0x5f65   :  { %v7360_v62 = vpop.eup %7359 }
0x5f66   :  { %4557 = vrot.lane.b32.xlu0 %v7360_v62, %s7488_s10 }
0x5fd8   :  { %v4558_v4 = vpop.permute.xlu0 %4557 }
0x5fd9   :  { %v4560_v23 = vmul.f32 %v7358_v0, %v4558_v4 }
0x5fdb   :  { %4562 = vrot.lane.b32.xlu1 %v4560_v23, %s7489_s11 }
0x604d   :  { %v4563_v40 = vpop.permute.xlu1 %4562 }
0x604e   :  { %6601 = vmatmul.mubr.msk.f32.vlgmr.msra.gmra.mrb[48].mxu1 %vm210_vm3, %v4563_v40  ;;  %6620 = vmatprep.mubr.msk.f32.mxu0 %vm210_vm3, %v4563_v40 }
0x604f   :  { %6993 = vmatpush3.bf16.msra.mxu1 %v8355_v31  ;;  %6631 = vmatprep.mubr.msk.f32.mxu1 %vm7486_vm0, %v7487_v2 }
0x6050   :  { %6994 = vmatprep.subr.bf16.mxu1 %v7485_v1 }
0x6053   :  { %6996 = vmatpush3.bf16.msra.mxu1 %v8359_v49 }
0x6054   :  { %6997 = vmatprep.subr.bf16.mxu1 %v7485_v1 }
0x6056   :  { %6632 = vmatmul.mubr.f32.vlgmr.msra.gmra.mrb[50].mxu1 %v7487_v2 }
0x6057   :  { %6999 = vmatpush3.bf16.msra.mxu1 %v8355_v31  ;;  %6642 = vmatprep.mubr.msk.f32.mxu1 %vm7486_vm0, %v7487_v2 }
0x6058   :  { %7000 = vmatprep.subr.bf16.mxu1 %v7485_v1 }
0x605b   :  { %7002 = vmatpush3.bf16.msra.mxu1 %v8359_v49 }
0x605c   :  { %7009 = vmatprep.subr.bf16.mxu1 %v7485_v1 }
0x6121   :  { %v4632_v6 = vpop.f32.mrb[48].mxu1 }
0x6122   :  { %v4633_v16 = vadd.f32 %v4632_v6, %v3870_v20  ;;  %v6602_v9 = vpop.f32.mrb[49].mxu1  ;;  %v4760_v6 = vadd.f32 %v8384_v32, %v8343_v57 }
0x6124   :  { %v5732_v33 = vmul.f32 -1.442695, %v4633_v16 }
0x6129   :  { %v4854_v15 = vpop.f32.mrb[50].mxu1 }
0x612a   :  { %v4855_v26 = vadd.f32 %v4854_v15, %v4750_v48  ;;  %v6633_v19 = vpop.f32.mrb[51].mxu1 }
0x612c   :  { %7361 = vtanh.f32 %v4855_v26  ;;  %v5743_v25 = vmul.f32 -1.442695, %v4855_v26 }
0x612e   :  { %7363 = vpow2.f32 %v5743_v25 }
0x6136   :  { %v7362_v61 = vpop.eup %7361 }
0x6137   :  { %4867 = vrot.lane.b32.xlu0 %v7362_v61, %s7488_s10 }
0x6138   :  { %v7364_v35 = vpop.eup %7363 }
0x6139   :  { %v4861_v18 = vadd.f32 1.0, %v7364_v35 }
0x613b   :  { %7365 = vrcp.f32 %v4861_v18 }
0x6145   :  { %v7366_v17 = vpop.eup %7365 }
0x6146   :  { %v4865_v43 = vmul.f32 0.0, %v7366_v17 }
0x61a9   :  { %v4868_v37 = vpop.permute.xlu0 %4867 }
0x61aa   :  { %v4870_v29 = vmul.f32 %v7366_v17, %v4868_v37 }
0x61ac   :  { %4872 = vrot.lane.b32.xlu1 %v4870_v29, %s7489_s11 }
0x621e   :  { %v4873_v34 = vpop.permute.xlu1 %4872 }
0x621f   :  { %v4875_v11 = vadd.f32 %v4873_v34, %v4865_v43 }
0x6221   :  { %7367 = vtanh.f32 %v4875_v11 }
0x6222   :  { %7369 = vtanh.f32 %v4633_v16 }
0x6223   :  { %7371 = vpow2.f32 %v5732_v33 }
0x622b   :  { %v7368_v42 = vpop.eup %7367 }
0x622c   :  { %4878 = vrot.lane.b32.xlu0 %v7368_v42, %s7488_s10  ;;  %v7370_v28 = vpop.eup %7369  ;;  %v4765_v42 = vadd.f32 %v8341_v63, %v8384_v32 }
0x622d   :  { %v7372_v27 = vpop.eup %7371 }
0x622e   :  { %v4639_v45 = vadd.f32 1.0, %v7372_v27 }
0x6230   :  { %4645 = vrot.lane.b32.xlu0 %v7370_v28, %s7488_s10  ;;  %7373 = vrcp.f32 %v4639_v45 }
0x623a   :  { %v7374_v52 = vpop.eup %7373 }
0x623b   :  { %v4643_v58 = vmul.f32 %v7374_v52, %v8351_v14 }
0x629e   :  { %v4879_v13 = vpop.permute.xlu0 %4878 }
0x629f   :  { %v4881_v50 = vmul.f32 %v7366_v17, %v4879_v13 }
0x62a1   :  { %4883 = vrot.lane.b32.xlu1 %v4881_v50, %s7489_s11 }
0x62a2   :  { %v4646_v54 = vpop.permute.xlu0 %4645 }
0x62a3   :  { %v4648_v51 = vmul.f32 %v7374_v52, %v4646_v54 }
0x62a5   :  { %4650 = vrot.lane.b32.xlu0 %v4648_v51, %s7489_s11 }
0x6313   :  { %v4884_v39 = vpop.permute.xlu1 %4883 }
0x6314   :  { %6643 = vmatmul.mubr.msk.f32.vlgmr.msra.gmra.mrb[52].mxu1 %vm210_vm3, %v4884_v39 }
0x6315   :  { %7011 = vmatpush3.bf16.msra.mxu1 %v8355_v31  ;;  %6664 = vmatprep.mubr.msk.f32.mxu1 %vm7486_vm0, %v7487_v2 }
0x6316   :  { %7012 = vmatprep.subr.bf16.mxu1 %v7485_v1 }
0x6317   :  { %v4651_v38 = vpop.permute.xlu0 %4650 }
0x6318   :  { %v4653_v47 = vadd.f32 %v4651_v38, %v4643_v58 }
0x6319   :  { %7014 = vmatpush3.bf16.msra.mxu1 %v8359_v49 }
0x631a   :  { %7375 = vtanh.f32 %v4653_v47  ;;  %7021 = vmatprep.subr.bf16.mxu1 %v7485_v1 }
0x6324   :  { %v7376_v55 = vpop.eup %7375 }
0x6325   :  { %4656 = vrot.lane.b32.xlu0 %v7376_v55, %s7488_s10 }
0x6397   :  { %v4657_v12 = vpop.permute.xlu0 %4656 }
0x6398   :  { %v4659_v56 = vmul.f32 %v7374_v52, %v4657_v12 }
0x639a   :  { %4679 = vrot.lane.b32.xlu0 %v4659_v56, %s7489_s11 }
0x63e7   :  { %v4953_v21 = vpop.f32.mrb[52].mxu1 }
0x63e8   :  { %v4954_v60 = vadd.f32 %v4953_v21, %v4755_v30  ;;  %v6644_v53 = vpop.f32.mrb[53].mxu1  ;;  %v4770_v30 = vadd.f32 %v8384_v32, %v8348_v46 }
0x63ea   :  { %7377 = vtanh.f32 %v4954_v60  ;;  %v5745_v22 = vmul.f32 -1.442695, %v4954_v60 }
0x63ec   :  { %7379 = vpow2.f32 %v5745_v22 }
0x63f4   :  { %v7378_v5 = vpop.eup %7377 }
0x63f5   :  { %4966 = vrot.lane.b32.xlu1 %v7378_v5, %s7488_s10 }
0x63f6   :  { %v7380_v3 = vpop.eup %7379 }
0x63f7   :  { %v4960_v36 = vadd.f32 1.0, %v7380_v3 }
0x63f9   :  { %7381 = vrcp.f32 %v4960_v36 }
0x6403   :  { %v7382_v41 = vpop.eup %7381 }
0x6404   :  { %v4964_v62 = vmul.f32 %v7382_v41, %v4875_v11 }
0x640c   :  { %v4680_v0 = vpop.permute.xlu0 %4679 }
0x640d   :  { %6621 = vmatmul.mubr.msk.f32.gmra.mrb[76].mxu0 %vm210_vm3, %v4680_v0 }
0x640e   :  { %6653 = vmatprep.mubr.msk.f32.mxu0 %vm7486_vm0, %v7487_v2 }
0x6467   :  { %v4967_v59 = vpop.permute.xlu1 %4966 }
0x6468   :  { %v4969_v14 = vmul.f32 %v7382_v41, %v4967_v59 }
0x646a   :  { %4971 = vrot.lane.b32.xlu1 %v4969_v14, %s7489_s11 }
0x64dc   :  { %v4972_v10 = vpop.permute.xlu1 %4971 }
0x64dd   :  { %v4974_v7 = vadd.f32 %v4972_v10, %v4964_v62 }
0x64df   :  { %7383 = vtanh.f32 %v4974_v7 }
0x64e0   :  { %v8410_v8 = vpop.f32.mrb[76].mxu0 }
0x64e1   :  { %v8412_v44 = vpop.f32.mrb[77].mxu0 }
0x64e9   :  { %v7384_v4 = vpop.eup %7383 }
0x64ea   :  { %4977 = vrot.lane.b32.xlu1 %v7384_v4, %s7488_s10 }
0x655c   :  { %v4978_v23 = vpop.permute.xlu1 %4977 }
0x655d   :  { %v4980_v40 = vmul.f32 %v7382_v41, %v4978_v23 }
0x655f   :  { %4982 = vrot.lane.b32.xlu1 %v4980_v40, %s7489_s11  ;;  %v4775_v40 = vadd.f32 %v8346_v24, %v8384_v32 }
0x65d1   :  { %v4983_v20 = vpop.permute.xlu1 %4982 }
0x65d2   :  { %6654 = vmatmul.mubr.msk.f32.vlgmr.msra.gmra.mrb[78].mxu0 %vm210_vm3, %v4983_v20 }
0x65d3   :  { %7017 = vmatpush3.bf16.msra.mxu0 %v8355_v31  ;;  %6675 = vmatprep.mubr.msk.f32.mxu0 %vm7486_vm0, %v7487_v2 }
0x65d4   :  { %7018 = vmatprep.subr.bf16.mxu0 %v7485_v1 }
0x65d7   :  { %7020 = vmatpush3.bf16.msra.mxu0 %v8359_v49 }
0x65d8   :  { %7027 = vmatprep.subr.bf16.mxu0 %v7485_v1 }
0x66a5   :  { %v5052_v16 = vpop.f32.mrb[78].mxu0 }
0x66a6   :  { %v5053_v9 = vadd.f32 %v5052_v16, %v4760_v6  ;;  %v6655_v48 = vpop.f32.mrb[79].mxu0 }
0x66a8   :  { %7385 = vtanh.f32 %v5053_v9  ;;  %v5747_v26 = vmul.f32 -1.442695, %v5053_v9 }
0x66aa   :  { %7387 = vpow2.f32 %v5747_v26 }
0x66b2   :  { %v7386_v15 = vpop.eup %7385 }
0x66b3   :  { %5065 = vrot.lane.b32.xlu0 %v7386_v15, %s7488_s10 }
0x66b4   :  { %v7388_v19 = vpop.eup %7387 }
0x66b5   :  { %v5059_v61 = vadd.f32 1.0, %v7388_v19 }
0x66b7   :  { %7389 = vrcp.f32 %v5059_v61 }
0x66c1   :  { %v7390_v25 = vpop.eup %7389 }
0x66c2   :  { %v5063_v17 = vmul.f32 %v7390_v25, %v4974_v7 }
0x6725   :  { %v5066_v35 = vpop.permute.xlu0 %5065 }
0x6726   :  { %v5068_v18 = vmul.f32 %v7390_v25, %v5066_v35 }
0x6728   :  { %5070 = vrot.lane.b32.xlu1 %v5068_v18, %s7489_s11 }
0x679a   :  { %v5071_v37 = vpop.permute.xlu1 %5070 }
0x679b   :  { %v5073_v57 = vadd.f32 %v5071_v37, %v5063_v17  ;;  %v4780_v17 = vadd.f32 %v8384_v32, %v8412_v44 }
0x679d   :  { %7391 = vtanh.f32 %v5073_v57 }
0x67a7   :  { %v7392_v29 = vpop.eup %7391 }
0x67a8   :  { %5076 = vrot.lane.b32.xlu0 %v7392_v29, %s7488_s10 }
0x681a   :  { %v5077_v43 = vpop.permute.xlu0 %5076 }
0x681b   :  { %v5079_v34 = vmul.f32 %v7390_v25, %v5077_v43 }
0x681d   :  { %5081 = vrot.lane.b32.xlu1 %v5079_v34, %s7489_s11 }
0x688f   :  { %v5082_v11 = vpop.permute.xlu1 %5081 }
0x6890   :  { %6665 = vmatmul.mubr.msk.f32.vlgmr.msra.gmra.mrb[54].mxu1 %vm210_vm3, %v5082_v11 }
0x6891   :  { %7023 = vmatpush3.bf16.msra.mxu1 %v8355_v31  ;;  %6686 = vmatprep.mubr.msk.f32.mxu1 %vm7486_vm0, %v7487_v2 }
0x6892   :  { %7024 = vmatprep.subr.bf16.mxu1 %v7485_v1 }
0x6895   :  { %7026 = vmatpush3.bf16.msra.mxu1 %v8359_v49 }
0x6896   :  { %7033 = vmatprep.subr.bf16.mxu1 %v7485_v1 }
0x6963   :  { %v5151_v28 = vpop.f32.mrb[54].mxu1 }
0x6964   :  { %v5152_v33 = vadd.f32 %v5151_v28, %v4765_v42  ;;  %v6666_v27 = vpop.f32.mrb[55].mxu1 }
0x6966   :  { %7393 = vtanh.f32 %v5152_v33  ;;  %v5749_v13 = vmul.f32 -1.442695, %v5152_v33 }
0x6968   :  { %7395 = vpow2.f32 %v5749_v13 }
0x6970   :  { %v7394_v45 = vpop.eup %7393 }
0x6971   :  { %5164 = vrot.lane.b32.xlu0 %v7394_v45, %s7488_s10 }
0x6972   :  { %v7396_v50 = vpop.eup %7395 }
0x6973   :  { %v5158_v52 = vadd.f32 1.0, %v7396_v50 }
0x6975   :  { %7397 = vrcp.f32 %v5158_v52 }
0x697f   :  { %v7398_v54 = vpop.eup %7397 }
0x6980   :  { %v5162_v58 = vmul.f32 %v7398_v54, %v5073_v57 }
0x69e3   :  { %v5165_v51 = vpop.permute.xlu0 %5164 }
0x69e4   :  { %v5167_v39 = vmul.f32 %v7398_v54, %v5165_v51 }
0x69e6   :  { %5169 = vrot.lane.b32.xlu1 %v5167_v39, %s7489_s11  ;;  %v4785_v39 = vadd.f32 %v8410_v8, %v8384_v32  ;;  %v5758_v32 = vld [vmem:[%s8492_s5] ss:$0 sm:$0xff] }
0x6a58   :  { %v5170_v38 = vpop.permute.xlu1 %5169 }
0x6a59   :  { %v5172_v63 = vadd.f32 %v5170_v38, %v5162_v58 }
0x6a5b   :  { %7399 = vtanh.f32 %v5172_v63 }
0x6a65   :  { %v7400_v47 = vpop.eup %7399 }
0x6a66   :  { %5175 = vrot.lane.b32.xlu0 %v7400_v47, %s7488_s10 }
0x6ad8   :  { %v5176_v55 = vpop.permute.xlu0 %5175 }
0x6ad9   :  { %v5178_v12 = vmul.f32 %v7398_v54, %v5176_v55 }
0x6adb   :  { %5180 = vrot.lane.b32.xlu1 %v5178_v12, %s7489_s11 }
0x6b4d   :  { %v5181_v56 = vpop.permute.xlu1 %5180 }
0x6b4e   :  { %6676 = vmatmul.mubr.msk.f32.vlgmr.msra.gmra.mrb[80].mxu0 %vm210_vm3, %v5181_v56 }
0x6b4f   :  { %7029 = vmatpush3.bf16.msra.mxu0 %v8355_v31  ;;  %6697 = vmatprep.mubr.msk.f32.mxu0 %vm7486_vm0, %v7487_v2 }
0x6b50   :  { %7030 = vmatprep.subr.bf16.mxu0 %v7485_v1 }
0x6b53   :  { %7032 = vmatpush3.bf16.msra.mxu0 %v8359_v49 }
0x6c21   :  { %v5250_v21 = vpop.f32.mrb[80].mxu0 }
0x6c22   :  { %v5251_v60 = vadd.f32 %v5250_v21, %v4770_v30  ;;  %v6677_v53 = vpop.f32.mrb[81].mxu0 }
0x6c24   :  { %7401 = vtanh.f32 %v5251_v60  ;;  %v5751_v0 = vmul.f32 -1.442695, %v5251_v60 }
0x6c26   :  { %7403 = vpow2.f32 %v5751_v0 }
0x6c2e   :  { %v7402_v5 = vpop.eup %7401 }
0x6c2f   :  { %5263 = vrot.lane.b32.xlu0 %v7402_v5, %s7488_s10 }
0x6c30   :  { %v7404_v22 = vpop.eup %7403 }
0x6c31   :  { %v5257_v3 = vadd.f32 1.0, %v7404_v22 }
0x6c33   :  { %7405 = vrcp.f32 %v5257_v3 }
0x6c3d   :  { %v7406_v36 = vpop.eup %7405 }
0x6c3e   :  { %v5261_v14 = vmul.f32 %v7406_v36, %v5172_v63 }
0x6ca1   :  { %v5264_v41 = vpop.permute.xlu0 %5263 }
0x6ca2   :  { %v5266_v59 = vmul.f32 %v7406_v36, %v5264_v41 }
0x6ca4   :  { %5268 = vrot.lane.b32.xlu1 %v5266_v59, %s7489_s11 }
0x6d16   :  { %v5269_v62 = vpop.permute.xlu1 %5268 }
0x6d17   :  { %v5271_v46 = vadd.f32 %v5269_v62, %v5261_v14  ;;  %v5759_v62 = vld [vmem:[#allocation2] ss:$0 sm:$0xff] }
0x6d19   :  { %7407 = vtanh.f32 %v5271_v46 }
0x6d23   :  { %v7408_v10 = vpop.eup %7407 }
0x6d24   :  { %5274 = vrot.lane.b32.xlu0 %v7408_v10, %s7488_s10 }
0x6d96   :  { %v5275_v7 = vpop.permute.xlu0 %5274 }
0x6d97   :  { %v5277_v4 = vmul.f32 %v7406_v36, %v5275_v7 }
0x6d99   :  { %5279 = vrot.lane.b32.xlu1 %v5277_v4, %s7489_s11 }
0x6e0b   :  { %v5280_v23 = vpop.permute.xlu1 %5279 }
0x6e0c   :  { %6687 = vmatmul.mubr.msk.f32.vlgmr.msra.gmra.mrb[56].mxu1 %vm210_vm3, %v5280_v23 }
0x6e0d   :  { %7035 = vmatpush3.bf16.msra.mxu1 %v8355_v31  ;;  %6708 = vmatprep.mubr.msk.f32.mxu1 %vm7486_vm0, %v7487_v2 }
0x6e0e   :  { %7036 = vmatprep.subr.bf16.mxu1 %v7485_v1 }
0x6e11   :  { %7038 = vmatpush3.bf16.msra.mxu1 %v8359_v49 }
0x6edf   :  { %v5349_v20 = vpop.f32.mrb[56].mxu1 }
0x6ee0   :  { %v5350_v6 = vadd.f32 %v5349_v20, %v4775_v40  ;;  %v6688_v16 = vpop.f32.mrb[57].mxu1 }
0x6ee2   :  { %7409 = vtanh.f32 %v5350_v6  ;;  %v5753_v48 = vmul.f32 -1.442695, %v5350_v6 }
0x6ee4   :  { %7411 = vpow2.f32 %v5753_v48 }
0x6eec   :  { %v7410_v9 = vpop.eup %7409 }
0x6eed   :  { %5362 = vrot.lane.b32.xlu0 %v7410_v9, %s7488_s10 }
0x6eee   :  { %v7412_v31 = vpop.eup %7411 }
0x6eef   :  { %v5356_v15 = vadd.f32 1.0, %v7412_v31 }
0x6ef1   :  { %7413 = vrcp.f32 %v5356_v15 }
0x6efb   :  { %v7414_v2 = vpop.eup %7413 }
0x6efc   :  { %v5360_v49 = vmul.f32 %v7414_v2, %v5271_v46 }
0x6f5f   :  { %v5363_v26 = vpop.permute.xlu0 %5362 }
0x6f60   :  { %v5365_v1 = vmul.f32 %v7414_v2, %v5363_v26 }
0x6f62   :  { %5367 = vrot.lane.b32.xlu1 %v5365_v1, %s7489_s11 }
0x6fd4   :  { %v5368_v19 = vpop.permute.xlu1 %5367 }
0x6fd5   :  { %v5370_v24 = vadd.f32 %v5368_v19, %v5360_v49 }
0x6fd7   :  { %7415 = vtanh.f32 %v5370_v24 }
0x6fe1   :  { %v7416_v61 = vpop.eup %7415 }
0x6fe2   :  { %5373 = vrot.lane.b32.xlu0 %v7416_v61, %s7488_s10 }
0x7054   :  { %v5374_v25 = vpop.permute.xlu0 %5373 }
0x7055   :  { %v5376_v35 = vmul.f32 %v7414_v2, %v5374_v25 }
0x7057   :  { %5378 = vrot.lane.b32.xlu1 %v5376_v35, %s7489_s11 }
0x70c9   :  { %v5379_v18 = vpop.permute.xlu1 %5378 }
0x70ca   :  { %6698 = vmatmul.mubr.msk.f32.vlgmr.msra.gmra.mrb[82].mxu0 %vm210_vm3, %v5379_v18 }
0x719d   :  { %v5448_v37 = vpop.f32.mrb[82].mxu0 }
0x719e   :  { %v5449_v57 = vadd.f32 %v5448_v37, %v4780_v17  ;;  %v6699_v29 = vpop.f32.mrb[83].mxu0 }
0x71a0   :  { %7417 = vtanh.f32 %v5449_v57  ;;  %v5755_v34 = vmul.f32 -1.442695, %v5449_v57 }
0x71a2   :  { %7419 = vpow2.f32 %v5755_v34 }
0x71aa   :  { %v7418_v43 = vpop.eup %7417 }
0x71ab   :  { %5461 = vrot.lane.b32.xlu0 %v7418_v43, %s7488_s10 }
0x71ac   :  { %v7420_v11 = vpop.eup %7419 }
0x71ad   :  { %v5455_v42 = vadd.f32 1.0, %v7420_v11 }
0x71af   :  { %7421 = vrcp.f32 %v5455_v42 }
0x71b9   :  { %v7422_v28 = vpop.eup %7421 }
0x71ba   :  { %v5459_v45 = vmul.f32 %v7422_v28, %v5370_v24 }
0x721d   :  { %v5462_v33 = vpop.permute.xlu0 %5461 }
0x721e   :  { %v5464_v27 = vmul.f32 %v7422_v28, %v5462_v33 }
0x7220   :  { %5466 = vrot.lane.b32.xlu1 %v5464_v27, %s7489_s11 }
0x7292   :  { %v5467_v13 = vpop.permute.xlu1 %5466 }
0x7293   :  { %v5469_v44 = vadd.f32 %v5467_v13, %v5459_v45 }
0x7295   :  { %7423 = vtanh.f32 %v5469_v44 }
0x729f   :  { %v7424_v50 = vpop.eup %7423 }
0x72a0   :  { %5472 = vrot.lane.b32.xlu0 %v7424_v50, %s7488_s10 }
0x7312   :  { %v5473_v52 = vpop.permute.xlu0 %5472 }
0x7313   :  { %v5475_v54 = vmul.f32 %v7422_v28, %v5473_v52 }
0x7315   :  { %5477 = vrot.lane.b32.xlu1 %v5475_v54, %s7489_s11 }
0x7387   :  { %v5478_v51 = vpop.permute.xlu1 %5477 }
0x7388   :  { %6709 = vmatmul.mubr.msk.f32.vlgmr.msra.gmra.mrb[58].mxu1 %vm210_vm3, %v5478_v51 }
0x745b   :  { %v5547_v58 = vpop.f32.mrb[58].mxu1 }
0x745c   :  { %v5548_v38 = vadd.f32 %v5547_v58, %v4785_v39  ;;  %v6710_v63 = vpop.f32.mrb[59].mxu1 }
0x745e   :  { %7425 = vtanh.f32 %v5548_v38  ;;  %v5757_v55 = vmul.f32 -1.442695, %v5548_v38 }
0x7460   :  { %7427 = vpow2.f32 %v5757_v55 }
0x7468   :  { %v7426_v47 = vpop.eup %7425 }
0x7469   :  { %5560 = vrot.lane.b32.xlu0 %v7426_v47, %s7488_s10 }
0x746a   :  { %v7428_v12 = vpop.eup %7427 }
0x746b   :  { %v5554_v56 = vadd.f32 1.0, %v7428_v12 }
0x746d   :  { %7429 = vrcp.f32 %v5554_v56 }
0x7477   :  { %v7430_v30 = vpop.eup %7429 }
0x7478   :  { %v5558_v8 = vmul.f32 %v7430_v30, %v5469_v44 }
0x74db   :  { %v5561_v21 = vpop.permute.xlu0 %5560 }
0x74dc   :  { %v5563_v60 = vmul.f32 %v7430_v30, %v5561_v21 }
0x74de   :  { %5565 = vrot.lane.b32.xlu1 %v5563_v60, %s7489_s11 }
0x74e2   :  { %5581 = vrot.lane.b32.xlu1 %v5758_v32, %s7490_s8 }
0x7550   :  { %v5566_v53 = vpop.permute.xlu1 %5565 }
0x7551   :  { %v5568_v5 = vadd.f32 %v5566_v53, %v5558_v8 }
0x7553   :  { %7431 = vtanh.f32 %v5568_v5 }
0x7554   :  { %v5582_v3 = vpop.permute.xlu1 %5581 }
0x755d   :  { %v7432_v0 = vpop.eup %7431 }
0x755e   :  { %5571 = vrot.lane.b32.xlu0 %v7432_v0, %s7488_s10 }
0x75d0   :  { %v5572_v22 = vpop.permute.xlu0 %5571 }
0x75d1   :  { %v5574_v36 = vmul.f32 %v7430_v30, %v5572_v22 }
0x75d3   :  { %v5584_v41 = vmul.f32 %v5582_v3, %v5574_v36 }
0x75d5   :  { %5586 = vrot.lane.b32.xlu0 %v5584_v41, %s7489_s11 }
0x7647   :  { %v5587_v59 = vpop.permute.xlu0 %5586 }
0x7648   :  { %v5589_v14 = vsel %vm210_vm3, %v5587_v59, 0.0 }
0x7649   :  { %5590 = vadd.xlane.f32.xlu1 %v5589_v14 }
0x76d6   :  { %v5591_v46 = vpop.xlane.xlu1 %5590 }
0x76d7   :  { %v5599_v10 = vadd.f32 %v5759_v62, %v5591_v46 }
0x76d9   :  { %5601 = vst.msk [vmem:[%s8494_s7] sm:$0xff] %vm5600_vm4, %v5599_v10 }
0x76da   :  { %5606 = vsyncpa [#allocation4], 1 }
0x76db   :  { %5607 = vsyncpa [#allocation6], 1 }

</bundles_post_ra>
